<compile_context>
chip_gen: v7x
topology: tpu7x:2x2x1
jax: 0.10.0
libtpu: 0.0.40
codegen_flags: <defaults>
</compile_context>

<pallas_src>
import functools

import jax
import jax.numpy as jnp
from jax.experimental import pallas as pl
from jax.experimental.pallas import tpu as pltpu

# ---- small, module-consistent hyperparameters (scaled-down) -----------------
MAX_LENGTH = 8
ENC_EMB_DIM = 16
DEC_EMB_DIM = 16
ENC_HID_DIM = 32          # bidirectional encoder: 2 x (ENC_HID_DIM // 2)
DEC_HID_DIM = 32
INPUT_DIM = 12            # source vocab size
OUTPUT_DIM = 10           # target vocab size
V_PAD = 128               # lane-dense padded target vocab (argmax-safe via -1e30 pad bias)
ATTN_AUG = 8              # attn-bias fold padding (keeps contraction dim 8-aligned)
START_TOKEN = 1           # lang_th_romanized.char2index['<start>']
PAD_IDX = 0


# =============================== kernels =====================================
def encoder_kernel(x_ref, valid_ref, wih_ref, whh_ref, b_ref, dirm_ref,
                   out_ref, hfin_ref, cfin_ref, *, T, B2, Hd):
    """Bidirectional (fwd+bwd batch-stacked) LSTM encoder, whole sequence in one invocation.

    x_ref    : (T*2B, 2E)  bf16  block-diagonal packed inputs, time-major
    valid_ref: (T, 2B, 1)  f32   1.0 while t < length (per row)
    wih_ref  : (2E, 4Hd)   bf16  [W_ih_fwd ; W_ih_bwd] stacked along K (block-diag with x)
    whh_ref  : (Hd, 8Hd)   bf16  [W_hh_fwd | W_hh_bwd] stacked along N
    b_ref    : (2B, 4Hd)   f32   per-row (direction-dependent) bias
    dirm_ref : (2B, 1)     f32   1.0 for forward rows, 0.0 for backward rows
    """
    # hoisted: input projection for ALL timesteps as one MXU dot (off the serial chain)
    x_proj = jnp.dot(x_ref[...], wih_ref[...],
                     preferred_element_type=jnp.float32)            # (T*2B, 4Hd)
    whh = whh_ref[...]
    b = b_ref[...]
    dirm = dirm_ref[...]

    h = jnp.zeros((B2, Hd), jnp.float32)
    c = jnp.zeros((B2, Hd), jnp.float32)
    for t in range(T):                                              # unrolled serial recurrence
        v_t = valid_ref[t]                                          # (2B, 1)
        hh2 = jnp.dot(h.astype(jnp.bfloat16), whh,
                      preferred_element_type=jnp.float32)           # (2B, 8Hd), one MXU push
        hh = jnp.where(dirm > 0.0, hh2[:, :4 * Hd], hh2[:, 4 * Hd:])
        gates = x_proj[t * B2:(t + 1) * B2] + hh + b                # (2B, 4Hd)

        # full-vreg nonlinearities (EUP), then static slices for recombination
        sig = jax.nn.sigmoid(gates)
        tnh = jnp.tanh(gates)
        i_g = sig[:, 0 * Hd:1 * Hd]
        f_g = sig[:, 1 * Hd:2 * Hd]
        g_g = tnh[:, 2 * Hd:3 * Hd]
        o_g = sig[:, 3 * Hd:4 * Hd]

        c_new = f_g * c + i_g * g_g
        h_new = o_g * jnp.tanh(c_new)

        out_ref[t] = v_t * h_new                                    # pad_packed -> zeros past len
        h = v_t * h_new + (1.0 - v_t) * h                           # hold state past length
        c = v_t * c_new + (1.0 - v_t) * c

    hfin_ref[...] = h
    cfin_ref[...] = c


def decoder_kernel(h0_ref, c0_ref, enc_flat_ref, enc_t_ref, mbias_ref,
                   w_in_ref, b_lstm_ref, w_attn_ref, w_out_ref, b_out_ref,
                   logits_ref, state_sc, *, steps, B, H, Vp, start_token):
    """Greedy decoder (LSTM cell + 'general' attention + output proj), all steps fused.

    enc_flat_ref: (B*S, H)     bf16  encoder outputs, row index = b*S + s
    enc_t_ref   : (H+AUG, B*S) bf16  transposed enc outputs + ones row (attn-bias fold)
    mbias_ref   : (B, B*S)     f32   additive mask: 0 valid, -1e10 for pad / other-batch cols
    w_in_ref    : (Vp+2H, 4H)  bf16  [emb_pad @ W_ih_emb ; W_ih_ctx ; W_hh]
    w_attn_ref  : (H, H+AUG)   bf16  [W_a | b_a | 0]
    w_out_ref   : (2H, Vp)     bf16  [W_out_ctx ; W_out_h], lanes >= V are zero
    b_out_ref   : (1, Vp)      f32   output bias, lanes >= V set to -1e30
    state_sc    : (B, Vp+2H)   f32   fused LSTM input [one-hot | context | h]
    """
    col = jax.lax.broadcasted_iota(jnp.int32, (B, Vp), 1)

    # init fused input state: one-hot(<start>), zero context, encoder-final hidden
    state_sc[:, :Vp] = (col == start_token).astype(jnp.float32)
    state_sc[:, Vp:Vp + H] = jnp.zeros((B, H), jnp.float32)
    state_sc[:, Vp + H:] = h0_ref[...]
    c = c0_ref[...]

    # hoisted loop-invariant loads / broadcasts
    enc_flat = enc_flat_ref[...]
    enc_t = enc_t_ref[...]
    mbias = mbias_ref[...]
    w_in = w_in_ref[...]
    w_attn = w_attn_ref[...]
    w_out = w_out_ref[...]
    b_lstm = jnp.broadcast_to(b_lstm_ref[...], (B, b_lstm_ref.shape[1]))
    b_out = jnp.broadcast_to(b_out_ref[...], (B, Vp))

    for t in range(steps):                                           # unrolled greedy decode
        # fused LSTM gates: ONE dot over [one-hot | context | h]; embedding lookup is folded
        # into w_in (one-hot rows of the fused weight), dropout = identity.
        st = state_sc[...].astype(jnp.bfloat16)                      # (B, Vp+2H)
        gates = jnp.dot(st, w_in, preferred_element_type=jnp.float32) + b_lstm   # (B, 4H)
        sig = jax.nn.sigmoid(gates)
        tnh = jnp.tanh(gates)
        i_g = sig[:, 0 * H:1 * H]
        f_g = sig[:, 1 * H:2 * H]
        g_g = tnh[:, 2 * H:3 * H]
        o_g = sig[:, 3 * H:4 * H]
        c = f_g * c + i_g * g_g
        h_new = o_g * jnp.tanh(c)                                    # (B, H)

        # Attn(method='general'): energies[b,s] = (W_a enc[b,s] + b_a) . h_new[b]
        qb = jnp.dot(h_new.astype(jnp.bfloat16), w_attn,
                     preferred_element_type=jnp.float32)             # (B, H+AUG)
        energies = jnp.dot(qb.astype(jnp.bfloat16), enc_t,
                           preferred_element_type=jnp.float32) + mbias   # (B, B*S)
        energies = energies - jnp.max(energies, axis=1, keepdims=True)
        e = jnp.exp(energies)
        attn = e / jnp.sum(e, axis=1, keepdims=True)                 # exact softmax (dim=1)
        context = jnp.dot(attn.astype(jnp.bfloat16), enc_flat,
                          preferred_element_type=jnp.float32)        # (B, H)

        # stash context / h: the tail of the fused state doubles as the output-proj input
        state_sc[:, Vp:Vp + H] = context
        state_sc[:, Vp + H:] = h_new
        out_in = state_sc[:, Vp:].astype(jnp.bfloat16)               # (B, 2H) = [context | h]
        logits = jnp.dot(out_in, w_out,
                         preferred_element_type=jnp.float32) + b_out  # (B, Vp) lane-dense
        logits_ref[t] = logits

        # greedy feedback (topk(1), teacher forcing off): first argmax index as one-hot
        mx = jnp.max(logits, axis=1, keepdims=True)
        cand = jnp.where(logits >= mx, col, Vp)
        tok = jnp.min(cand, axis=1, keepdims=True)                   # (B, 1)
        state_sc[:, :Vp] = (col == tok).astype(jnp.float32)


# ================================ glue =======================================
def run_encoder(params, src_tokens, seq_lens):
    """Bidirectional encoder; both directions batch-stacked into one single-shot kernel."""
    B, T = src_tokens.shape
    Hd = ENC_HID_DIM // 2

    emb = jnp.take(params['enc_emb'], src_tokens, axis=0)              # (B, T, E)
    lens = seq_lens.astype(jnp.int32)
    t_idx = jnp.arange(T, dtype=jnp.int32)
    valid = (t_idx[None, :] < lens[:, None]).astype(jnp.float32)       # (B, T)

    # backward direction: reverse each sequence within its own length
    rev_idx = jnp.clip(lens[:, None] - 1 - t_idx[None, :], 0, T - 1)   # (B, T)
    emb_rev = jnp.take_along_axis(emb, rev_idx[:, :, None], axis=1)

    # stack directions on the batch axis, block-diagonal on the feature axis
    zeros_e = jnp.zeros_like(emb)
    x_f = jnp.concatenate([emb, zeros_e], axis=-1)                     # (B, T, 2E)
    x_b = jnp.concatenate([zeros_e, emb_rev], axis=-1)
    x = jnp.swapaxes(jnp.concatenate([x_f, x_b], axis=0), 0, 1)        # (T, 2B, 2E)
    x_flat = x.reshape(T * 2 * B, 2 * ENC_EMB_DIM).astype(jnp.bfloat16)

    valid_st = jnp.swapaxes(jnp.concatenate([valid, valid], axis=0), 0, 1)[:, :, None]  # (T,2B,1)

    b_stacked = jnp.concatenate(
        [jnp.broadcast_to(params['enc_b_f'], (B, 4 * Hd)),
         jnp.broadcast_to(params['enc_b_b'], (B, 4 * Hd))], axis=0)    # (2B, 4Hd)
    dir_mask = jnp.concatenate(
        [jnp.ones((B, 1), jnp.float32), jnp.zeros((B, 1), jnp.float32)], axis=0)  # (2B, 1)

    out, hfin, cfin = pl.pallas_call(
        functools.partial(encoder_kernel, T=T, B2=2 * B, Hd=Hd),
        out_shape=(jax.ShapeDtypeStruct((T, 2 * B, Hd), jnp.float32),
                   jax.ShapeDtypeStruct((2 * B, Hd), jnp.float32),
                   jax.ShapeDtypeStruct((2 * B, Hd), jnp.float32)),
    )(x_flat, valid_st, params['enc_wih_bd'], params['enc_whh_cat'],
      b_stacked, dir_mask)

    out = jnp.swapaxes(out, 0, 1)                                      # (2B, T, Hd)
    out_f = out[:B]
    out_b = jnp.take_along_axis(out[B:], rev_idx[:, :, None], axis=1) * valid[:, :, None]
    enc_outputs = jnp.concatenate([out_f, out_b], axis=-1)             # (B, T, H)
    h_cat = jnp.concatenate([hfin[:B], hfin[B:]], axis=1)              # (B, H)
    c_cat = jnp.concatenate([cfin[:B], cfin[B:]], axis=1)              # (B, H)
    return enc_outputs, (h_cat, c_cat)


def run_decoder(params, enc_outputs, dec_h, dec_c, mask, max_len):
    """Whole greedy decode loop fused into ONE single-shot pallas_call."""
    B, S, H = enc_outputs.shape
    Vp = V_PAD

    enc_flat = enc_outputs.reshape(B * S, H)
    enc_flat_bf = enc_flat.astype(jnp.bfloat16)                        # (B*S, H)
    enc_t_aug = jnp.concatenate(
        [enc_flat.T,
         jnp.ones((1, B * S), jnp.float32),
         jnp.zeros((ATTN_AUG - 1, B * S), jnp.float32)],
        axis=0).astype(jnp.bfloat16)                                   # (H+AUG, B*S)

    # flattened-attention mask: valid iff same batch row AND not a pad position
    same_b = jnp.eye(B, dtype=jnp.float32)[:, :, None]                 # (B, B, 1)
    valid_flat = (same_b * mask[None, :, :]).reshape(B, B * S)         # (B, B*S)
    mask_bias = (1.0 - valid_flat) * (-1e10)

    logits = pl.pallas_call(
        functools.partial(decoder_kernel, steps=max_len, B=B, H=H, Vp=Vp,
                          start_token=START_TOKEN),
        out_shape=jax.ShapeDtypeStruct((max_len, B, Vp), jnp.float32),
        scratch_shapes=[pltpu.VMEM((B, Vp + 2 * H), jnp.float32)],     # fused [onehot|ctx|h]
    )(dec_h, dec_c, enc_flat_bf, enc_t_aug, mask_bias,
      params['dec_w_in'], params['dec_b'], params['attn_w_aug'],
      params['dec_w_out'], params['dec_b_out'])
    return logits[:, :, :OUTPUT_DIM]                                   # drop lane padding


def seq2seq_forward(params, source_seq, source_seq_len):
    """Seq2Seq.forward with target_seq=None semantics, teacher_forcing_ratio=0."""
    # replicate Encoder's length handling: lengths sorted descending, assigned positionally
    lens_sorted = jnp.sort(source_seq_len)[::-1]
    enc_outputs, (h_cat, c_cat) = run_encoder(params, source_seq, lens_sorted)
    mask = (source_seq[:, :enc_outputs.shape[1]] != PAD_IDX).astype(jnp.float32)
    outputs = run_decoder(params, enc_outputs, h_cat, c_cat, mask, MAX_LENGTH)
    return outputs                                                     # (MAX_LENGTH, B, OUTPUT_DIM)


# ============================ parameter init =================================
def init_params(key):
    Hd = ENC_HID_DIM // 2
    H = DEC_HID_DIM
    V = OUTPUT_DIM
    ks = iter(jax.random.split(key, 24))

    def u(shape, scale):
        return jax.random.uniform(next(ks), shape, jnp.float32, -scale, scale)

    s_enc = 1.0 / (Hd ** 0.5)
    s_dec = 1.0 / (H ** 0.5)
    return {
        # encoder
        'enc_emb':    jax.random.normal(next(ks), (INPUT_DIM, ENC_EMB_DIM), jnp.float32),
        'enc_wih_f':  u((ENC_EMB_DIM, 4 * Hd), s_enc),
        'enc_whh_f':  u((Hd, 4 * Hd), s_enc),
        'enc_b_f':    u((1, 4 * Hd), s_enc),          # bias_ih + bias_hh combined
        'enc_wih_b':  u((ENC_EMB_DIM, 4 * Hd), s_enc),
        'enc_whh_b':  u((Hd, 4 * Hd), s_enc),
        'enc_b_b':    u((1, 4 * Hd), s_enc),
        # decoder
        'dec_emb':    jax.random.normal(next(ks), (V, DEC_EMB_DIM), jnp.float32),
        'dec_wih_e':  u((DEC_EMB_DIM, 4 * H), s_dec),
        'dec_wih_c':  u((H, 4 * H), s_dec),
        'dec_whh':    u((H, 4 * H), s_dec),
        'dec_b':      u((1, 4 * H), s_dec),
        'attn_w':     u((H, H), s_dec),
        'attn_b':     u((H, 1), s_dec),
        'dec_wout_c': u((H, OUTPUT_DIM), s_dec),
        'dec_wout_h': u((H, OUTPUT_DIM), s_dec),
        'dec_bout':   u((1, OUTPUT_DIM), s_dec),
    }


def fuse_params(p):
    """Host-side, one-time weight fusion / padding / bf16 cast for the kernels."""
    H = DEC_HID_DIM
    V = OUTPUT_DIM
    Vp = V_PAD
    f = {'enc_emb': p['enc_emb'],
         'enc_b_f': p['enc_b_f'],
         'enc_b_b': p['enc_b_b'],
         'dec_b':   p['dec_b']}
    # encoder: K-stacked (block-diag) input weight, N-stacked hidden weights
    f['enc_wih_bd'] = jnp.concatenate([p['enc_wih_f'], p['enc_wih_b']],
                                      axis=0).astype(jnp.bfloat16)          # (2E, 4Hd)
    f['enc_whh_cat'] = jnp.concatenate([p['enc_whh_f'], p['enc_whh_b']],
                                       axis=1).astype(jnp.bfloat16)         # (Hd, 8Hd)
    # decoder: fold embedding into W_ih and fuse the three LSTM-input matmuls
    emb_pad = jnp.zeros((Vp, DEC_EMB_DIM), jnp.float32).at[:V].set(p['dec_emb'])
    w_onehot = emb_pad @ p['dec_wih_e']                                      # (Vp, 4H)
    f['dec_w_in'] = jnp.concatenate([w_onehot, p['dec_wih_c'], p['dec_whh']],
                                    axis=0).astype(jnp.bfloat16)             # (Vp+2H, 4H)
    # attention: bias folded via augmented columns (padded to 8 for tile alignment)
    f['attn_w_aug'] = jnp.concatenate(
        [p['attn_w'], p['attn_b'], jnp.zeros((H, ATTN_AUG - 1), jnp.float32)],
        axis=1).astype(jnp.bfloat16)                                         # (H, H+AUG)
    # output projection: fused [ctx ; h] weight, lane-dense padded vocab
    f['dec_w_out'] = jnp.concatenate(
        [jnp.pad(p['dec_wout_c'], ((0, 0), (0, Vp - V))),
         jnp.pad(p['dec_wout_h'], ((0, 0), (0, Vp - V)))],
        axis=0).astype(jnp.bfloat16)                                         # (2H, Vp)
    f['dec_b_out'] = jnp.full((1, Vp), -1e30, jnp.float32).at[:, :V].set(p['dec_bout'])
    return f


# ================================= main ======================================
if __name__ == "__main__":
    key = jax.random.PRNGKey(0)
    pkey, dkey = jax.random.split(key)
    params = fuse_params(init_params(pkey))

    B = 8
    lengths = jnp.array([8, 8, 7, 6, 5, 4, 3, 2], dtype=jnp.int32)          # sorted descending
    toks = jax.random.randint(dkey, (B, MAX_LENGTH), 1, INPUT_DIM, dtype=jnp.int32)
    t_idx = jnp.arange(MAX_LENGTH, dtype=jnp.int32)
    source_seq = jnp.where(t_idx[None, :] < lengths[:, None], toks, PAD_IDX).astype(jnp.int32)

    fwd = jax.jit(seq2seq_forward)
    out = fwd(params, source_seq, lengths)
    out = jax.block_until_ready(out)

    assert out.shape == (MAX_LENGTH, B, OUTPUT_DIM), out.shape
    assert out.dtype == jnp.float32
    assert bool(jnp.all(jnp.isfinite(out)))
    print("KERNEL_OK")
</pallas_src>

<mosaic_0001>
module attributes {stable_mosaic.version = 11 : i64} {
  func.func @encoder_kernel(%arg0: memref<128x32xbf16, #tpu.memory_space<vmem>>, %arg1: memref<8x16x1xf32, #tpu.memory_space<vmem>>, %arg2: memref<32x64xbf16, #tpu.memory_space<vmem>>, %arg3: memref<16x128xbf16, #tpu.memory_space<vmem>>, %arg4: memref<16x64xf32, #tpu.memory_space<vmem>>, %arg5: memref<16x1xf32, #tpu.memory_space<vmem>>, %arg6: memref<8x16x16xf32, #tpu.memory_space<vmem>>, %arg7: memref<16x16xf32, #tpu.memory_space<vmem>>, %arg8: memref<16x16xf32, #tpu.memory_space<vmem>>) attributes {dimension_semantics = [], scalar_prefetch = 0 : i64, scratch_operands = 0 : i64, tpu.core_type = #tpu.core_type<tc>} {
    %c0 = arith.constant 0 : index
    %c0_0 = arith.constant 0 : index
    %0 = vector.load %arg0[%c0, %c0_0] : memref<128x32xbf16, #tpu.memory_space<vmem>>, vector<128x32xbf16>
    %c0_1 = arith.constant 0 : index
    %c0_2 = arith.constant 0 : index
    %1 = vector.load %arg2[%c0_1, %c0_2] : memref<32x64xbf16, #tpu.memory_space<vmem>>, vector<32x64xbf16>
    %cst = arith.constant dense<0.000000e+00> : vector<128x64xf32>
    %2 = tpu.matmul %0, %1, %cst {dimension_numbers = #tpu.dot_dimension_numbers<[1], [0], [0], [1], [0, 0, 1, 1], [], []>} : vector<128x32xbf16>, vector<32x64xbf16>, vector<128x64xf32> -> vector<128x64xf32>
    %c0_3 = arith.constant 0 : index
    %c0_4 = arith.constant 0 : index
    %3 = vector.load %arg3[%c0_3, %c0_4] : memref<16x128xbf16, #tpu.memory_space<vmem>>, vector<16x128xbf16>
    %c0_5 = arith.constant 0 : index
    %c0_6 = arith.constant 0 : index
    %4 = vector.load %arg4[%c0_5, %c0_6] : memref<16x64xf32, #tpu.memory_space<vmem>>, vector<16x64xf32>
    %c0_7 = arith.constant 0 : index
    %c0_8 = arith.constant 0 : index
    %5 = vector.load %arg5[%c0_7, %c0_8] : memref<16x1xf32, #tpu.memory_space<vmem>>, vector<16x1xf32>
    %cst_9 = arith.constant 0.000000e+00 : f32
    %6 = vector.broadcast %cst_9 : f32 to vector<16x16xf32>
    %cst_10 = arith.constant 0.000000e+00 : f32
    %7 = vector.broadcast %cst_10 : f32 to vector<16x16xf32>
    %c0_11 = arith.constant 0 : index
    %c0_12 = arith.constant 0 : index
    %c0_13 = arith.constant 0 : index
    %8 = vector.load %arg1[%c0_11, %c0_12, %c0_13] : memref<8x16x1xf32, #tpu.memory_space<vmem>>, vector<1x16x1xf32>
    %9 = vector.shape_cast %8 : vector<1x16x1xf32> to vector<16x1xf32>
    %10 = arith.truncf %6 : vector<16x16xf32> to vector<16x16xbf16>
    %cst_14 = arith.constant dense<0.000000e+00> : vector<16x128xf32>
    %11 = tpu.matmul %10, %3, %cst_14 {dimension_numbers = #tpu.dot_dimension_numbers<[1], [0], [0], [1], [0, 0, 1, 1], [], []>} : vector<16x16xbf16>, vector<16x128xbf16>, vector<16x128xf32> -> vector<16x128xf32>
    %cst_15 = arith.constant 0.000000e+00 : f32
    %12 = vector.broadcast %cst_15 : f32 to vector<16x1xf32>
    %13 = arith.cmpf ogt, %5, %12 : vector<16x1xf32>
    %14 = vector.extract_strided_slice %11 {offsets = [0, 0], sizes = [16, 64], strides = [1, 1]} : vector<16x128xf32> to vector<16x64xf32>
    %15 = vector.extract_strided_slice %11 {offsets = [0, 64], sizes = [16, 64], strides = [1, 1]} : vector<16x128xf32> to vector<16x64xf32>
    %16 = vector.shape_cast %13 : vector<16x1xi1> to vector<16x1xi1>
    %17 = vector.broadcast %16 : vector<16x1xi1> to vector<16x64xi1>
    %18 = arith.select %17, %14, %15 : vector<16x64xi1>, vector<16x64xf32>
    %19 = vector.extract_strided_slice %2 {offsets = [0, 0], sizes = [16, 64], strides = [1, 1]} : vector<128x64xf32> to vector<16x64xf32>
    %20 = arith.addf %19, %18 : vector<16x64xf32>
    %21 = arith.addf %20, %4 : vector<16x64xf32>
    %22 = arith.negf %21 : vector<16x64xf32>
    %23 = math.exp %22 : vector<16x64xf32>
    %cst_16 = arith.constant 1.000000e+00 : f32
    %24 = vector.broadcast %cst_16 : f32 to vector<16x64xf32>
    %25 = arith.addf %24, %23 : vector<16x64xf32>
    %26 = arith.divf %24, %25 : vector<16x64xf32>
    %27 = math.tanh %21 : vector<16x64xf32>
    %28 = vector.extract_strided_slice %26 {offsets = [0, 0], sizes = [16, 16], strides = [1, 1]} : vector<16x64xf32> to vector<16x16xf32>
    %29 = vector.extract_strided_slice %26 {offsets = [0, 16], sizes = [16, 16], strides = [1, 1]} : vector<16x64xf32> to vector<16x16xf32>
    %30 = vector.extract_strided_slice %27 {offsets = [0, 32], sizes = [16, 16], strides = [1, 1]} : vector<16x64xf32> to vector<16x16xf32>
    %31 = vector.extract_strided_slice %26 {offsets = [0, 48], sizes = [16, 16], strides = [1, 1]} : vector<16x64xf32> to vector<16x16xf32>
    %32 = arith.mulf %29, %7 : vector<16x16xf32>
    %33 = arith.mulf %28, %30 : vector<16x16xf32>
    %34 = arith.addf %32, %33 : vector<16x16xf32>
    %35 = math.tanh %34 : vector<16x16xf32>
    %36 = arith.mulf %31, %35 : vector<16x16xf32>
    %37 = vector.broadcast %9 : vector<16x1xf32> to vector<16x16xf32>
    %38 = arith.mulf %37, %36 : vector<16x16xf32>
    %c0_17 = arith.constant 0 : index
    %c0_18 = arith.constant 0 : index
    %c0_19 = arith.constant 0 : index
    %39 = vector.load %arg6[%c0_17, %c0_18, %c0_19] : memref<8x16x16xf32, #tpu.memory_space<vmem>>, vector<1x16x16xf32>
    %40 = vector.shape_cast %39 : vector<1x16x16xf32> to vector<16x16xf32>
    %41 = vector.shape_cast %38 : vector<16x16xf32> to vector<1x16x16xf32>
    tpu.vector_store %arg6[%c0_17, %c0_18, %c0_19], %41 {strides = array<i32>} : memref<8x16x16xf32, #tpu.memory_space<vmem>>, vector<1x16x16xf32>,
    %42 = vector.broadcast %9 : vector<16x1xf32> to vector<16x16xf32>
    %43 = arith.mulf %42, %36 : vector<16x16xf32>
    %cst_20 = arith.constant 1.000000e+00 : f32
    %44 = vector.broadcast %cst_20 : f32 to vector<16x1xf32>
    %45 = arith.subf %44, %9 : vector<16x1xf32>
    %46 = vector.broadcast %45 : vector<16x1xf32> to vector<16x16xf32>
    %47 = arith.mulf %46, %6 : vector<16x16xf32>
    %48 = arith.addf %43, %47 : vector<16x16xf32>
    %49 = vector.broadcast %9 : vector<16x1xf32> to vector<16x16xf32>
    %50 = arith.mulf %49, %34 : vector<16x16xf32>
    %cst_21 = arith.constant 1.000000e+00 : f32
    %51 = vector.broadcast %cst_21 : f32 to vector<16x1xf32>
    %52 = arith.subf %51, %9 : vector<16x1xf32>
    %53 = vector.broadcast %52 : vector<16x1xf32> to vector<16x16xf32>
    %54 = arith.mulf %53, %7 : vector<16x16xf32>
    %55 = arith.addf %50, %54 : vector<16x16xf32>
    %c1 = arith.constant 1 : index
    %c0_22 = arith.constant 0 : index
    %c0_23 = arith.constant 0 : index
    %56 = vector.load %arg1[%c1, %c0_22, %c0_23] : memref<8x16x1xf32, #tpu.memory_space<vmem>>, vector<1x16x1xf32>
    %57 = vector.shape_cast %56 : vector<1x16x1xf32> to vector<16x1xf32>
    %58 = arith.truncf %48 : vector<16x16xf32> to vector<16x16xbf16>
    %cst_24 = arith.constant dense<0.000000e+00> : vector<16x128xf32>
    %59 = tpu.matmul %58, %3, %cst_24 {dimension_numbers = #tpu.dot_dimension_numbers<[1], [0], [0], [1], [0, 0, 1, 1], [], []>} : vector<16x16xbf16>, vector<16x128xbf16>, vector<16x128xf32> -> vector<16x128xf32>
    %cst_25 = arith.constant 0.000000e+00 : f32
    %60 = vector.broadcast %cst_25 : f32 to vector<16x1xf32>
    %61 = arith.cmpf ogt, %5, %60 : vector<16x1xf32>
    %62 = vector.extract_strided_slice %59 {offsets = [0, 0], sizes = [16, 64], strides = [1, 1]} : vector<16x128xf32> to vector<16x64xf32>
    %63 = vector.extract_strided_slice %59 {offsets = [0, 64], sizes = [16, 64], strides = [1, 1]} : vector<16x128xf32> to vector<16x64xf32>
    %64 = vector.shape_cast %61 : vector<16x1xi1> to vector<16x1xi1>
    %65 = vector.broadcast %64 : vector<16x1xi1> to vector<16x64xi1>
    %66 = arith.select %65, %62, %63 : vector<16x64xi1>, vector<16x64xf32>
    %67 = vector.extract_strided_slice %2 {offsets = [16, 0], sizes = [16, 64], strides = [1, 1]} : vector<128x64xf32> to vector<16x64xf32>
    %68 = arith.addf %67, %66 : vector<16x64xf32>
    %69 = arith.addf %68, %4 : vector<16x64xf32>
    %70 = arith.negf %69 : vector<16x64xf32>
    %71 = math.exp %70 : vector<16x64xf32>
    %cst_26 = arith.constant 1.000000e+00 : f32
    %72 = vector.broadcast %cst_26 : f32 to vector<16x64xf32>
    %73 = arith.addf %72, %71 : vector<16x64xf32>
    %74 = arith.divf %72, %73 : vector<16x64xf32>
    %75 = math.tanh %69 : vector<16x64xf32>
    %76 = vector.extract_strided_slice %74 {offsets = [0, 0], sizes = [16, 16], strides = [1, 1]} : vector<16x64xf32> to vector<16x16xf32>
    %77 = vector.extract_strided_slice %74 {offsets = [0, 16], sizes = [16, 16], strides = [1, 1]} : vector<16x64xf32> to vector<16x16xf32>
    %78 = vector.extract_strided_slice %75 {offsets = [0, 32], sizes = [16, 16], strides = [1, 1]} : vector<16x64xf32> to vector<16x16xf32>
    %79 = vector.extract_strided_slice %74 {offsets = [0, 48], sizes = [16, 16], strides = [1, 1]} : vector<16x64xf32> to vector<16x16xf32>
    %80 = arith.mulf %77, %55 : vector<16x16xf32>
    %81 = arith.mulf %76, %78 : vector<16x16xf32>
    %82 = arith.addf %80, %81 : vector<16x16xf32>
    %83 = math.tanh %82 : vector<16x16xf32>
    %84 = arith.mulf %79, %83 : vector<16x16xf32>
    %85 = vector.broadcast %57 : vector<16x1xf32> to vector<16x16xf32>
    %86 = arith.mulf %85, %84 : vector<16x16xf32>
    %c1_27 = arith.constant 1 : index
    %c0_28 = arith.constant 0 : index
    %c0_29 = arith.constant 0 : index
    %87 = vector.load %arg6[%c1_27, %c0_28, %c0_29] : memref<8x16x16xf32, #tpu.memory_space<vmem>>, vector<1x16x16xf32>
    %88 = vector.shape_cast %87 : vector<1x16x16xf32> to vector<16x16xf32>
    %89 = vector.shape_cast %86 : vector<16x16xf32> to vector<1x16x16xf32>
    tpu.vector_store %arg6[%c1_27, %c0_28, %c0_29], %89 {strides = array<i32>} : memref<8x16x16xf32, #tpu.memory_space<vmem>>, vector<1x16x16xf32>,
    %90 = vector.broadcast %57 : vector<16x1xf32> to vector<16x16xf32>
    %91 = arith.mulf %90, %84 : vector<16x16xf32>
    %cst_30 = arith.constant 1.000000e+00 : f32
    %92 = vector.broadcast %cst_30 : f32 to vector<16x1xf32>
    %93 = arith.subf %92, %57 : vector<16x1xf32>
    %94 = vector.broadcast %93 : vector<16x1xf32> to vector<16x16xf32>
    %95 = arith.mulf %94, %48 : vector<16x16xf32>
    %96 = arith.addf %91, %95 : vector<16x16xf32>
    %97 = vector.broadcast %57 : vector<16x1xf32> to vector<16x16xf32>
    %98 = arith.mulf %97, %82 : vector<16x16xf32>
    %cst_31 = arith.constant 1.000000e+00 : f32
    %99 = vector.broadcast %cst_31 : f32 to vector<16x1xf32>
    %100 = arith.subf %99, %57 : vector<16x1xf32>
    %101 = vector.broadcast %100 : vector<16x1xf32> to vector<16x16xf32>
    %102 = arith.mulf %101, %55 : vector<16x16xf32>
    %103 = arith.addf %98, %102 : vector<16x16xf32>
    %c2 = arith.constant 2 : index
    %c0_32 = arith.constant 0 : index
    %c0_33 = arith.constant 0 : index
    %104 = vector.load %arg1[%c2, %c0_32, %c0_33] : memref<8x16x1xf32, #tpu.memory_space<vmem>>, vector<1x16x1xf32>
    %105 = vector.shape_cast %104 : vector<1x16x1xf32> to vector<16x1xf32>
    %106 = arith.truncf %96 : vector<16x16xf32> to vector<16x16xbf16>
    %cst_34 = arith.constant dense<0.000000e+00> : vector<16x128xf32>
    %107 = tpu.matmul %106, %3, %cst_34 {dimension_numbers = #tpu.dot_dimension_numbers<[1], [0], [0], [1], [0, 0, 1, 1], [], []>} : vector<16x16xbf16>, vector<16x128xbf16>, vector<16x128xf32> -> vector<16x128xf32>
    %cst_35 = arith.constant 0.000000e+00 : f32
    %108 = vector.broadcast %cst_35 : f32 to vector<16x1xf32>
    %109 = arith.cmpf ogt, %5, %108 : vector<16x1xf32>
    %110 = vector.extract_strided_slice %107 {offsets = [0, 0], sizes = [16, 64], strides = [1, 1]} : vector<16x128xf32> to vector<16x64xf32>
    %111 = vector.extract_strided_slice %107 {offsets = [0, 64], sizes = [16, 64], strides = [1, 1]} : vector<16x128xf32> to vector<16x64xf32>
    %112 = vector.shape_cast %109 : vector<16x1xi1> to vector<16x1xi1>
    %113 = vector.broadcast %112 : vector<16x1xi1> to vector<16x64xi1>
    %114 = arith.select %113, %110, %111 : vector<16x64xi1>, vector<16x64xf32>
    %115 = vector.extract_strided_slice %2 {offsets = [32, 0], sizes = [16, 64], strides = [1, 1]} : vector<128x64xf32> to vector<16x64xf32>
    %116 = arith.addf %115, %114 : vector<16x64xf32>
    %117 = arith.addf %116, %4 : vector<16x64xf32>
    %118 = arith.negf %117 : vector<16x64xf32>
    %119 = math.exp %118 : vector<16x64xf32>
    %cst_36 = arith.constant 1.000000e+00 : f32
    %120 = vector.broadcast %cst_36 : f32 to vector<16x64xf32>
    %121 = arith.addf %120, %119 : vector<16x64xf32>
    %122 = arith.divf %120, %121 : vector<16x64xf32>
    %123 = math.tanh %117 : vector<16x64xf32>
    %124 = vector.extract_strided_slice %122 {offsets = [0, 0], sizes = [16, 16], strides = [1, 1]} : vector<16x64xf32> to vector<16x16xf32>
    %125 = vector.extract_strided_slice %122 {offsets = [0, 16], sizes = [16, 16], strides = [1, 1]} : vector<16x64xf32> to vector<16x16xf32>
    %126 = vector.extract_strided_slice %123 {offsets = [0, 32], sizes = [16, 16], strides = [1, 1]} : vector<16x64xf32> to vector<16x16xf32>
    %127 = vector.extract_strided_slice %122 {offsets = [0, 48], sizes = [16, 16], strides = [1, 1]} : vector<16x64xf32> to vector<16x16xf32>
    %128 = arith.mulf %125, %103 : vector<16x16xf32>
    %129 = arith.mulf %124, %126 : vector<16x16xf32>
    %130 = arith.addf %128, %129 : vector<16x16xf32>
    %131 = math.tanh %130 : vector<16x16xf32>
    %132 = arith.mulf %127, %131 : vector<16x16xf32>
    %133 = vector.broadcast %105 : vector<16x1xf32> to vector<16x16xf32>
    %134 = arith.mulf %133, %132 : vector<16x16xf32>
    %c2_37 = arith.constant 2 : index
    %c0_38 = arith.constant 0 : index
    %c0_39 = arith.constant 0 : index
    %135 = vector.load %arg6[%c2_37, %c0_38, %c0_39] : memref<8x16x16xf32, #tpu.memory_space<vmem>>, vector<1x16x16xf32>
    %136 = vector.shape_cast %135 : vector<1x16x16xf32> to vector<16x16xf32>
    %137 = vector.shape_cast %134 : vector<16x16xf32> to vector<1x16x16xf32>
    tpu.vector_store %arg6[%c2_37, %c0_38, %c0_39], %137 {strides = array<i32>} : memref<8x16x16xf32, #tpu.memory_space<vmem>>, vector<1x16x16xf32>,
    %138 = vector.broadcast %105 : vector<16x1xf32> to vector<16x16xf32>
    %139 = arith.mulf %138, %132 : vector<16x16xf32>
    %cst_40 = arith.constant 1.000000e+00 : f32
    %140 = vector.broadcast %cst_40 : f32 to vector<16x1xf32>
    %141 = arith.subf %140, %105 : vector<16x1xf32>
    %142 = vector.broadcast %141 : vector<16x1xf32> to vector<16x16xf32>
    %143 = arith.mulf %142, %96 : vector<16x16xf32>
    %144 = arith.addf %139, %143 : vector<16x16xf32>
    %145 = vector.broadcast %105 : vector<16x1xf32> to vector<16x16xf32>
    %146 = arith.mulf %145, %130 : vector<16x16xf32>
    %cst_41 = arith.constant 1.000000e+00 : f32
    %147 = vector.broadcast %cst_41 : f32 to vector<16x1xf32>
    %148 = arith.subf %147, %105 : vector<16x1xf32>
    %149 = vector.broadcast %148 : vector<16x1xf32> to vector<16x16xf32>
    %150 = arith.mulf %149, %103 : vector<16x16xf32>
    %151 = arith.addf %146, %150 : vector<16x16xf32>
    %c3 = arith.constant 3 : index
    %c0_42 = arith.constant 0 : index
    %c0_43 = arith.constant 0 : index
    %152 = vector.load %arg1[%c3, %c0_42, %c0_43] : memref<8x16x1xf32, #tpu.memory_space<vmem>>, vector<1x16x1xf32>
    %153 = vector.shape_cast %152 : vector<1x16x1xf32> to vector<16x1xf32>
    %154 = arith.truncf %144 : vector<16x16xf32> to vector<16x16xbf16>
    %cst_44 = arith.constant dense<0.000000e+00> : vector<16x128xf32>
    %155 = tpu.matmul %154, %3, %cst_44 {dimension_numbers = #tpu.dot_dimension_numbers<[1], [0], [0], [1], [0, 0, 1, 1], [], []>} : vector<16x16xbf16>, vector<16x128xbf16>, vector<16x128xf32> -> vector<16x128xf32>
    %cst_45 = arith.constant 0.000000e+00 : f32
    %156 = vector.broadcast %cst_45 : f32 to vector<16x1xf32>
    %157 = arith.cmpf ogt, %5, %156 : vector<16x1xf32>
    %158 = vector.extract_strided_slice %155 {offsets = [0, 0], sizes = [16, 64], strides = [1, 1]} : vector<16x128xf32> to vector<16x64xf32>
    %159 = vector.extract_strided_slice %155 {offsets = [0, 64], sizes = [16, 64], strides = [1, 1]} : vector<16x128xf32> to vector<16x64xf32>
    %160 = vector.shape_cast %157 : vector<16x1xi1> to vector<16x1xi1>
    %161 = vector.broadcast %160 : vector<16x1xi1> to vector<16x64xi1>
    %162 = arith.select %161, %158, %159 : vector<16x64xi1>, vector<16x64xf32>
    %163 = vector.extract_strided_slice %2 {offsets = [48, 0], sizes = [16, 64], strides = [1, 1]} : vector<128x64xf32> to vector<16x64xf32>
    %164 = arith.addf %163, %162 : vector<16x64xf32>
    %165 = arith.addf %164, %4 : vector<16x64xf32>
    %166 = arith.negf %165 : vector<16x64xf32>
    %167 = math.exp %166 : vector<16x64xf32>
    %cst_46 = arith.constant 1.000000e+00 : f32
    %168 = vector.broadcast %cst_46 : f32 to vector<16x64xf32>
    %169 = arith.addf %168, %167 : vector<16x64xf32>
    %170 = arith.divf %168, %169 : vector<16x64xf32>
    %171 = math.tanh %165 : vector<16x64xf32>
    %172 = vector.extract_strided_slice %170 {offsets = [0, 0], sizes = [16, 16], strides = [1, 1]} : vector<16x64xf32> to vector<16x16xf32>
    %173 = vector.extract_strided_slice %170 {offsets = [0, 16], sizes = [16, 16], strides = [1, 1]} : vector<16x64xf32> to vector<16x16xf32>
    %174 = vector.extract_strided_slice %171 {offsets = [0, 32], sizes = [16, 16], strides = [1, 1]} : vector<16x64xf32> to vector<16x16xf32>
    %175 = vector.extract_strided_slice %170 {offsets = [0, 48], sizes = [16, 16], strides = [1, 1]} : vector<16x64xf32> to vector<16x16xf32>
    %176 = arith.mulf %173, %151 : vector<16x16xf32>
    %177 = arith.mulf %172, %174 : vector<16x16xf32>
    %178 = arith.addf %176, %177 : vector<16x16xf32>
    %179 = math.tanh %178 : vector<16x16xf32>
    %180 = arith.mulf %175, %179 : vector<16x16xf32>
    %181 = vector.broadcast %153 : vector<16x1xf32> to vector<16x16xf32>
    %182 = arith.mulf %181, %180 : vector<16x16xf32>
    %c3_47 = arith.constant 3 : index
    %c0_48 = arith.constant 0 : index
    %c0_49 = arith.constant 0 : index
    %183 = vector.load %arg6[%c3_47, %c0_48, %c0_49] : memref<8x16x16xf32, #tpu.memory_space<vmem>>, vector<1x16x16xf32>
    %184 = vector.shape_cast %183 : vector<1x16x16xf32> to vector<16x16xf32>
    %185 = vector.shape_cast %182 : vector<16x16xf32> to vector<1x16x16xf32>
    tpu.vector_store %arg6[%c3_47, %c0_48, %c0_49], %185 {strides = array<i32>} : memref<8x16x16xf32, #tpu.memory_space<vmem>>, vector<1x16x16xf32>,
    %186 = vector.broadcast %153 : vector<16x1xf32> to vector<16x16xf32>
    %187 = arith.mulf %186, %180 : vector<16x16xf32>
    %cst_50 = arith.constant 1.000000e+00 : f32
    %188 = vector.broadcast %cst_50 : f32 to vector<16x1xf32>
    %189 = arith.subf %188, %153 : vector<16x1xf32>
    %190 = vector.broadcast %189 : vector<16x1xf32> to vector<16x16xf32>
    %191 = arith.mulf %190, %144 : vector<16x16xf32>
    %192 = arith.addf %187, %191 : vector<16x16xf32>
    %193 = vector.broadcast %153 : vector<16x1xf32> to vector<16x16xf32>
    %194 = arith.mulf %193, %178 : vector<16x16xf32>
    %cst_51 = arith.constant 1.000000e+00 : f32
    %195 = vector.broadcast %cst_51 : f32 to vector<16x1xf32>
    %196 = arith.subf %195, %153 : vector<16x1xf32>
    %197 = vector.broadcast %196 : vector<16x1xf32> to vector<16x16xf32>
    %198 = arith.mulf %197, %151 : vector<16x16xf32>
    %199 = arith.addf %194, %198 : vector<16x16xf32>
    %c4 = arith.constant 4 : index
    %c0_52 = arith.constant 0 : index
    %c0_53 = arith.constant 0 : index
    %200 = vector.load %arg1[%c4, %c0_52, %c0_53] : memref<8x16x1xf32, #tpu.memory_space<vmem>>, vector<1x16x1xf32>
    %201 = vector.shape_cast %200 : vector<1x16x1xf32> to vector<16x1xf32>
    %202 = arith.truncf %192 : vector<16x16xf32> to vector<16x16xbf16>
    %cst_54 = arith.constant dense<0.000000e+00> : vector<16x128xf32>
    %203 = tpu.matmul %202, %3, %cst_54 {dimension_numbers = #tpu.dot_dimension_numbers<[1], [0], [0], [1], [0, 0, 1, 1], [], []>} : vector<16x16xbf16>, vector<16x128xbf16>, vector<16x128xf32> -> vector<16x128xf32>
    %cst_55 = arith.constant 0.000000e+00 : f32
    %204 = vector.broadcast %cst_55 : f32 to vector<16x1xf32>
    %205 = arith.cmpf ogt, %5, %204 : vector<16x1xf32>
    %206 = vector.extract_strided_slice %203 {offsets = [0, 0], sizes = [16, 64], strides = [1, 1]} : vector<16x128xf32> to vector<16x64xf32>
    %207 = vector.extract_strided_slice %203 {offsets = [0, 64], sizes = [16, 64], strides = [1, 1]} : vector<16x128xf32> to vector<16x64xf32>
    %208 = vector.shape_cast %205 : vector<16x1xi1> to vector<16x1xi1>
    %209 = vector.broadcast %208 : vector<16x1xi1> to vector<16x64xi1>
    %210 = arith.select %209, %206, %207 : vector<16x64xi1>, vector<16x64xf32>
    %211 = vector.extract_strided_slice %2 {offsets = [64, 0], sizes = [16, 64], strides = [1, 1]} : vector<128x64xf32> to vector<16x64xf32>
    %212 = arith.addf %211, %210 : vector<16x64xf32>
    %213 = arith.addf %212, %4 : vector<16x64xf32>
    %214 = arith.negf %213 : vector<16x64xf32>
    %215 = math.exp %214 : vector<16x64xf32>
    %cst_56 = arith.constant 1.000000e+00 : f32
    %216 = vector.broadcast %cst_56 : f32 to vector<16x64xf32>
    %217 = arith.addf %216, %215 : vector<16x64xf32>
    %218 = arith.divf %216, %217 : vector<16x64xf32>
    %219 = math.tanh %213 : vector<16x64xf32>
    %220 = vector.extract_strided_slice %218 {offsets = [0, 0], sizes = [16, 16], strides = [1, 1]} : vector<16x64xf32> to vector<16x16xf32>
    %221 = vector.extract_strided_slice %218 {offsets = [0, 16], sizes = [16, 16], strides = [1, 1]} : vector<16x64xf32> to vector<16x16xf32>
    %222 = vector.extract_strided_slice %219 {offsets = [0, 32], sizes = [16, 16], strides = [1, 1]} : vector<16x64xf32> to vector<16x16xf32>
    %223 = vector.extract_strided_slice %218 {offsets = [0, 48], sizes = [16, 16], strides = [1, 1]} : vector<16x64xf32> to vector<16x16xf32>
    %224 = arith.mulf %221, %199 : vector<16x16xf32>
    %225 = arith.mulf %220, %222 : vector<16x16xf32>
    %226 = arith.addf %224, %225 : vector<16x16xf32>
    %227 = math.tanh %226 : vector<16x16xf32>
    %228 = arith.mulf %223, %227 : vector<16x16xf32>
    %229 = vector.broadcast %201 : vector<16x1xf32> to vector<16x16xf32>
    %230 = arith.mulf %229, %228 : vector<16x16xf32>
    %c4_57 = arith.constant 4 : index
    %c0_58 = arith.constant 0 : index
    %c0_59 = arith.constant 0 : index
    %231 = vector.load %arg6[%c4_57, %c0_58, %c0_59] : memref<8x16x16xf32, #tpu.memory_space<vmem>>, vector<1x16x16xf32>
    %232 = vector.shape_cast %231 : vector<1x16x16xf32> to vector<16x16xf32>
    %233 = vector.shape_cast %230 : vector<16x16xf32> to vector<1x16x16xf32>
    tpu.vector_store %arg6[%c4_57, %c0_58, %c0_59], %233 {strides = array<i32>} : memref<8x16x16xf32, #tpu.memory_space<vmem>>, vector<1x16x16xf32>,
    %234 = vector.broadcast %201 : vector<16x1xf32> to vector<16x16xf32>
    %235 = arith.mulf %234, %228 : vector<16x16xf32>
    %cst_60 = arith.constant 1.000000e+00 : f32
    %236 = vector.broadcast %cst_60 : f32 to vector<16x1xf32>
    %237 = arith.subf %236, %201 : vector<16x1xf32>
    %238 = vector.broadcast %237 : vector<16x1xf32> to vector<16x16xf32>
    %239 = arith.mulf %238, %192 : vector<16x16xf32>
    %240 = arith.addf %235, %239 : vector<16x16xf32>
    %241 = vector.broadcast %201 : vector<16x1xf32> to vector<16x16xf32>
    %242 = arith.mulf %241, %226 : vector<16x16xf32>
    %cst_61 = arith.constant 1.000000e+00 : f32
    %243 = vector.broadcast %cst_61 : f32 to vector<16x1xf32>
    %244 = arith.subf %243, %201 : vector<16x1xf32>
    %245 = vector.broadcast %244 : vector<16x1xf32> to vector<16x16xf32>
    %246 = arith.mulf %245, %199 : vector<16x16xf32>
    %247 = arith.addf %242, %246 : vector<16x16xf32>
    %c5 = arith.constant 5 : index
    %c0_62 = arith.constant 0 : index
    %c0_63 = arith.constant 0 : index
    %248 = vector.load %arg1[%c5, %c0_62, %c0_63] : memref<8x16x1xf32, #tpu.memory_space<vmem>>, vector<1x16x1xf32>
    %249 = vector.shape_cast %248 : vector<1x16x1xf32> to vector<16x1xf32>
    %250 = arith.truncf %240 : vector<16x16xf32> to vector<16x16xbf16>
    %cst_64 = arith.constant dense<0.000000e+00> : vector<16x128xf32>
    %251 = tpu.matmul %250, %3, %cst_64 {dimension_numbers = #tpu.dot_dimension_numbers<[1], [0], [0], [1], [0, 0, 1, 1], [], []>} : vector<16x16xbf16>, vector<16x128xbf16>, vector<16x128xf32> -> vector<16x128xf32>
    %cst_65 = arith.constant 0.000000e+00 : f32
    %252 = vector.broadcast %cst_65 : f32 to vector<16x1xf32>
    %253 = arith.cmpf ogt, %5, %252 : vector<16x1xf32>
    %254 = vector.extract_strided_slice %251 {offsets = [0, 0], sizes = [16, 64], strides = [1, 1]} : vector<16x128xf32> to vector<16x64xf32>
    %255 = vector.extract_strided_slice %251 {offsets = [0, 64], sizes = [16, 64], strides = [1, 1]} : vector<16x128xf32> to vector<16x64xf32>
    %256 = vector.shape_cast %253 : vector<16x1xi1> to vector<16x1xi1>
    %257 = vector.broadcast %256 : vector<16x1xi1> to vector<16x64xi1>
    %258 = arith.select %257, %254, %255 : vector<16x64xi1>, vector<16x64xf32>
    %259 = vector.extract_strided_slice %2 {offsets = [80, 0], sizes = [16, 64], strides = [1, 1]} : vector<128x64xf32> to vector<16x64xf32>
    %260 = arith.addf %259, %258 : vector<16x64xf32>
    %261 = arith.addf %260, %4 : vector<16x64xf32>
    %262 = arith.negf %261 : vector<16x64xf32>
    %263 = math.exp %262 : vector<16x64xf32>
    %cst_66 = arith.constant 1.000000e+00 : f32
    %264 = vector.broadcast %cst_66 : f32 to vector<16x64xf32>
    %265 = arith.addf %264, %263 : vector<16x64xf32>
    %266 = arith.divf %264, %265 : vector<16x64xf32>
    %267 = math.tanh %261 : vector<16x64xf32>
    %268 = vector.extract_strided_slice %266 {offsets = [0, 0], sizes = [16, 16], strides = [1, 1]} : vector<16x64xf32> to vector<16x16xf32>
    %269 = vector.extract_strided_slice %266 {offsets = [0, 16], sizes = [16, 16], strides = [1, 1]} : vector<16x64xf32> to vector<16x16xf32>
    %270 = vector.extract_strided_slice %267 {offsets = [0, 32], sizes = [16, 16], strides = [1, 1]} : vector<16x64xf32> to vector<16x16xf32>
    %271 = vector.extract_strided_slice %266 {offsets = [0, 48], sizes = [16, 16], strides = [1, 1]} : vector<16x64xf32> to vector<16x16xf32>
    %272 = arith.mulf %269, %247 : vector<16x16xf32>
    %273 = arith.mulf %268, %270 : vector<16x16xf32>
    %274 = arith.addf %272, %273 : vector<16x16xf32>
    %275 = math.tanh %274 : vector<16x16xf32>
    %276 = arith.mulf %271, %275 : vector<16x16xf32>
    %277 = vector.broadcast %249 : vector<16x1xf32> to vector<16x16xf32>
    %278 = arith.mulf %277, %276 : vector<16x16xf32>
    %c5_67 = arith.constant 5 : index
    %c0_68 = arith.constant 0 : index
    %c0_69 = arith.constant 0 : index
    %279 = vector.load %arg6[%c5_67, %c0_68, %c0_69] : memref<8x16x16xf32, #tpu.memory_space<vmem>>, vector<1x16x16xf32>
    %280 = vector.shape_cast %279 : vector<1x16x16xf32> to vector<16x16xf32>
    %281 = vector.shape_cast %278 : vector<16x16xf32> to vector<1x16x16xf32>
    tpu.vector_store %arg6[%c5_67, %c0_68, %c0_69], %281 {strides = array<i32>} : memref<8x16x16xf32, #tpu.memory_space<vmem>>, vector<1x16x16xf32>,
    %282 = vector.broadcast %249 : vector<16x1xf32> to vector<16x16xf32>
    %283 = arith.mulf %282, %276 : vector<16x16xf32>
    %cst_70 = arith.constant 1.000000e+00 : f32
    %284 = vector.broadcast %cst_70 : f32 to vector<16x1xf32>
    %285 = arith.subf %284, %249 : vector<16x1xf32>
    %286 = vector.broadcast %285 : vector<16x1xf32> to vector<16x16xf32>
    %287 = arith.mulf %286, %240 : vector<16x16xf32>
    %288 = arith.addf %283, %287 : vector<16x16xf32>
    %289 = vector.broadcast %249 : vector<16x1xf32> to vector<16x16xf32>
    %290 = arith.mulf %289, %274 : vector<16x16xf32>
    %cst_71 = arith.constant 1.000000e+00 : f32
    %291 = vector.broadcast %cst_71 : f32 to vector<16x1xf32>
    %292 = arith.subf %291, %249 : vector<16x1xf32>
    %293 = vector.broadcast %292 : vector<16x1xf32> to vector<16x16xf32>
    %294 = arith.mulf %293, %247 : vector<16x16xf32>
    %295 = arith.addf %290, %294 : vector<16x16xf32>
    %c6 = arith.constant 6 : index
    %c0_72 = arith.constant 0 : index
    %c0_73 = arith.constant 0 : index
    %296 = vector.load %arg1[%c6, %c0_72, %c0_73] : memref<8x16x1xf32, #tpu.memory_space<vmem>>, vector<1x16x1xf32>
    %297 = vector.shape_cast %296 : vector<1x16x1xf32> to vector<16x1xf32>
    %298 = arith.truncf %288 : vector<16x16xf32> to vector<16x16xbf16>
    %cst_74 = arith.constant dense<0.000000e+00> : vector<16x128xf32>
    %299 = tpu.matmul %298, %3, %cst_74 {dimension_numbers = #tpu.dot_dimension_numbers<[1], [0], [0], [1], [0, 0, 1, 1], [], []>} : vector<16x16xbf16>, vector<16x128xbf16>, vector<16x128xf32> -> vector<16x128xf32>
    %cst_75 = arith.constant 0.000000e+00 : f32
    %300 = vector.broadcast %cst_75 : f32 to vector<16x1xf32>
    %301 = arith.cmpf ogt, %5, %300 : vector<16x1xf32>
    %302 = vector.extract_strided_slice %299 {offsets = [0, 0], sizes = [16, 64], strides = [1, 1]} : vector<16x128xf32> to vector<16x64xf32>
    %303 = vector.extract_strided_slice %299 {offsets = [0, 64], sizes = [16, 64], strides = [1, 1]} : vector<16x128xf32> to vector<16x64xf32>
    %304 = vector.shape_cast %301 : vector<16x1xi1> to vector<16x1xi1>
    %305 = vector.broadcast %304 : vector<16x1xi1> to vector<16x64xi1>
    %306 = arith.select %305, %302, %303 : vector<16x64xi1>, vector<16x64xf32>
    %307 = vector.extract_strided_slice %2 {offsets = [96, 0], sizes = [16, 64], strides = [1, 1]} : vector<128x64xf32> to vector<16x64xf32>
    %308 = arith.addf %307, %306 : vector<16x64xf32>
    %309 = arith.addf %308, %4 : vector<16x64xf32>
    %310 = arith.negf %309 : vector<16x64xf32>
    %311 = math.exp %310 : vector<16x64xf32>
    %cst_76 = arith.constant 1.000000e+00 : f32
    %312 = vector.broadcast %cst_76 : f32 to vector<16x64xf32>
    %313 = arith.addf %312, %311 : vector<16x64xf32>
    %314 = arith.divf %312, %313 : vector<16x64xf32>
    %315 = math.tanh %309 : vector<16x64xf32>
    %316 = vector.extract_strided_slice %314 {offsets = [0, 0], sizes = [16, 16], strides = [1, 1]} : vector<16x64xf32> to vector<16x16xf32>
    %317 = vector.extract_strided_slice %314 {offsets = [0, 16], sizes = [16, 16], strides = [1, 1]} : vector<16x64xf32> to vector<16x16xf32>
    %318 = vector.extract_strided_slice %315 {offsets = [0, 32], sizes = [16, 16], strides = [1, 1]} : vector<16x64xf32> to vector<16x16xf32>
    %319 = vector.extract_strided_slice %314 {offsets = [0, 48], sizes = [16, 16], strides = [1, 1]} : vector<16x64xf32> to vector<16x16xf32>
    %320 = arith.mulf %317, %295 : vector<16x16xf32>
    %321 = arith.mulf %316, %318 : vector<16x16xf32>
    %322 = arith.addf %320, %321 : vector<16x16xf32>
    %323 = math.tanh %322 : vector<16x16xf32>
    %324 = arith.mulf %319, %323 : vector<16x16xf32>
    %325 = vector.broadcast %297 : vector<16x1xf32> to vector<16x16xf32>
    %326 = arith.mulf %325, %324 : vector<16x16xf32>
    %c6_77 = arith.constant 6 : index
    %c0_78 = arith.constant 0 : index
    %c0_79 = arith.constant 0 : index
    %327 = vector.load %arg6[%c6_77, %c0_78, %c0_79] : memref<8x16x16xf32, #tpu.memory_space<vmem>>, vector<1x16x16xf32>
    %328 = vector.shape_cast %327 : vector<1x16x16xf32> to vector<16x16xf32>
    %329 = vector.shape_cast %326 : vector<16x16xf32> to vector<1x16x16xf32>
    tpu.vector_store %arg6[%c6_77, %c0_78, %c0_79], %329 {strides = array<i32>} : memref<8x16x16xf32, #tpu.memory_space<vmem>>, vector<1x16x16xf32>,
    %330 = vector.broadcast %297 : vector<16x1xf32> to vector<16x16xf32>
    %331 = arith.mulf %330, %324 : vector<16x16xf32>
    %cst_80 = arith.constant 1.000000e+00 : f32
    %332 = vector.broadcast %cst_80 : f32 to vector<16x1xf32>
    %333 = arith.subf %332, %297 : vector<16x1xf32>
    %334 = vector.broadcast %333 : vector<16x1xf32> to vector<16x16xf32>
    %335 = arith.mulf %334, %288 : vector<16x16xf32>
    %336 = arith.addf %331, %335 : vector<16x16xf32>
    %337 = vector.broadcast %297 : vector<16x1xf32> to vector<16x16xf32>
    %338 = arith.mulf %337, %322 : vector<16x16xf32>
    %cst_81 = arith.constant 1.000000e+00 : f32
    %339 = vector.broadcast %cst_81 : f32 to vector<16x1xf32>
    %340 = arith.subf %339, %297 : vector<16x1xf32>
    %341 = vector.broadcast %340 : vector<16x1xf32> to vector<16x16xf32>
    %342 = arith.mulf %341, %295 : vector<16x16xf32>
    %343 = arith.addf %338, %342 : vector<16x16xf32>
    %c7 = arith.constant 7 : index
    %c0_82 = arith.constant 0 : index
    %c0_83 = arith.constant 0 : index
    %344 = vector.load %arg1[%c7, %c0_82, %c0_83] : memref<8x16x1xf32, #tpu.memory_space<vmem>>, vector<1x16x1xf32>
    %345 = vector.shape_cast %344 : vector<1x16x1xf32> to vector<16x1xf32>
    %346 = arith.truncf %336 : vector<16x16xf32> to vector<16x16xbf16>
    %cst_84 = arith.constant dense<0.000000e+00> : vector<16x128xf32>
    %347 = tpu.matmul %346, %3, %cst_84 {dimension_numbers = #tpu.dot_dimension_numbers<[1], [0], [0], [1], [0, 0, 1, 1], [], []>} : vector<16x16xbf16>, vector<16x128xbf16>, vector<16x128xf32> -> vector<16x128xf32>
    %cst_85 = arith.constant 0.000000e+00 : f32
    %348 = vector.broadcast %cst_85 : f32 to vector<16x1xf32>
    %349 = arith.cmpf ogt, %5, %348 : vector<16x1xf32>
    %350 = vector.extract_strided_slice %347 {offsets = [0, 0], sizes = [16, 64], strides = [1, 1]} : vector<16x128xf32> to vector<16x64xf32>
    %351 = vector.extract_strided_slice %347 {offsets = [0, 64], sizes = [16, 64], strides = [1, 1]} : vector<16x128xf32> to vector<16x64xf32>
    %352 = vector.shape_cast %349 : vector<16x1xi1> to vector<16x1xi1>
    %353 = vector.broadcast %352 : vector<16x1xi1> to vector<16x64xi1>
    %354 = arith.select %353, %350, %351 : vector<16x64xi1>, vector<16x64xf32>
    %355 = vector.extract_strided_slice %2 {offsets = [112, 0], sizes = [16, 64], strides = [1, 1]} : vector<128x64xf32> to vector<16x64xf32>
    %356 = arith.addf %355, %354 : vector<16x64xf32>
    %357 = arith.addf %356, %4 : vector<16x64xf32>
    %358 = arith.negf %357 : vector<16x64xf32>
    %359 = math.exp %358 : vector<16x64xf32>
    %cst_86 = arith.constant 1.000000e+00 : f32
    %360 = vector.broadcast %cst_86 : f32 to vector<16x64xf32>
    %361 = arith.addf %360, %359 : vector<16x64xf32>
    %362 = arith.divf %360, %361 : vector<16x64xf32>
    %363 = math.tanh %357 : vector<16x64xf32>
    %364 = vector.extract_strided_slice %362 {offsets = [0, 0], sizes = [16, 16], strides = [1, 1]} : vector<16x64xf32> to vector<16x16xf32>
    %365 = vector.extract_strided_slice %362 {offsets = [0, 16], sizes = [16, 16], strides = [1, 1]} : vector<16x64xf32> to vector<16x16xf32>
    %366 = vector.extract_strided_slice %363 {offsets = [0, 32], sizes = [16, 16], strides = [1, 1]} : vector<16x64xf32> to vector<16x16xf32>
    %367 = vector.extract_strided_slice %362 {offsets = [0, 48], sizes = [16, 16], strides = [1, 1]} : vector<16x64xf32> to vector<16x16xf32>
    %368 = arith.mulf %365, %343 : vector<16x16xf32>
    %369 = arith.mulf %364, %366 : vector<16x16xf32>
    %370 = arith.addf %368, %369 : vector<16x16xf32>
    %371 = math.tanh %370 : vector<16x16xf32>
    %372 = arith.mulf %367, %371 : vector<16x16xf32>
    %373 = vector.broadcast %345 : vector<16x1xf32> to vector<16x16xf32>
    %374 = arith.mulf %373, %372 : vector<16x16xf32>
    %c7_87 = arith.constant 7 : index
    %c0_88 = arith.constant 0 : index
    %c0_89 = arith.constant 0 : index
    %375 = vector.load %arg6[%c7_87, %c0_88, %c0_89] : memref<8x16x16xf32, #tpu.memory_space<vmem>>, vector<1x16x16xf32>
    %376 = vector.shape_cast %375 : vector<1x16x16xf32> to vector<16x16xf32>
    %377 = vector.shape_cast %374 : vector<16x16xf32> to vector<1x16x16xf32>
    tpu.vector_store %arg6[%c7_87, %c0_88, %c0_89], %377 {strides = array<i32>} : memref<8x16x16xf32, #tpu.memory_space<vmem>>, vector<1x16x16xf32>,
    %378 = vector.broadcast %345 : vector<16x1xf32> to vector<16x16xf32>
    %379 = arith.mulf %378, %372 : vector<16x16xf32>
    %cst_90 = arith.constant 1.000000e+00 : f32
    %380 = vector.broadcast %cst_90 : f32 to vector<16x1xf32>
    %381 = arith.subf %380, %345 : vector<16x1xf32>
    %382 = vector.broadcast %381 : vector<16x1xf32> to vector<16x16xf32>
    %383 = arith.mulf %382, %336 : vector<16x16xf32>
    %384 = arith.addf %379, %383 : vector<16x16xf32>
    %385 = vector.broadcast %345 : vector<16x1xf32> to vector<16x16xf32>
    %386 = arith.mulf %385, %370 : vector<16x16xf32>
    %cst_91 = arith.constant 1.000000e+00 : f32
    %387 = vector.broadcast %cst_91 : f32 to vector<16x1xf32>
    %388 = arith.subf %387, %345 : vector<16x1xf32>
    %389 = vector.broadcast %388 : vector<16x1xf32> to vector<16x16xf32>
    %390 = arith.mulf %389, %343 : vector<16x16xf32>
    %391 = arith.addf %386, %390 : vector<16x16xf32>
    %c0_92 = arith.constant 0 : index
    %c0_93 = arith.constant 0 : index
    %392 = vector.load %arg7[%c0_92, %c0_93] : memref<16x16xf32, #tpu.memory_space<vmem>>, vector<16x16xf32>
    tpu.vector_store %arg7[%c0_92, %c0_93], %384 {strides = array<i32>} : memref<16x16xf32, #tpu.memory_space<vmem>>, vector<16x16xf32>,
    %c0_94 = arith.constant 0 : index
    %c0_95 = arith.constant 0 : index
    %393 = vector.load %arg8[%c0_94, %c0_95] : memref<16x16xf32, #tpu.memory_space<vmem>>, vector<16x16xf32>
    tpu.vector_store %arg8[%c0_94, %c0_95], %391 {strides = array<i32>} : memref<16x16xf32, #tpu.memory_space<vmem>>, vector<16x16xf32>,
    return
  }
}

module attributes {stable_mosaic.version = 11 : i64} {
  func.func @decoder_kernel(%arg0: memref<8x32xf32, #tpu.memory_space<vmem>>, %arg1: memref<8x32xf32, #tpu.memory_space<vmem>>, %arg2: memref<64x32xbf16, #tpu.memory_space<vmem>>, %arg3: memref<40x64xbf16, #tpu.memory_space<vmem>>, %arg4: memref<8x64xf32, #tpu.memory_space<vmem>>, %arg5: memref<192x128xbf16, #tpu.memory_space<vmem>>, %arg6: memref<1x128xf32, #tpu.memory_space<vmem>>, %arg7: memref<32x40xbf16, #tpu.memory_space<vmem>>, %arg8: memref<64x128xbf16, #tpu.memory_space<vmem>>, %arg9: memref<1x128xf32, #tpu.memory_space<vmem>>, %arg10: memref<8x8x128xf32, #tpu.memory_space<vmem>>, %arg11: memref<8x192xf32, #tpu.memory_space<vmem>>) attributes {dimension_semantics = [], scalar_prefetch = 0 : i64, scratch_operands = 1 : i64, tpu.core_type = #tpu.core_type<tc>} {
    %0 = tpu.iota {dimensions = array<i32: 1>} : vector<8x128xi32>
    %c1_i32 = arith.constant 1 : i32
    %1 = vector.broadcast %c1_i32 : i32 to vector<8x128xi32>
    %2 = arith.cmpi eq, %0, %1 : vector<8x128xi32>
    %3 = arith.extui %2 : vector<8x128xi1> to vector<8x128xi32>
    %4 = arith.sitofp %3 : vector<8x128xi32> to vector<8x128xf32>
    %c0 = arith.constant 0 : index
    %c0_0 = arith.constant 0 : index
    %5 = vector.load %arg11[%c0, %c0_0] : memref<8x192xf32, #tpu.memory_space<vmem>>, vector<8x128xf32>
    tpu.vector_store %arg11[%c0, %c0_0], %4 {strides = array<i32>} : memref<8x192xf32, #tpu.memory_space<vmem>>, vector<8x128xf32>,
    %cst = arith.constant 0.000000e+00 : f32
    %6 = vector.broadcast %cst : f32 to vector<8x32xf32>
    %c0_1 = arith.constant 0 : index
    %c128 = arith.constant 128 : index
    %7 = vector.load %arg11[%c0_1, %c128] : memref<8x192xf32, #tpu.memory_space<vmem>>, vector<8x32xf32>
    tpu.vector_store %arg11[%c0_1, %c128], %6 {strides = array<i32>} : memref<8x192xf32, #tpu.memory_space<vmem>>, vector<8x32xf32>,
    %c0_2 = arith.constant 0 : index
    %c0_3 = arith.constant 0 : index
    %8 = vector.load %arg0[%c0_2, %c0_3] : memref<8x32xf32, #tpu.memory_space<vmem>>, vector<8x32xf32>
    %c0_4 = arith.constant 0 : index
    %c160 = arith.constant 160 : index
    %9 = vector.load %arg11[%c0_4, %c160] : memref<8x192xf32, #tpu.memory_space<vmem>>, vector<8x32xf32>
    tpu.vector_store %arg11[%c0_4, %c160], %8 {strides = array<i32>} : memref<8x192xf32, #tpu.memory_space<vmem>>, vector<8x32xf32>,
    %c0_5 = arith.constant 0 : index
    %c0_6 = arith.constant 0 : index
    %10 = vector.load %arg1[%c0_5, %c0_6] : memref<8x32xf32, #tpu.memory_space<vmem>>, vector<8x32xf32>
    %c0_7 = arith.constant 0 : index
    %c0_8 = arith.constant 0 : index
    %11 = vector.load %arg2[%c0_7, %c0_8] : memref<64x32xbf16, #tpu.memory_space<vmem>>, vector<64x32xbf16>
    %c0_9 = arith.constant 0 : index
    %c0_10 = arith.constant 0 : index
    %12 = vector.load %arg3[%c0_9, %c0_10] : memref<40x64xbf16, #tpu.memory_space<vmem>>, vector<40x64xbf16>
    %c0_11 = arith.constant 0 : index
    %c0_12 = arith.constant 0 : index
    %13 = vector.load %arg4[%c0_11, %c0_12] : memref<8x64xf32, #tpu.memory_space<vmem>>, vector<8x64xf32>
    %c0_13 = arith.constant 0 : index
    %c0_14 = arith.constant 0 : index
    %14 = vector.load %arg5[%c0_13, %c0_14] : memref<192x128xbf16, #tpu.memory_space<vmem>>, vector<192x128xbf16>
    %c0_15 = arith.constant 0 : index
    %c0_16 = arith.constant 0 : index
    %15 = vector.load %arg7[%c0_15, %c0_16] : memref<32x40xbf16, #tpu.memory_space<vmem>>, vector<32x40xbf16>
    %c0_17 = arith.constant 0 : index
    %c0_18 = arith.constant 0 : index
    %16 = vector.load %arg8[%c0_17, %c0_18] : memref<64x128xbf16, #tpu.memory_space<vmem>>, vector<64x128xbf16>
    %c0_19 = arith.constant 0 : index
    %c0_20 = arith.constant 0 : index
    %17 = vector.load %arg6[%c0_19, %c0_20] : memref<1x128xf32, #tpu.memory_space<vmem>>, vector<1x128xf32>
    %18 = vector.shape_cast %17 : vector<1x128xf32> to vector<1x128xf32>
    %19 = vector.broadcast %18 : vector<1x128xf32> to vector<8x128xf32>
    %c0_21 = arith.constant 0 : index
    %c0_22 = arith.constant 0 : index
    %20 = vector.load %arg9[%c0_21, %c0_22] : memref<1x128xf32, #tpu.memory_space<vmem>>, vector<1x128xf32>
    %21 = vector.shape_cast %20 : vector<1x128xf32> to vector<1x128xf32>
    %22 = vector.broadcast %21 : vector<1x128xf32> to vector<8x128xf32>
    %c0_23 = arith.constant 0 : index
    %c0_24 = arith.constant 0 : index
    %23 = vector.load %arg11[%c0_23, %c0_24] : memref<8x192xf32, #tpu.memory_space<vmem>>, vector<8x192xf32>
    %24 = arith.truncf %23 : vector<8x192xf32> to vector<8x192xbf16>
    %cst_25 = arith.constant dense<0.000000e+00> : vector<8x128xf32>
    %25 = tpu.matmul %24, %14, %cst_25 {dimension_numbers = #tpu.dot_dimension_numbers<[1], [0], [0], [1], [0, 0, 1, 1], [], []>} : vector<8x192xbf16>, vector<192x128xbf16>, vector<8x128xf32> -> vector<8x128xf32>
    %26 = arith.addf %25, %19 : vector<8x128xf32>
    %27 = arith.negf %26 : vector<8x128xf32>
    %28 = math.exp %27 : vector<8x128xf32>
    %cst_26 = arith.constant 1.000000e+00 : f32
    %29 = vector.broadcast %cst_26 : f32 to vector<8x128xf32>
    %30 = arith.addf %29, %28 : vector<8x128xf32>
    %31 = arith.divf %29, %30 : vector<8x128xf32>
    %32 = math.tanh %26 : vector<8x128xf32>
    %33 = vector.extract_strided_slice %31 {offsets = [0, 0], sizes = [8, 32], strides = [1, 1]} : vector<8x128xf32> to vector<8x32xf32>
    %34 = vector.extract_strided_slice %31 {offsets = [0, 32], sizes = [8, 32], strides = [1, 1]} : vector<8x128xf32> to vector<8x32xf32>
    %35 = vector.extract_strided_slice %32 {offsets = [0, 64], sizes = [8, 32], strides = [1, 1]} : vector<8x128xf32> to vector<8x32xf32>
    %36 = vector.extract_strided_slice %31 {offsets = [0, 96], sizes = [8, 32], strides = [1, 1]} : vector<8x128xf32> to vector<8x32xf32>
    %37 = arith.mulf %34, %10 : vector<8x32xf32>
    %38 = arith.mulf %33, %35 : vector<8x32xf32>
    %39 = arith.addf %37, %38 : vector<8x32xf32>
    %40 = math.tanh %39 : vector<8x32xf32>
    %41 = arith.mulf %36, %40 : vector<8x32xf32>
    %42 = arith.truncf %41 : vector<8x32xf32> to vector<8x32xbf16>
    %cst_27 = arith.constant dense<0.000000e+00> : vector<8x40xf32>
    %43 = tpu.matmul %42, %15, %cst_27 {dimension_numbers = #tpu.dot_dimension_numbers<[1], [0], [0], [1], [0, 0, 1, 1], [], []>} : vector<8x32xbf16>, vector<32x40xbf16>, vector<8x40xf32> -> vector<8x40xf32>
    %44 = arith.truncf %43 : vector<8x40xf32> to vector<8x40xbf16>
    %cst_28 = arith.constant dense<0.000000e+00> : vector<8x64xf32>
    %45 = tpu.matmul %44, %12, %cst_28 {dimension_numbers = #tpu.dot_dimension_numbers<[1], [0], [0], [1], [0, 0, 1, 1], [], []>} : vector<8x40xbf16>, vector<40x64xbf16>, vector<8x64xf32> -> vector<8x64xf32>
    %46 = arith.addf %45, %13 : vector<8x64xf32>
    %cst_29 = arith.constant dense<0xFF800000> : vector<8xf32>
    %47 = vector.multi_reduction <maximumf>, %46, %cst_29 [1] : vector<8x64xf32> to vector<8xf32>
    %48 = vector.shape_cast %47 : vector<8xf32> to vector<8x1xf32>
    %49 = vector.broadcast %48 : vector<8x1xf32> to vector<8x64xf32>
    %50 = arith.subf %46, %49 : vector<8x64xf32>
    %51 = math.exp %50 : vector<8x64xf32>
    %cst_30 = arith.constant dense<0.000000e+00> : vector<8xf32>
    %52 = vector.multi_reduction <add>, %51, %cst_30 [1] : vector<8x64xf32> to vector<8xf32>
    %53 = vector.shape_cast %52 : vector<8xf32> to vector<8x1xf32>
    %54 = vector.broadcast %53 : vector<8x1xf32> to vector<8x64xf32>
    %55 = arith.divf %51, %54 : vector<8x64xf32>
    %56 = arith.truncf %55 : vector<8x64xf32> to vector<8x64xbf16>
    %cst_31 = arith.constant dense<0.000000e+00> : vector<8x32xf32>
    %57 = tpu.matmul %56, %11, %cst_31 {dimension_numbers = #tpu.dot_dimension_numbers<[1], [0], [0], [1], [0, 0, 1, 1], [], []>} : vector<8x64xbf16>, vector<64x32xbf16>, vector<8x32xf32> -> vector<8x32xf32>
    %c0_32 = arith.constant 0 : index
    %c128_33 = arith.constant 128 : index
    %58 = vector.load %arg11[%c0_32, %c128_33] : memref<8x192xf32, #tpu.memory_space<vmem>>, vector<8x32xf32>
    tpu.vector_store %arg11[%c0_32, %c128_33], %57 {strides = array<i32>} : memref<8x192xf32, #tpu.memory_space<vmem>>, vector<8x32xf32>,
    %c0_34 = arith.constant 0 : index
    %c160_35 = arith.constant 160 : index
    %59 = vector.load %arg11[%c0_34, %c160_35] : memref<8x192xf32, #tpu.memory_space<vmem>>, vector<8x32xf32>
    tpu.vector_store %arg11[%c0_34, %c160_35], %41 {strides = array<i32>} : memref<8x192xf32, #tpu.memory_space<vmem>>, vector<8x32xf32>,
    %c0_36 = arith.constant 0 : index
    %c128_37 = arith.constant 128 : index
    %60 = vector.load %arg11[%c0_36, %c128_37] : memref<8x192xf32, #tpu.memory_space<vmem>>, vector<8x64xf32>
    %61 = arith.truncf %60 : vector<8x64xf32> to vector<8x64xbf16>
    %cst_38 = arith.constant dense<0.000000e+00> : vector<8x128xf32>
    %62 = tpu.matmul %61, %16, %cst_38 {dimension_numbers = #tpu.dot_dimension_numbers<[1], [0], [0], [1], [0, 0, 1, 1], [], []>} : vector<8x64xbf16>, vector<64x128xbf16>, vector<8x128xf32> -> vector<8x128xf32>
    %63 = arith.addf %62, %22 : vector<8x128xf32>
    %c0_39 = arith.constant 0 : index
    %c0_40 = arith.constant 0 : index
    %c0_41 = arith.constant 0 : index
    %64 = vector.load %arg10[%c0_39, %c0_40, %c0_41] : memref<8x8x128xf32, #tpu.memory_space<vmem>>, vector<1x8x128xf32>
    %65 = vector.shape_cast %64 : vector<1x8x128xf32> to vector<8x128xf32>
    %66 = vector.shape_cast %63 : vector<8x128xf32> to vector<1x8x128xf32>
    tpu.vector_store %arg10[%c0_39, %c0_40, %c0_41], %66 {strides = array<i32>} : memref<8x8x128xf32, #tpu.memory_space<vmem>>, vector<1x8x128xf32>,
    %cst_42 = arith.constant dense<0xFF800000> : vector<8xf32>
    %67 = vector.multi_reduction <maximumf>, %63, %cst_42 [1] : vector<8x128xf32> to vector<8xf32>
    %68 = vector.shape_cast %67 : vector<8xf32> to vector<8x1xf32>
    %69 = vector.broadcast %68 : vector<8x1xf32> to vector<8x128xf32>
    %70 = arith.cmpf oge, %63, %69 : vector<8x128xf32>
    %c128_i32 = arith.constant 128 : i32
    %71 = vector.broadcast %c128_i32 : i32 to vector<8x128xi32>
    %72 = arith.select %70, %0, %71 : vector<8x128xi1>, vector<8x128xi32>
    %cst_43 = arith.constant dense<2147483647> : vector<8xi32>
    %73 = vector.multi_reduction <minsi>, %72, %cst_43 [1] : vector<8x128xi32> to vector<8xi32>
    %74 = vector.shape_cast %73 : vector<8xi32> to vector<8x1xi32>
    %75 = vector.broadcast %74 : vector<8x1xi32> to vector<8x128xi32>
    %76 = arith.cmpi eq, %0, %75 : vector<8x128xi32>
    %77 = arith.extui %76 : vector<8x128xi1> to vector<8x128xi32>
    %78 = arith.sitofp %77 : vector<8x128xi32> to vector<8x128xf32>
    %c0_44 = arith.constant 0 : index
    %c0_45 = arith.constant 0 : index
    %79 = vector.load %arg11[%c0_44, %c0_45] : memref<8x192xf32, #tpu.memory_space<vmem>>, vector<8x128xf32>
    tpu.vector_store %arg11[%c0_44, %c0_45], %78 {strides = array<i32>} : memref<8x192xf32, #tpu.memory_space<vmem>>, vector<8x128xf32>,
    %c0_46 = arith.constant 0 : index
    %c0_47 = arith.constant 0 : index
    %80 = vector.load %arg11[%c0_46, %c0_47] : memref<8x192xf32, #tpu.memory_space<vmem>>, vector<8x192xf32>
    %81 = arith.truncf %80 : vector<8x192xf32> to vector<8x192xbf16>
    %cst_48 = arith.constant dense<0.000000e+00> : vector<8x128xf32>
    %82 = tpu.matmul %81, %14, %cst_48 {dimension_numbers = #tpu.dot_dimension_numbers<[1], [0], [0], [1], [0, 0, 1, 1], [], []>} : vector<8x192xbf16>, vector<192x128xbf16>, vector<8x128xf32> -> vector<8x128xf32>
    %83 = arith.addf %82, %19 : vector<8x128xf32>
    %84 = arith.negf %83 : vector<8x128xf32>
    %85 = math.exp %84 : vector<8x128xf32>
    %cst_49 = arith.constant 1.000000e+00 : f32
    %86 = vector.broadcast %cst_49 : f32 to vector<8x128xf32>
    %87 = arith.addf %86, %85 : vector<8x128xf32>
    %88 = arith.divf %86, %87 : vector<8x128xf32>
    %89 = math.tanh %83 : vector<8x128xf32>
    %90 = vector.extract_strided_slice %88 {offsets = [0, 0], sizes = [8, 32], strides = [1, 1]} : vector<8x128xf32> to vector<8x32xf32>
    %91 = vector.extract_strided_slice %88 {offsets = [0, 32], sizes = [8, 32], strides = [1, 1]} : vector<8x128xf32> to vector<8x32xf32>
    %92 = vector.extract_strided_slice %89 {offsets = [0, 64], sizes = [8, 32], strides = [1, 1]} : vector<8x128xf32> to vector<8x32xf32>
    %93 = vector.extract_strided_slice %88 {offsets = [0, 96], sizes = [8, 32], strides = [1, 1]} : vector<8x128xf32> to vector<8x32xf32>
    %94 = arith.mulf %91, %39 : vector<8x32xf32>
    %95 = arith.mulf %90, %92 : vector<8x32xf32>
    %96 = arith.addf %94, %95 : vector<8x32xf32>
    %97 = math.tanh %96 : vector<8x32xf32>
    %98 = arith.mulf %93, %97 : vector<8x32xf32>
    %99 = arith.truncf %98 : vector<8x32xf32> to vector<8x32xbf16>
    %cst_50 = arith.constant dense<0.000000e+00> : vector<8x40xf32>
    %100 = tpu.matmul %99, %15, %cst_50 {dimension_numbers = #tpu.dot_dimension_numbers<[1], [0], [0], [1], [0, 0, 1, 1], [], []>} : vector<8x32xbf16>, vector<32x40xbf16>, vector<8x40xf32> -> vector<8x40xf32>
    %101 = arith.truncf %100 : vector<8x40xf32> to vector<8x40xbf16>
    %cst_51 = arith.constant dense<0.000000e+00> : vector<8x64xf32>
    %102 = tpu.matmul %101, %12, %cst_51 {dimension_numbers = #tpu.dot_dimension_numbers<[1], [0], [0], [1], [0, 0, 1, 1], [], []>} : vector<8x40xbf16>, vector<40x64xbf16>, vector<8x64xf32> -> vector<8x64xf32>
    %103 = arith.addf %102, %13 : vector<8x64xf32>
    %cst_52 = arith.constant dense<0xFF800000> : vector<8xf32>
    %104 = vector.multi_reduction <maximumf>, %103, %cst_52 [1] : vector<8x64xf32> to vector<8xf32>
    %105 = vector.shape_cast %104 : vector<8xf32> to vector<8x1xf32>
    %106 = vector.broadcast %105 : vector<8x1xf32> to vector<8x64xf32>
    %107 = arith.subf %103, %106 : vector<8x64xf32>
    %108 = math.exp %107 : vector<8x64xf32>
    %cst_53 = arith.constant dense<0.000000e+00> : vector<8xf32>
    %109 = vector.multi_reduction <add>, %108, %cst_53 [1] : vector<8x64xf32> to vector<8xf32>
    %110 = vector.shape_cast %109 : vector<8xf32> to vector<8x1xf32>
    %111 = vector.broadcast %110 : vector<8x1xf32> to vector<8x64xf32>
    %112 = arith.divf %108, %111 : vector<8x64xf32>
    %113 = arith.truncf %112 : vector<8x64xf32> to vector<8x64xbf16>
    %cst_54 = arith.constant dense<0.000000e+00> : vector<8x32xf32>
    %114 = tpu.matmul %113, %11, %cst_54 {dimension_numbers = #tpu.dot_dimension_numbers<[1], [0], [0], [1], [0, 0, 1, 1], [], []>} : vector<8x64xbf16>, vector<64x32xbf16>, vector<8x32xf32> -> vector<8x32xf32>
    %c0_55 = arith.constant 0 : index
    %c128_56 = arith.constant 128 : index
    %115 = vector.load %arg11[%c0_55, %c128_56] : memref<8x192xf32, #tpu.memory_space<vmem>>, vector<8x32xf32>
    tpu.vector_store %arg11[%c0_55, %c128_56], %114 {strides = array<i32>} : memref<8x192xf32, #tpu.memory_space<vmem>>, vector<8x32xf32>,
    %c0_57 = arith.constant 0 : index
    %c160_58 = arith.constant 160 : index
    %116 = vector.load %arg11[%c0_57, %c160_58] : memref<8x192xf32, #tpu.memory_space<vmem>>, vector<8x32xf32>
    tpu.vector_store %arg11[%c0_57, %c160_58], %98 {strides = array<i32>} : memref<8x192xf32, #tpu.memory_space<vmem>>, vector<8x32xf32>,
    %c0_59 = arith.constant 0 : index
    %c128_60 = arith.constant 128 : index
    %117 = vector.load %arg11[%c0_59, %c128_60] : memref<8x192xf32, #tpu.memory_space<vmem>>, vector<8x64xf32>
    %118 = arith.truncf %117 : vector<8x64xf32> to vector<8x64xbf16>
    %cst_61 = arith.constant dense<0.000000e+00> : vector<8x128xf32>
    %119 = tpu.matmul %118, %16, %cst_61 {dimension_numbers = #tpu.dot_dimension_numbers<[1], [0], [0], [1], [0, 0, 1, 1], [], []>} : vector<8x64xbf16>, vector<64x128xbf16>, vector<8x128xf32> -> vector<8x128xf32>
    %120 = arith.addf %119, %22 : vector<8x128xf32>
    %c1 = arith.constant 1 : index
    %c0_62 = arith.constant 0 : index
    %c0_63 = arith.constant 0 : index
    %121 = vector.load %arg10[%c1, %c0_62, %c0_63] : memref<8x8x128xf32, #tpu.memory_space<vmem>>, vector<1x8x128xf32>
    %122 = vector.shape_cast %121 : vector<1x8x128xf32> to vector<8x128xf32>
    %123 = vector.shape_cast %120 : vector<8x128xf32> to vector<1x8x128xf32>
    tpu.vector_store %arg10[%c1, %c0_62, %c0_63], %123 {strides = array<i32>} : memref<8x8x128xf32, #tpu.memory_space<vmem>>, vector<1x8x128xf32>,
    %cst_64 = arith.constant dense<0xFF800000> : vector<8xf32>
    %124 = vector.multi_reduction <maximumf>, %120, %cst_64 [1] : vector<8x128xf32> to vector<8xf32>
    %125 = vector.shape_cast %124 : vector<8xf32> to vector<8x1xf32>
    %126 = vector.broadcast %125 : vector<8x1xf32> to vector<8x128xf32>
    %127 = arith.cmpf oge, %120, %126 : vector<8x128xf32>
    %c128_i32_65 = arith.constant 128 : i32
    %128 = vector.broadcast %c128_i32_65 : i32 to vector<8x128xi32>
    %129 = arith.select %127, %0, %128 : vector<8x128xi1>, vector<8x128xi32>
    %cst_66 = arith.constant dense<2147483647> : vector<8xi32>
    %130 = vector.multi_reduction <minsi>, %129, %cst_66 [1] : vector<8x128xi32> to vector<8xi32>
    %131 = vector.shape_cast %130 : vector<8xi32> to vector<8x1xi32>
    %132 = vector.broadcast %131 : vector<8x1xi32> to vector<8x128xi32>
    %133 = arith.cmpi eq, %0, %132 : vector<8x128xi32>
    %134 = arith.extui %133 : vector<8x128xi1> to vector<8x128xi32>
    %135 = arith.sitofp %134 : vector<8x128xi32> to vector<8x128xf32>
    %c0_67 = arith.constant 0 : index
    %c0_68 = arith.constant 0 : index
    %136 = vector.load %arg11[%c0_67, %c0_68] : memref<8x192xf32, #tpu.memory_space<vmem>>, vector<8x128xf32>
    tpu.vector_store %arg11[%c0_67, %c0_68], %135 {strides = array<i32>} : memref<8x192xf32, #tpu.memory_space<vmem>>, vector<8x128xf32>,
    %c0_69 = arith.constant 0 : index
    %c0_70 = arith.constant 0 : index
    %137 = vector.load %arg11[%c0_69, %c0_70] : memref<8x192xf32, #tpu.memory_space<vmem>>, vector<8x192xf32>
    %138 = arith.truncf %137 : vector<8x192xf32> to vector<8x192xbf16>
    %cst_71 = arith.constant dense<0.000000e+00> : vector<8x128xf32>
    %139 = tpu.matmul %138, %14, %cst_71 {dimension_numbers = #tpu.dot_dimension_numbers<[1], [0], [0], [1], [0, 0, 1, 1], [], []>} : vector<8x192xbf16>, vector<192x128xbf16>, vector<8x128xf32> -> vector<8x128xf32>
    %140 = arith.addf %139, %19 : vector<8x128xf32>
    %141 = arith.negf %140 : vector<8x128xf32>
    %142 = math.exp %141 : vector<8x128xf32>
    %cst_72 = arith.constant 1.000000e+00 : f32
    %143 = vector.broadcast %cst_72 : f32 to vector<8x128xf32>
    %144 = arith.addf %143, %142 : vector<8x128xf32>
    %145 = arith.divf %143, %144 : vector<8x128xf32>
    %146 = math.tanh %140 : vector<8x128xf32>
    %147 = vector.extract_strided_slice %145 {offsets = [0, 0], sizes = [8, 32], strides = [1, 1]} : vector<8x128xf32> to vector<8x32xf32>
    %148 = vector.extract_strided_slice %145 {offsets = [0, 32], sizes = [8, 32], strides = [1, 1]} : vector<8x128xf32> to vector<8x32xf32>
    %149 = vector.extract_strided_slice %146 {offsets = [0, 64], sizes = [8, 32], strides = [1, 1]} : vector<8x128xf32> to vector<8x32xf32>
    %150 = vector.extract_strided_slice %145 {offsets = [0, 96], sizes = [8, 32], strides = [1, 1]} : vector<8x128xf32> to vector<8x32xf32>
    %151 = arith.mulf %148, %96 : vector<8x32xf32>
    %152 = arith.mulf %147, %149 : vector<8x32xf32>
    %153 = arith.addf %151, %152 : vector<8x32xf32>
    %154 = math.tanh %153 : vector<8x32xf32>
    %155 = arith.mulf %150, %154 : vector<8x32xf32>
    %156 = arith.truncf %155 : vector<8x32xf32> to vector<8x32xbf16>
    %cst_73 = arith.constant dense<0.000000e+00> : vector<8x40xf32>
    %157 = tpu.matmul %156, %15, %cst_73 {dimension_numbers = #tpu.dot_dimension_numbers<[1], [0], [0], [1], [0, 0, 1, 1], [], []>} : vector<8x32xbf16>, vector<32x40xbf16>, vector<8x40xf32> -> vector<8x40xf32>
    %158 = arith.truncf %157 : vector<8x40xf32> to vector<8x40xbf16>
    %cst_74 = arith.constant dense<0.000000e+00> : vector<8x64xf32>
    %159 = tpu.matmul %158, %12, %cst_74 {dimension_numbers = #tpu.dot_dimension_numbers<[1], [0], [0], [1], [0, 0, 1, 1], [], []>} : vector<8x40xbf16>, vector<40x64xbf16>, vector<8x64xf32> -> vector<8x64xf32>
    %160 = arith.addf %159, %13 : vector<8x64xf32>
    %cst_75 = arith.constant dense<0xFF800000> : vector<8xf32>
    %161 = vector.multi_reduction <maximumf>, %160, %cst_75 [1] : vector<8x64xf32> to vector<8xf32>
    %162 = vector.shape_cast %161 : vector<8xf32> to vector<8x1xf32>
    %163 = vector.broadcast %162 : vector<8x1xf32> to vector<8x64xf32>
    %164 = arith.subf %160, %163 : vector<8x64xf32>
    %165 = math.exp %164 : vector<8x64xf32>
    %cst_76 = arith.constant dense<0.000000e+00> : vector<8xf32>
    %166 = vector.multi_reduction <add>, %165, %cst_76 [1] : vector<8x64xf32> to vector<8xf32>
    %167 = vector.shape_cast %166 : vector<8xf32> to vector<8x1xf32>
    %168 = vector.broadcast %167 : vector<8x1xf32> to vector<8x64xf32>
    %169 = arith.divf %165, %168 : vector<8x64xf32>
    %170 = arith.truncf %169 : vector<8x64xf32> to vector<8x64xbf16>
    %cst_77 = arith.constant dense<0.000000e+00> : vector<8x32xf32>
    %171 = tpu.matmul %170, %11, %cst_77 {dimension_numbers = #tpu.dot_dimension_numbers<[1], [0], [0], [1], [0, 0, 1, 1], [], []>} : vector<8x64xbf16>, vector<64x32xbf16>, vector<8x32xf32> -> vector<8x32xf32>
    %c0_78 = arith.constant 0 : index
    %c128_79 = arith.constant 128 : index
    %172 = vector.load %arg11[%c0_78, %c128_79] : memref<8x192xf32, #tpu.memory_space<vmem>>, vector<8x32xf32>
    tpu.vector_store %arg11[%c0_78, %c128_79], %171 {strides = array<i32>} : memref<8x192xf32, #tpu.memory_space<vmem>>, vector<8x32xf32>,
    %c0_80 = arith.constant 0 : index
    %c160_81 = arith.constant 160 : index
    %173 = vector.load %arg11[%c0_80, %c160_81] : memref<8x192xf32, #tpu.memory_space<vmem>>, vector<8x32xf32>
    tpu.vector_store %arg11[%c0_80, %c160_81], %155 {strides = array<i32>} : memref<8x192xf32, #tpu.memory_space<vmem>>, vector<8x32xf32>,
    %c0_82 = arith.constant 0 : index
    %c128_83 = arith.constant 128 : index
    %174 = vector.load %arg11[%c0_82, %c128_83] : memref<8x192xf32, #tpu.memory_space<vmem>>, vector<8x64xf32>
    %175 = arith.truncf %174 : vector<8x64xf32> to vector<8x64xbf16>
    %cst_84 = arith.constant dense<0.000000e+00> : vector<8x128xf32>
    %176 = tpu.matmul %175, %16, %cst_84 {dimension_numbers = #tpu.dot_dimension_numbers<[1], [0], [0], [1], [0, 0, 1, 1], [], []>} : vector<8x64xbf16>, vector<64x128xbf16>, vector<8x128xf32> -> vector<8x128xf32>
    %177 = arith.addf %176, %22 : vector<8x128xf32>
    %c2 = arith.constant 2 : index
    %c0_85 = arith.constant 0 : index
    %c0_86 = arith.constant 0 : index
    %178 = vector.load %arg10[%c2, %c0_85, %c0_86] : memref<8x8x128xf32, #tpu.memory_space<vmem>>, vector<1x8x128xf32>
    %179 = vector.shape_cast %178 : vector<1x8x128xf32> to vector<8x128xf32>
    %180 = vector.shape_cast %177 : vector<8x128xf32> to vector<1x8x128xf32>
    tpu.vector_store %arg10[%c2, %c0_85, %c0_86], %180 {strides = array<i32>} : memref<8x8x128xf32, #tpu.memory_space<vmem>>, vector<1x8x128xf32>,
    %cst_87 = arith.constant dense<0xFF800000> : vector<8xf32>
    %181 = vector.multi_reduction <maximumf>, %177, %cst_87 [1] : vector<8x128xf32> to vector<8xf32>
    %182 = vector.shape_cast %181 : vector<8xf32> to vector<8x1xf32>
    %183 = vector.broadcast %182 : vector<8x1xf32> to vector<8x128xf32>
    %184 = arith.cmpf oge, %177, %183 : vector<8x128xf32>
    %c128_i32_88 = arith.constant 128 : i32
    %185 = vector.broadcast %c128_i32_88 : i32 to vector<8x128xi32>
    %186 = arith.select %184, %0, %185 : vector<8x128xi1>, vector<8x128xi32>
    %cst_89 = arith.constant dense<2147483647> : vector<8xi32>
    %187 = vector.multi_reduction <minsi>, %186, %cst_89 [1] : vector<8x128xi32> to vector<8xi32>
    %188 = vector.shape_cast %187 : vector<8xi32> to vector<8x1xi32>
    %189 = vector.broadcast %188 : vector<8x1xi32> to vector<8x128xi32>
    %190 = arith.cmpi eq, %0, %189 : vector<8x128xi32>
    %191 = arith.extui %190 : vector<8x128xi1> to vector<8x128xi32>
    %192 = arith.sitofp %191 : vector<8x128xi32> to vector<8x128xf32>
    %c0_90 = arith.constant 0 : index
    %c0_91 = arith.constant 0 : index
    %193 = vector.load %arg11[%c0_90, %c0_91] : memref<8x192xf32, #tpu.memory_space<vmem>>, vector<8x128xf32>
    tpu.vector_store %arg11[%c0_90, %c0_91], %192 {strides = array<i32>} : memref<8x192xf32, #tpu.memory_space<vmem>>, vector<8x128xf32>,
    %c0_92 = arith.constant 0 : index
    %c0_93 = arith.constant 0 : index
    %194 = vector.load %arg11[%c0_92, %c0_93] : memref<8x192xf32, #tpu.memory_space<vmem>>, vector<8x192xf32>
    %195 = arith.truncf %194 : vector<8x192xf32> to vector<8x192xbf16>
    %cst_94 = arith.constant dense<0.000000e+00> : vector<8x128xf32>
    %196 = tpu.matmul %195, %14, %cst_94 {dimension_numbers = #tpu.dot_dimension_numbers<[1], [0], [0], [1], [0, 0, 1, 1], [], []>} : vector<8x192xbf16>, vector<192x128xbf16>, vector<8x128xf32> -> vector<8x128xf32>
    %197 = arith.addf %196, %19 : vector<8x128xf32>
    %198 = arith.negf %197 : vector<8x128xf32>
    %199 = math.exp %198 : vector<8x128xf32>
    %cst_95 = arith.constant 1.000000e+00 : f32
    %200 = vector.broadcast %cst_95 : f32 to vector<8x128xf32>
    %201 = arith.addf %200, %199 : vector<8x128xf32>
    %202 = arith.divf %200, %201 : vector<8x128xf32>
    %203 = math.tanh %197 : vector<8x128xf32>
    %204 = vector.extract_strided_slice %202 {offsets = [0, 0], sizes = [8, 32], strides = [1, 1]} : vector<8x128xf32> to vector<8x32xf32>
    %205 = vector.extract_strided_slice %202 {offsets = [0, 32], sizes = [8, 32], strides = [1, 1]} : vector<8x128xf32> to vector<8x32xf32>
    %206 = vector.extract_strided_slice %203 {offsets = [0, 64], sizes = [8, 32], strides = [1, 1]} : vector<8x128xf32> to vector<8x32xf32>
    %207 = vector.extract_strided_slice %202 {offsets = [0, 96], sizes = [8, 32], strides = [1, 1]} : vector<8x128xf32> to vector<8x32xf32>
    %208 = arith.mulf %205, %153 : vector<8x32xf32>
    %209 = arith.mulf %204, %206 : vector<8x32xf32>
    %210 = arith.addf %208, %209 : vector<8x32xf32>
    %211 = math.tanh %210 : vector<8x32xf32>
    %212 = arith.mulf %207, %211 : vector<8x32xf32>
    %213 = arith.truncf %212 : vector<8x32xf32> to vector<8x32xbf16>
    %cst_96 = arith.constant dense<0.000000e+00> : vector<8x40xf32>
    %214 = tpu.matmul %213, %15, %cst_96 {dimension_numbers = #tpu.dot_dimension_numbers<[1], [0], [0], [1], [0, 0, 1, 1], [], []>} : vector<8x32xbf16>, vector<32x40xbf16>, vector<8x40xf32> -> vector<8x40xf32>
    %215 = arith.truncf %214 : vector<8x40xf32> to vector<8x40xbf16>
    %cst_97 = arith.constant dense<0.000000e+00> : vector<8x64xf32>
    %216 = tpu.matmul %215, %12, %cst_97 {dimension_numbers = #tpu.dot_dimension_numbers<[1], [0], [0], [1], [0, 0, 1, 1], [], []>} : vector<8x40xbf16>, vector<40x64xbf16>, vector<8x64xf32> -> vector<8x64xf32>
    %217 = arith.addf %216, %13 : vector<8x64xf32>
    %cst_98 = arith.constant dense<0xFF800000> : vector<8xf32>
    %218 = vector.multi_reduction <maximumf>, %217, %cst_98 [1] : vector<8x64xf32> to vector<8xf32>
    %219 = vector.shape_cast %218 : vector<8xf32> to vector<8x1xf32>
    %220 = vector.broadcast %219 : vector<8x1xf32> to vector<8x64xf32>
    %221 = arith.subf %217, %220 : vector<8x64xf32>
    %222 = math.exp %221 : vector<8x64xf32>
    %cst_99 = arith.constant dense<0.000000e+00> : vector<8xf32>
    %223 = vector.multi_reduction <add>, %222, %cst_99 [1] : vector<8x64xf32> to vector<8xf32>
    %224 = vector.shape_cast %223 : vector<8xf32> to vector<8x1xf32>
    %225 = vector.broadcast %224 : vector<8x1xf32> to vector<8x64xf32>
    %226 = arith.divf %222, %225 : vector<8x64xf32>
    %227 = arith.truncf %226 : vector<8x64xf32> to vector<8x64xbf16>
    %cst_100 = arith.constant dense<0.000000e+00> : vector<8x32xf32>
    %228 = tpu.matmul %227, %11, %cst_100 {dimension_numbers = #tpu.dot_dimension_numbers<[1], [0], [0], [1], [0, 0, 1, 1], [], []>} : vector<8x64xbf16>, vector<64x32xbf16>, vector<8x32xf32> -> vector<8x32xf32>
    %c0_101 = arith.constant 0 : index
    %c128_102 = arith.constant 128 : index
    %229 = vector.load %arg11[%c0_101, %c128_102] : memref<8x192xf32, #tpu.memory_space<vmem>>, vector<8x32xf32>
    tpu.vector_store %arg11[%c0_101, %c128_102], %228 {strides = array<i32>} : memref<8x192xf32, #tpu.memory_space<vmem>>, vector<8x32xf32>,
    %c0_103 = arith.constant 0 : index
    %c160_104 = arith.constant 160 : index
    %230 = vector.load %arg11[%c0_103, %c160_104] : memref<8x192xf32, #tpu.memory_space<vmem>>, vector<8x32xf32>
    tpu.vector_store %arg11[%c0_103, %c160_104], %212 {strides = array<i32>} : memref<8x192xf32, #tpu.memory_space<vmem>>, vector<8x32xf32>,
    %c0_105 = arith.constant 0 : index
    %c128_106 = arith.constant 128 : index
    %231 = vector.load %arg11[%c0_105, %c128_106] : memref<8x192xf32, #tpu.memory_space<vmem>>, vector<8x64xf32>
    %232 = arith.truncf %231 : vector<8x64xf32> to vector<8x64xbf16>
    %cst_107 = arith.constant dense<0.000000e+00> : vector<8x128xf32>
    %233 = tpu.matmul %232, %16, %cst_107 {dimension_numbers = #tpu.dot_dimension_numbers<[1], [0], [0], [1], [0, 0, 1, 1], [], []>} : vector<8x64xbf16>, vector<64x128xbf16>, vector<8x128xf32> -> vector<8x128xf32>
    %234 = arith.addf %233, %22 : vector<8x128xf32>
    %c3 = arith.constant 3 : index
    %c0_108 = arith.constant 0 : index
    %c0_109 = arith.constant 0 : index
    %235 = vector.load %arg10[%c3, %c0_108, %c0_109] : memref<8x8x128xf32, #tpu.memory_space<vmem>>, vector<1x8x128xf32>
    %236 = vector.shape_cast %235 : vector<1x8x128xf32> to vector<8x128xf32>
    %237 = vector.shape_cast %234 : vector<8x128xf32> to vector<1x8x128xf32>
    tpu.vector_store %arg10[%c3, %c0_108, %c0_109], %237 {strides = array<i32>} : memref<8x8x128xf32, #tpu.memory_space<vmem>>, vector<1x8x128xf32>,
    %cst_110 = arith.constant dense<0xFF800000> : vector<8xf32>
    %238 = vector.multi_reduction <maximumf>, %234, %cst_110 [1] : vector<8x128xf32> to vector<8xf32>
    %239 = vector.shape_cast %238 : vector<8xf32> to vector<8x1xf32>
    %240 = vector.broadcast %239 : vector<8x1xf32> to vector<8x128xf32>
    %241 = arith.cmpf oge, %234, %240 : vector<8x128xf32>
    %c128_i32_111 = arith.constant 128 : i32
    %242 = vector.broadcast %c128_i32_111 : i32 to vector<8x128xi32>
    %243 = arith.select %241, %0, %242 : vector<8x128xi1>, vector<8x128xi32>
    %cst_112 = arith.constant dense<2147483647> : vector<8xi32>
    %244 = vector.multi_reduction <minsi>, %243, %cst_112 [1] : vector<8x128xi32> to vector<8xi32>
    %245 = vector.shape_cast %244 : vector<8xi32> to vector<8x1xi32>
    %246 = vector.broadcast %245 : vector<8x1xi32> to vector<8x128xi32>
    %247 = arith.cmpi eq, %0, %246 : vector<8x128xi32>
    %248 = arith.extui %247 : vector<8x128xi1> to vector<8x128xi32>
    %249 = arith.sitofp %248 : vector<8x128xi32> to vector<8x128xf32>
    %c0_113 = arith.constant 0 : index
    %c0_114 = arith.constant 0 : index
    %250 = vector.load %arg11[%c0_113, %c0_114] : memref<8x192xf32, #tpu.memory_space<vmem>>, vector<8x128xf32>
    tpu.vector_store %arg11[%c0_113, %c0_114], %249 {strides = array<i32>} : memref<8x192xf32, #tpu.memory_space<vmem>>, vector<8x128xf32>,
    %c0_115 = arith.constant 0 : index
    %c0_116 = arith.constant 0 : index
    %251 = vector.load %arg11[%c0_115, %c0_116] : memref<8x192xf32, #tpu.memory_space<vmem>>, vector<8x192xf32>
    %252 = arith.truncf %251 : vector<8x192xf32> to vector<8x192xbf16>
    %cst_117 = arith.constant dense<0.000000e+00> : vector<8x128xf32>
    %253 = tpu.matmul %252, %14, %cst_117 {dimension_numbers = #tpu.dot_dimension_numbers<[1], [0], [0], [1], [0, 0, 1, 1], [], []>} : vector<8x192xbf16>, vector<192x128xbf16>, vector<8x128xf32> -> vector<8x128xf32>
    %254 = arith.addf %253, %19 : vector<8x128xf32>
    %255 = arith.negf %254 : vector<8x128xf32>
    %256 = math.exp %255 : vector<8x128xf32>
    %cst_118 = arith.constant 1.000000e+00 : f32
    %257 = vector.broadcast %cst_118 : f32 to vector<8x128xf32>
    %258 = arith.addf %257, %256 : vector<8x128xf32>
    %259 = arith.divf %257, %258 : vector<8x128xf32>
    %260 = math.tanh %254 : vector<8x128xf32>
    %261 = vector.extract_strided_slice %259 {offsets = [0, 0], sizes = [8, 32], strides = [1, 1]} : vector<8x128xf32> to vector<8x32xf32>
    %262 = vector.extract_strided_slice %259 {offsets = [0, 32], sizes = [8, 32], strides = [1, 1]} : vector<8x128xf32> to vector<8x32xf32>
    %263 = vector.extract_strided_slice %260 {offsets = [0, 64], sizes = [8, 32], strides = [1, 1]} : vector<8x128xf32> to vector<8x32xf32>
    %264 = vector.extract_strided_slice %259 {offsets = [0, 96], sizes = [8, 32], strides = [1, 1]} : vector<8x128xf32> to vector<8x32xf32>
    %265 = arith.mulf %262, %210 : vector<8x32xf32>
    %266 = arith.mulf %261, %263 : vector<8x32xf32>
    %267 = arith.addf %265, %266 : vector<8x32xf32>
    %268 = math.tanh %267 : vector<8x32xf32>
    %269 = arith.mulf %264, %268 : vector<8x32xf32>
    %270 = arith.truncf %269 : vector<8x32xf32> to vector<8x32xbf16>
    %cst_119 = arith.constant dense<0.000000e+00> : vector<8x40xf32>
    %271 = tpu.matmul %270, %15, %cst_119 {dimension_numbers = #tpu.dot_dimension_numbers<[1], [0], [0], [1], [0, 0, 1, 1], [], []>} : vector<8x32xbf16>, vector<32x40xbf16>, vector<8x40xf32> -> vector<8x40xf32>
    %272 = arith.truncf %271 : vector<8x40xf32> to vector<8x40xbf16>
    %cst_120 = arith.constant dense<0.000000e+00> : vector<8x64xf32>
    %273 = tpu.matmul %272, %12, %cst_120 {dimension_numbers = #tpu.dot_dimension_numbers<[1], [0], [0], [1], [0, 0, 1, 1], [], []>} : vector<8x40xbf16>, vector<40x64xbf16>, vector<8x64xf32> -> vector<8x64xf32>
    %274 = arith.addf %273, %13 : vector<8x64xf32>
    %cst_121 = arith.constant dense<0xFF800000> : vector<8xf32>
    %275 = vector.multi_reduction <maximumf>, %274, %cst_121 [1] : vector<8x64xf32> to vector<8xf32>
    %276 = vector.shape_cast %275 : vector<8xf32> to vector<8x1xf32>
    %277 = vector.broadcast %276 : vector<8x1xf32> to vector<8x64xf32>
    %278 = arith.subf %274, %277 : vector<8x64xf32>
    %279 = math.exp %278 : vector<8x64xf32>
    %cst_122 = arith.constant dense<0.000000e+00> : vector<8xf32>
    %280 = vector.multi_reduction <add>, %279, %cst_122 [1] : vector<8x64xf32> to vector<8xf32>
    %281 = vector.shape_cast %280 : vector<8xf32> to vector<8x1xf32>
    %282 = vector.broadcast %281 : vector<8x1xf32> to vector<8x64xf32>
    %283 = arith.divf %279, %282 : vector<8x64xf32>
    %284 = arith.truncf %283 : vector<8x64xf32> to vector<8x64xbf16>
    %cst_123 = arith.constant dense<0.000000e+00> : vector<8x32xf32>
    %285 = tpu.matmul %284, %11, %cst_123 {dimension_numbers = #tpu.dot_dimension_numbers<[1], [0], [0], [1], [0, 0, 1, 1], [], []>} : vector<8x64xbf16>, vector<64x32xbf16>, vector<8x32xf32> -> vector<8x32xf32>
    %c0_124 = arith.constant 0 : index
    %c128_125 = arith.constant 128 : index
    %286 = vector.load %arg11[%c0_124, %c128_125] : memref<8x192xf32, #tpu.memory_space<vmem>>, vector<8x32xf32>
    tpu.vector_store %arg11[%c0_124, %c128_125], %285 {strides = array<i32>} : memref<8x192xf32, #tpu.memory_space<vmem>>, vector<8x32xf32>,
    %c0_126 = arith.constant 0 : index
    %c160_127 = arith.constant 160 : index
    %287 = vector.load %arg11[%c0_126, %c160_127] : memref<8x192xf32, #tpu.memory_space<vmem>>, vector<8x32xf32>
    tpu.vector_store %arg11[%c0_126, %c160_127], %269 {strides = array<i32>} : memref<8x192xf32, #tpu.memory_space<vmem>>, vector<8x32xf32>,
    %c0_128 = arith.constant 0 : index
    %c128_129 = arith.constant 128 : index
    %288 = vector.load %arg11[%c0_128, %c128_129] : memref<8x192xf32, #tpu.memory_space<vmem>>, vector<8x64xf32>
    %289 = arith.truncf %288 : vector<8x64xf32> to vector<8x64xbf16>
    %cst_130 = arith.constant dense<0.000000e+00> : vector<8x128xf32>
    %290 = tpu.matmul %289, %16, %cst_130 {dimension_numbers = #tpu.dot_dimension_numbers<[1], [0], [0], [1], [0, 0, 1, 1], [], []>} : vector<8x64xbf16>, vector<64x128xbf16>, vector<8x128xf32> -> vector<8x128xf32>
    %291 = arith.addf %290, %22 : vector<8x128xf32>
    %c4 = arith.constant 4 : index
    %c0_131 = arith.constant 0 : index
    %c0_132 = arith.constant 0 : index
    %292 = vector.load %arg10[%c4, %c0_131, %c0_132] : memref<8x8x128xf32, #tpu.memory_space<vmem>>, vector<1x8x128xf32>
    %293 = vector.shape_cast %292 : vector<1x8x128xf32> to vector<8x128xf32>
    %294 = vector.shape_cast %291 : vector<8x128xf32> to vector<1x8x128xf32>
    tpu.vector_store %arg10[%c4, %c0_131, %c0_132], %294 {strides = array<i32>} : memref<8x8x128xf32, #tpu.memory_space<vmem>>, vector<1x8x128xf32>,
    %cst_133 = arith.constant dense<0xFF800000> : vector<8xf32>
    %295 = vector.multi_reduction <maximumf>, %291, %cst_133 [1] : vector<8x128xf32> to vector<8xf32>
    %296 = vector.shape_cast %295 : vector<8xf32> to vector<8x1xf32>
    %297 = vector.broadcast %296 : vector<8x1xf32> to vector<8x128xf32>
    %298 = arith.cmpf oge, %291, %297 : vector<8x128xf32>
    %c128_i32_134 = arith.constant 128 : i32
    %299 = vector.broadcast %c128_i32_134 : i32 to vector<8x128xi32>
    %300 = arith.select %298, %0, %299 : vector<8x128xi1>, vector<8x128xi32>
    %cst_135 = arith.constant dense<2147483647> : vector<8xi32>
    %301 = vector.multi_reduction <minsi>, %300, %cst_135 [1] : vector<8x128xi32> to vector<8xi32>
    %302 = vector.shape_cast %301 : vector<8xi32> to vector<8x1xi32>
    %303 = vector.broadcast %302 : vector<8x1xi32> to vector<8x128xi32>
    %304 = arith.cmpi eq, %0, %303 : vector<8x128xi32>
    %305 = arith.extui %304 : vector<8x128xi1> to vector<8x128xi32>
    %306 = arith.sitofp %305 : vector<8x128xi32> to vector<8x128xf32>
    %c0_136 = arith.constant 0 : index
    %c0_137 = arith.constant 0 : index
    %307 = vector.load %arg11[%c0_136, %c0_137] : memref<8x192xf32, #tpu.memory_space<vmem>>, vector<8x128xf32>
    tpu.vector_store %arg11[%c0_136, %c0_137], %306 {strides = array<i32>} : memref<8x192xf32, #tpu.memory_space<vmem>>, vector<8x128xf32>,
    %c0_138 = arith.constant 0 : index
    %c0_139 = arith.constant 0 : index
    %308 = vector.load %arg11[%c0_138, %c0_139] : memref<8x192xf32, #tpu.memory_space<vmem>>, vector<8x192xf32>
    %309 = arith.truncf %308 : vector<8x192xf32> to vector<8x192xbf16>
    %cst_140 = arith.constant dense<0.000000e+00> : vector<8x128xf32>
    %310 = tpu.matmul %309, %14, %cst_140 {dimension_numbers = #tpu.dot_dimension_numbers<[1], [0], [0], [1], [0, 0, 1, 1], [], []>} : vector<8x192xbf16>, vector<192x128xbf16>, vector<8x128xf32> -> vector<8x128xf32>
    %311 = arith.addf %310, %19 : vector<8x128xf32>
    %312 = arith.negf %311 : vector<8x128xf32>
    %313 = math.exp %312 : vector<8x128xf32>
    %cst_141 = arith.constant 1.000000e+00 : f32
    %314 = vector.broadcast %cst_141 : f32 to vector<8x128xf32>
    %315 = arith.addf %314, %313 : vector<8x128xf32>
    %316 = arith.divf %314, %315 : vector<8x128xf32>
    %317 = math.tanh %311 : vector<8x128xf32>
    %318 = vector.extract_strided_slice %316 {offsets = [0, 0], sizes = [8, 32], strides = [1, 1]} : vector<8x128xf32> to vector<8x32xf32>
    %319 = vector.extract_strided_slice %316 {offsets = [0, 32], sizes = [8, 32], strides = [1, 1]} : vector<8x128xf32> to vector<8x32xf32>
    %320 = vector.extract_strided_slice %317 {offsets = [0, 64], sizes = [8, 32], strides = [1, 1]} : vector<8x128xf32> to vector<8x32xf32>
    %321 = vector.extract_strided_slice %316 {offsets = [0, 96], sizes = [8, 32], strides = [1, 1]} : vector<8x128xf32> to vector<8x32xf32>
    %322 = arith.mulf %319, %267 : vector<8x32xf32>
    %323 = arith.mulf %318, %320 : vector<8x32xf32>
    %324 = arith.addf %322, %323 : vector<8x32xf32>
    %325 = math.tanh %324 : vector<8x32xf32>
    %326 = arith.mulf %321, %325 : vector<8x32xf32>
    %327 = arith.truncf %326 : vector<8x32xf32> to vector<8x32xbf16>
    %cst_142 = arith.constant dense<0.000000e+00> : vector<8x40xf32>
    %328 = tpu.matmul %327, %15, %cst_142 {dimension_numbers = #tpu.dot_dimension_numbers<[1], [0], [0], [1], [0, 0, 1, 1], [], []>} : vector<8x32xbf16>, vector<32x40xbf16>, vector<8x40xf32> -> vector<8x40xf32>
    %329 = arith.truncf %328 : vector<8x40xf32> to vector<8x40xbf16>
    %cst_143 = arith.constant dense<0.000000e+00> : vector<8x64xf32>
    %330 = tpu.matmul %329, %12, %cst_143 {dimension_numbers = #tpu.dot_dimension_numbers<[1], [0], [0], [1], [0, 0, 1, 1], [], []>} : vector<8x40xbf16>, vector<40x64xbf16>, vector<8x64xf32> -> vector<8x64xf32>
    %331 = arith.addf %330, %13 : vector<8x64xf32>
    %cst_144 = arith.constant dense<0xFF800000> : vector<8xf32>
    %332 = vector.multi_reduction <maximumf>, %331, %cst_144 [1] : vector<8x64xf32> to vector<8xf32>
    %333 = vector.shape_cast %332 : vector<8xf32> to vector<8x1xf32>
    %334 = vector.broadcast %333 : vector<8x1xf32> to vector<8x64xf32>
    %335 = arith.subf %331, %334 : vector<8x64xf32>
    %336 = math.exp %335 : vector<8x64xf32>
    %cst_145 = arith.constant dense<0.000000e+00> : vector<8xf32>
    %337 = vector.multi_reduction <add>, %336, %cst_145 [1] : vector<8x64xf32> to vector<8xf32>
    %338 = vector.shape_cast %337 : vector<8xf32> to vector<8x1xf32>
    %339 = vector.broadcast %338 : vector<8x1xf32> to vector<8x64xf32>
    %340 = arith.divf %336, %339 : vector<8x64xf32>
    %341 = arith.truncf %340 : vector<8x64xf32> to vector<8x64xbf16>
    %cst_146 = arith.constant dense<0.000000e+00> : vector<8x32xf32>
    %342 = tpu.matmul %341, %11, %cst_146 {dimension_numbers = #tpu.dot_dimension_numbers<[1], [0], [0], [1], [0, 0, 1, 1], [], []>} : vector<8x64xbf16>, vector<64x32xbf16>, vector<8x32xf32> -> vector<8x32xf32>
    %c0_147 = arith.constant 0 : index
    %c128_148 = arith.constant 128 : index
    %343 = vector.load %arg11[%c0_147, %c128_148] : memref<8x192xf32, #tpu.memory_space<vmem>>, vector<8x32xf32>
    tpu.vector_store %arg11[%c0_147, %c128_148], %342 {strides = array<i32>} : memref<8x192xf32, #tpu.memory_space<vmem>>, vector<8x32xf32>,
    %c0_149 = arith.constant 0 : index
    %c160_150 = arith.constant 160 : index
    %344 = vector.load %arg11[%c0_149, %c160_150] : memref<8x192xf32, #tpu.memory_space<vmem>>, vector<8x32xf32>
    tpu.vector_store %arg11[%c0_149, %c160_150], %326 {strides = array<i32>} : memref<8x192xf32, #tpu.memory_space<vmem>>, vector<8x32xf32>,
    %c0_151 = arith.constant 0 : index
    %c128_152 = arith.constant 128 : index
    %345 = vector.load %arg11[%c0_151, %c128_152] : memref<8x192xf32, #tpu.memory_space<vmem>>, vector<8x64xf32>
    %346 = arith.truncf %345 : vector<8x64xf32> to vector<8x64xbf16>
    %cst_153 = arith.constant dense<0.000000e+00> : vector<8x128xf32>
    %347 = tpu.matmul %346, %16, %cst_153 {dimension_numbers = #tpu.dot_dimension_numbers<[1], [0], [0], [1], [0, 0, 1, 1], [], []>} : vector<8x64xbf16>, vector<64x128xbf16>, vector<8x128xf32> -> vector<8x128xf32>
    %348 = arith.addf %347, %22 : vector<8x128xf32>
    %c5 = arith.constant 5 : index
    %c0_154 = arith.constant 0 : index
    %c0_155 = arith.constant 0 : index
    %349 = vector.load %arg10[%c5, %c0_154, %c0_155] : memref<8x8x128xf32, #tpu.memory_space<vmem>>, vector<1x8x128xf32>
    %350 = vector.shape_cast %349 : vector<1x8x128xf32> to vector<8x128xf32>
    %351 = vector.shape_cast %348 : vector<8x128xf32> to vector<1x8x128xf32>
    tpu.vector_store %arg10[%c5, %c0_154, %c0_155], %351 {strides = array<i32>} : memref<8x8x128xf32, #tpu.memory_space<vmem>>, vector<1x8x128xf32>,
    %cst_156 = arith.constant dense<0xFF800000> : vector<8xf32>
    %352 = vector.multi_reduction <maximumf>, %348, %cst_156 [1] : vector<8x128xf32> to vector<8xf32>
    %353 = vector.shape_cast %352 : vector<8xf32> to vector<8x1xf32>
    %354 = vector.broadcast %353 : vector<8x1xf32> to vector<8x128xf32>
    %355 = arith.cmpf oge, %348, %354 : vector<8x128xf32>
    %c128_i32_157 = arith.constant 128 : i32
    %356 = vector.broadcast %c128_i32_157 : i32 to vector<8x128xi32>
    %357 = arith.select %355, %0, %356 : vector<8x128xi1>, vector<8x128xi32>
    %cst_158 = arith.constant dense<2147483647> : vector<8xi32>
    %358 = vector.multi_reduction <minsi>, %357, %cst_158 [1] : vector<8x128xi32> to vector<8xi32>
    %359 = vector.shape_cast %358 : vector<8xi32> to vector<8x1xi32>
    %360 = vector.broadcast %359 : vector<8x1xi32> to vector<8x128xi32>
    %361 = arith.cmpi eq, %0, %360 : vector<8x128xi32>
    %362 = arith.extui %361 : vector<8x128xi1> to vector<8x128xi32>
    %363 = arith.sitofp %362 : vector<8x128xi32> to vector<8x128xf32>
    %c0_159 = arith.constant 0 : index
    %c0_160 = arith.constant 0 : index
    %364 = vector.load %arg11[%c0_159, %c0_160] : memref<8x192xf32, #tpu.memory_space<vmem>>, vector<8x128xf32>
    tpu.vector_store %arg11[%c0_159, %c0_160], %363 {strides = array<i32>} : memref<8x192xf32, #tpu.memory_space<vmem>>, vector<8x128xf32>,
    %c0_161 = arith.constant 0 : index
    %c0_162 = arith.constant 0 : index
    %365 = vector.load %arg11[%c0_161, %c0_162] : memref<8x192xf32, #tpu.memory_space<vmem>>, vector<8x192xf32>
    %366 = arith.truncf %365 : vector<8x192xf32> to vector<8x192xbf16>
    %cst_163 = arith.constant dense<0.000000e+00> : vector<8x128xf32>
    %367 = tpu.matmul %366, %14, %cst_163 {dimension_numbers = #tpu.dot_dimension_numbers<[1], [0], [0], [1], [0, 0, 1, 1], [], []>} : vector<8x192xbf16>, vector<192x128xbf16>, vector<8x128xf32> -> vector<8x128xf32>
    %368 = arith.addf %367, %19 : vector<8x128xf32>
    %369 = arith.negf %368 : vector<8x128xf32>
    %370 = math.exp %369 : vector<8x128xf32>
    %cst_164 = arith.constant 1.000000e+00 : f32
    %371 = vector.broadcast %cst_164 : f32 to vector<8x128xf32>
    %372 = arith.addf %371, %370 : vector<8x128xf32>
    %373 = arith.divf %371, %372 : vector<8x128xf32>
    %374 = math.tanh %368 : vector<8x128xf32>
    %375 = vector.extract_strided_slice %373 {offsets = [0, 0], sizes = [8, 32], strides = [1, 1]} : vector<8x128xf32> to vector<8x32xf32>
    %376 = vector.extract_strided_slice %373 {offsets = [0, 32], sizes = [8, 32], strides = [1, 1]} : vector<8x128xf32> to vector<8x32xf32>
    %377 = vector.extract_strided_slice %374 {offsets = [0, 64], sizes = [8, 32], strides = [1, 1]} : vector<8x128xf32> to vector<8x32xf32>
    %378 = vector.extract_strided_slice %373 {offsets = [0, 96], sizes = [8, 32], strides = [1, 1]} : vector<8x128xf32> to vector<8x32xf32>
    %379 = arith.mulf %376, %324 : vector<8x32xf32>
    %380 = arith.mulf %375, %377 : vector<8x32xf32>
    %381 = arith.addf %379, %380 : vector<8x32xf32>
    %382 = math.tanh %381 : vector<8x32xf32>
    %383 = arith.mulf %378, %382 : vector<8x32xf32>
    %384 = arith.truncf %383 : vector<8x32xf32> to vector<8x32xbf16>
    %cst_165 = arith.constant dense<0.000000e+00> : vector<8x40xf32>
    %385 = tpu.matmul %384, %15, %cst_165 {dimension_numbers = #tpu.dot_dimension_numbers<[1], [0], [0], [1], [0, 0, 1, 1], [], []>} : vector<8x32xbf16>, vector<32x40xbf16>, vector<8x40xf32> -> vector<8x40xf32>
    %386 = arith.truncf %385 : vector<8x40xf32> to vector<8x40xbf16>
    %cst_166 = arith.constant dense<0.000000e+00> : vector<8x64xf32>
    %387 = tpu.matmul %386, %12, %cst_166 {dimension_numbers = #tpu.dot_dimension_numbers<[1], [0], [0], [1], [0, 0, 1, 1], [], []>} : vector<8x40xbf16>, vector<40x64xbf16>, vector<8x64xf32> -> vector<8x64xf32>
    %388 = arith.addf %387, %13 : vector<8x64xf32>
    %cst_167 = arith.constant dense<0xFF800000> : vector<8xf32>
    %389 = vector.multi_reduction <maximumf>, %388, %cst_167 [1] : vector<8x64xf32> to vector<8xf32>
    %390 = vector.shape_cast %389 : vector<8xf32> to vector<8x1xf32>
    %391 = vector.broadcast %390 : vector<8x1xf32> to vector<8x64xf32>
    %392 = arith.subf %388, %391 : vector<8x64xf32>
    %393 = math.exp %392 : vector<8x64xf32>
    %cst_168 = arith.constant dense<0.000000e+00> : vector<8xf32>
    %394 = vector.multi_reduction <add>, %393, %cst_168 [1] : vector<8x64xf32> to vector<8xf32>
    %395 = vector.shape_cast %394 : vector<8xf32> to vector<8x1xf32>
    %396 = vector.broadcast %395 : vector<8x1xf32> to vector<8x64xf32>
    %397 = arith.divf %393, %396 : vector<8x64xf32>
    %398 = arith.truncf %397 : vector<8x64xf32> to vector<8x64xbf16>
    %cst_169 = arith.constant dense<0.000000e+00> : vector<8x32xf32>
    %399 = tpu.matmul %398, %11, %cst_169 {dimension_numbers = #tpu.dot_dimension_numbers<[1], [0], [0], [1], [0, 0, 1, 1], [], []>} : vector<8x64xbf16>, vector<64x32xbf16>, vector<8x32xf32> -> vector<8x32xf32>
    %c0_170 = arith.constant 0 : index
    %c128_171 = arith.constant 128 : index
    %400 = vector.load %arg11[%c0_170, %c128_171] : memref<8x192xf32, #tpu.memory_space<vmem>>, vector<8x32xf32>
    tpu.vector_store %arg11[%c0_170, %c128_171], %399 {strides = array<i32>} : memref<8x192xf32, #tpu.memory_space<vmem>>, vector<8x32xf32>,
    %c0_172 = arith.constant 0 : index
    %c160_173 = arith.constant 160 : index
    %401 = vector.load %arg11[%c0_172, %c160_173] : memref<8x192xf32, #tpu.memory_space<vmem>>, vector<8x32xf32>
    tpu.vector_store %arg11[%c0_172, %c160_173], %383 {strides = array<i32>} : memref<8x192xf32, #tpu.memory_space<vmem>>, vector<8x32xf32>,
    %c0_174 = arith.constant 0 : index
    %c128_175 = arith.constant 128 : index
    %402 = vector.load %arg11[%c0_174, %c128_175] : memref<8x192xf32, #tpu.memory_space<vmem>>, vector<8x64xf32>
    %403 = arith.truncf %402 : vector<8x64xf32> to vector<8x64xbf16>
    %cst_176 = arith.constant dense<0.000000e+00> : vector<8x128xf32>
    %404 = tpu.matmul %403, %16, %cst_176 {dimension_numbers = #tpu.dot_dimension_numbers<[1], [0], [0], [1], [0, 0, 1, 1], [], []>} : vector<8x64xbf16>, vector<64x128xbf16>, vector<8x128xf32> -> vector<8x128xf32>
    %405 = arith.addf %404, %22 : vector<8x128xf32>
    %c6 = arith.constant 6 : index
    %c0_177 = arith.constant 0 : index
    %c0_178 = arith.constant 0 : index
    %406 = vector.load %arg10[%c6, %c0_177, %c0_178] : memref<8x8x128xf32, #tpu.memory_space<vmem>>, vector<1x8x128xf32>
    %407 = vector.shape_cast %406 : vector<1x8x128xf32> to vector<8x128xf32>
    %408 = vector.shape_cast %405 : vector<8x128xf32> to vector<1x8x128xf32>
    tpu.vector_store %arg10[%c6, %c0_177, %c0_178], %408 {strides = array<i32>} : memref<8x8x128xf32, #tpu.memory_space<vmem>>, vector<1x8x128xf32>,
    %cst_179 = arith.constant dense<0xFF800000> : vector<8xf32>
    %409 = vector.multi_reduction <maximumf>, %405, %cst_179 [1] : vector<8x128xf32> to vector<8xf32>
    %410 = vector.shape_cast %409 : vector<8xf32> to vector<8x1xf32>
    %411 = vector.broadcast %410 : vector<8x1xf32> to vector<8x128xf32>
    %412 = arith.cmpf oge, %405, %411 : vector<8x128xf32>
    %c128_i32_180 = arith.constant 128 : i32
    %413 = vector.broadcast %c128_i32_180 : i32 to vector<8x128xi32>
    %414 = arith.select %412, %0, %413 : vector<8x128xi1>, vector<8x128xi32>
    %cst_181 = arith.constant dense<2147483647> : vector<8xi32>
    %415 = vector.multi_reduction <minsi>, %414, %cst_181 [1] : vector<8x128xi32> to vector<8xi32>
    %416 = vector.shape_cast %415 : vector<8xi32> to vector<8x1xi32>
    %417 = vector.broadcast %416 : vector<8x1xi32> to vector<8x128xi32>
    %418 = arith.cmpi eq, %0, %417 : vector<8x128xi32>
    %419 = arith.extui %418 : vector<8x128xi1> to vector<8x128xi32>
    %420 = arith.sitofp %419 : vector<8x128xi32> to vector<8x128xf32>
    %c0_182 = arith.constant 0 : index
    %c0_183 = arith.constant 0 : index
    %421 = vector.load %arg11[%c0_182, %c0_183] : memref<8x192xf32, #tpu.memory_space<vmem>>, vector<8x128xf32>
    tpu.vector_store %arg11[%c0_182, %c0_183], %420 {strides = array<i32>} : memref<8x192xf32, #tpu.memory_space<vmem>>, vector<8x128xf32>,
    %c0_184 = arith.constant 0 : index
    %c0_185 = arith.constant 0 : index
    %422 = vector.load %arg11[%c0_184, %c0_185] : memref<8x192xf32, #tpu.memory_space<vmem>>, vector<8x192xf32>
    %423 = arith.truncf %422 : vector<8x192xf32> to vector<8x192xbf16>
    %cst_186 = arith.constant dense<0.000000e+00> : vector<8x128xf32>
    %424 = tpu.matmul %423, %14, %cst_186 {dimension_numbers = #tpu.dot_dimension_numbers<[1], [0], [0], [1], [0, 0, 1, 1], [], []>} : vector<8x192xbf16>, vector<192x128xbf16>, vector<8x128xf32> -> vector<8x128xf32>
    %425 = arith.addf %424, %19 : vector<8x128xf32>
    %426 = arith.negf %425 : vector<8x128xf32>
    %427 = math.exp %426 : vector<8x128xf32>
    %cst_187 = arith.constant 1.000000e+00 : f32
    %428 = vector.broadcast %cst_187 : f32 to vector<8x128xf32>
    %429 = arith.addf %428, %427 : vector<8x128xf32>
    %430 = arith.divf %428, %429 : vector<8x128xf32>
    %431 = math.tanh %425 : vector<8x128xf32>
    %432 = vector.extract_strided_slice %430 {offsets = [0, 0], sizes = [8, 32], strides = [1, 1]} : vector<8x128xf32> to vector<8x32xf32>
    %433 = vector.extract_strided_slice %430 {offsets = [0, 32], sizes = [8, 32], strides = [1, 1]} : vector<8x128xf32> to vector<8x32xf32>
    %434 = vector.extract_strided_slice %431 {offsets = [0, 64], sizes = [8, 32], strides = [1, 1]} : vector<8x128xf32> to vector<8x32xf32>
    %435 = vector.extract_strided_slice %430 {offsets = [0, 96], sizes = [8, 32], strides = [1, 1]} : vector<8x128xf32> to vector<8x32xf32>
    %436 = arith.mulf %433, %381 : vector<8x32xf32>
    %437 = arith.mulf %432, %434 : vector<8x32xf32>
    %438 = arith.addf %436, %437 : vector<8x32xf32>
    %439 = math.tanh %438 : vector<8x32xf32>
    %440 = arith.mulf %435, %439 : vector<8x32xf32>
    %441 = arith.truncf %440 : vector<8x32xf32> to vector<8x32xbf16>
    %cst_188 = arith.constant dense<0.000000e+00> : vector<8x40xf32>
    %442 = tpu.matmul %441, %15, %cst_188 {dimension_numbers = #tpu.dot_dimension_numbers<[1], [0], [0], [1], [0, 0, 1, 1], [], []>} : vector<8x32xbf16>, vector<32x40xbf16>, vector<8x40xf32> -> vector<8x40xf32>
    %443 = arith.truncf %442 : vector<8x40xf32> to vector<8x40xbf16>
    %cst_189 = arith.constant dense<0.000000e+00> : vector<8x64xf32>
    %444 = tpu.matmul %443, %12, %cst_189 {dimension_numbers = #tpu.dot_dimension_numbers<[1], [0], [0], [1], [0, 0, 1, 1], [], []>} : vector<8x40xbf16>, vector<40x64xbf16>, vector<8x64xf32> -> vector<8x64xf32>
    %445 = arith.addf %444, %13 : vector<8x64xf32>
    %cst_190 = arith.constant dense<0xFF800000> : vector<8xf32>
    %446 = vector.multi_reduction <maximumf>, %445, %cst_190 [1] : vector<8x64xf32> to vector<8xf32>
    %447 = vector.shape_cast %446 : vector<8xf32> to vector<8x1xf32>
    %448 = vector.broadcast %447 : vector<8x1xf32> to vector<8x64xf32>
    %449 = arith.subf %445, %448 : vector<8x64xf32>
    %450 = math.exp %449 : vector<8x64xf32>
    %cst_191 = arith.constant dense<0.000000e+00> : vector<8xf32>
    %451 = vector.multi_reduction <add>, %450, %cst_191 [1] : vector<8x64xf32> to vector<8xf32>
    %452 = vector.shape_cast %451 : vector<8xf32> to vector<8x1xf32>
    %453 = vector.broadcast %452 : vector<8x1xf32> to vector<8x64xf32>
    %454 = arith.divf %450, %453 : vector<8x64xf32>
    %455 = arith.truncf %454 : vector<8x64xf32> to vector<8x64xbf16>
    %cst_192 = arith.constant dense<0.000000e+00> : vector<8x32xf32>
    %456 = tpu.matmul %455, %11, %cst_192 {dimension_numbers = #tpu.dot_dimension_numbers<[1], [0], [0], [1], [0, 0, 1, 1], [], []>} : vector<8x64xbf16>, vector<64x32xbf16>, vector<8x32xf32> -> vector<8x32xf32>
    %c0_193 = arith.constant 0 : index
    %c128_194 = arith.constant 128 : index
    %457 = vector.load %arg11[%c0_193, %c128_194] : memref<8x192xf32, #tpu.memory_space<vmem>>, vector<8x32xf32>
    tpu.vector_store %arg11[%c0_193, %c128_194], %456 {strides = array<i32>} : memref<8x192xf32, #tpu.memory_space<vmem>>, vector<8x32xf32>,
    %c0_195 = arith.constant 0 : index
    %c160_196 = arith.constant 160 : index
    %458 = vector.load %arg11[%c0_195, %c160_196] : memref<8x192xf32, #tpu.memory_space<vmem>>, vector<8x32xf32>
    tpu.vector_store %arg11[%c0_195, %c160_196], %440 {strides = array<i32>} : memref<8x192xf32, #tpu.memory_space<vmem>>, vector<8x32xf32>,
    %c0_197 = arith.constant 0 : index
    %c128_198 = arith.constant 128 : index
    %459 = vector.load %arg11[%c0_197, %c128_198] : memref<8x192xf32, #tpu.memory_space<vmem>>, vector<8x64xf32>
    %460 = arith.truncf %459 : vector<8x64xf32> to vector<8x64xbf16>
    %cst_199 = arith.constant dense<0.000000e+00> : vector<8x128xf32>
    %461 = tpu.matmul %460, %16, %cst_199 {dimension_numbers = #tpu.dot_dimension_numbers<[1], [0], [0], [1], [0, 0, 1, 1], [], []>} : vector<8x64xbf16>, vector<64x128xbf16>, vector<8x128xf32> -> vector<8x128xf32>
    %462 = arith.addf %461, %22 : vector<8x128xf32>
    %c7 = arith.constant 7 : index
    %c0_200 = arith.constant 0 : index
    %c0_201 = arith.constant 0 : index
    %463 = vector.load %arg10[%c7, %c0_200, %c0_201] : memref<8x8x128xf32, #tpu.memory_space<vmem>>, vector<1x8x128xf32>
    %464 = vector.shape_cast %463 : vector<1x8x128xf32> to vector<8x128xf32>
    %465 = vector.shape_cast %462 : vector<8x128xf32> to vector<1x8x128xf32>
    tpu.vector_store %arg10[%c7, %c0_200, %c0_201], %465 {strides = array<i32>} : memref<8x8x128xf32, #tpu.memory_space<vmem>>, vector<1x8x128xf32>,
    %cst_202 = arith.constant dense<0xFF800000> : vector<8xf32>
    %466 = vector.multi_reduction <maximumf>, %462, %cst_202 [1] : vector<8x128xf32> to vector<8xf32>
    %467 = vector.shape_cast %466 : vector<8xf32> to vector<8x1xf32>
    %468 = vector.broadcast %467 : vector<8x1xf32> to vector<8x128xf32>
    %469 = arith.cmpf oge, %462, %468 : vector<8x128xf32>
    %c128_i32_203 = arith.constant 128 : i32
    %470 = vector.broadcast %c128_i32_203 : i32 to vector<8x128xi32>
    %471 = arith.select %469, %0, %470 : vector<8x128xi1>, vector<8x128xi32>
    %cst_204 = arith.constant dense<2147483647> : vector<8xi32>
    %472 = vector.multi_reduction <minsi>, %471, %cst_204 [1] : vector<8x128xi32> to vector<8xi32>
    %473 = vector.shape_cast %472 : vector<8xi32> to vector<8x1xi32>
    %474 = vector.broadcast %473 : vector<8x1xi32> to vector<8x128xi32>
    %475 = arith.cmpi eq, %0, %474 : vector<8x128xi32>
    %476 = arith.extui %475 : vector<8x128xi1> to vector<8x128xi32>
    %477 = arith.sitofp %476 : vector<8x128xi32> to vector<8x128xf32>
    %c0_205 = arith.constant 0 : index
    %c0_206 = arith.constant 0 : index
    %478 = vector.load %arg11[%c0_205, %c0_206] : memref<8x192xf32, #tpu.memory_space<vmem>>, vector<8x128xf32>
    tpu.vector_store %arg11[%c0_205, %c0_206], %477 {strides = array<i32>} : memref<8x192xf32, #tpu.memory_space<vmem>>, vector<8x128xf32>,
    return
  }
}

</mosaic_0001>

<bundles_post_ra>
// kernel: seq2seq_forward.2
= control target key start
LH: loop header
LB: loop body
LE: loop exit
PB: predicated region body
PF: predicated region fallthrough
CT: control target
= control target key end

     0   :  { %v1850_v0 = vmov 0.0   ;;  %vm1851_vm0 = vmmov 0   ;;  %v1852_v3 = vmov 0   ;;  %vm99_vm1 = vcmask 261120   ;;  %s1854_s21 = smov 96   ;;  %s1855_s22 = smov 16   ;;  %s2633_s3 = inlined_call_operand.vmem [shape: bf16[16,128], index: 3, kind: input, shape index: {}]   ;;  %s2634_s2 = inlined_call_operand.vmem [shape: bf16[32,64], index: 2, kind: input, shape index: {}]   ;;  %s2635_s0 = inlined_call_operand.vmem [shape: bf16[128,32], index: 0, kind: input, shape index: {}]   ;;  %s2636_s5 = inlined_call_operand.vmem [shape: f32[16,1], index: 5, kind: input, shape index: {}]   ;;  %s2637_s4 = inlined_call_operand.vmem [shape: f32[16,64], index: 4, kind: input, shape index: {}]   ;;  %s2638_s1 = inlined_call_operand.vmem [shape: f32[8,16,1], index: 1, kind: input, shape index: {}]   ;;  %s2639_s6 = inlined_call_operand.vmem [shape: f32[8,16,16], index: 6, kind: output, shape index: {0}]   ;;  %s2640_s7 = inlined_call_operand.vmem [shape: f32[16,16], index: 7, kind: output, shape index: {1}]   ;;  %s2641_s8 = inlined_call_operand.vmem [shape: f32[16,16], index: 8, kind: output, shape index: {2}]  }
   0x1   :  { %1650 = vmatprep.subr.bf16.mxu1 %v1850_v0  ;;  %v1908_v1 = vld [vmem:[%s2633_s3] sm:$0xff]   ;;  %1652 = vmatprep.mubr.msk.bf16.mxu1 %vm1851_vm0, %v1850_v0  ;;  %v1711_v4 = vld [vmem:[%s2634_s2 + $0x8] sm:$0xff]   ;;  %s1856_s27 = smov 32   ;;  %s1857_s28 = smov 80   ;;  %vm235_vm6 = vcmask 130048  }
   0x2   :  { %v1710_v2 = vld [vmem:[%s2634_s2] sm:$0xff]   ;;  %1707 = vset.pattern.permute.xlu0 %v1852_v3  ;;  %1708 = vset.pattern.permute.xlu1 %v1852_v3  ;;  %v1713_v6 = vld [vmem:[%s2635_s0 + $0x8] sm:$0xff]   ;;  %s1858_s13 = smov 112  }
   0x3   :  { %1651 = vmatpush3.bf16.msra.mxu1 %v1908_v1  ;;  %1630 = vmatprep.subr.bf16.mxu0 %v1710_v2  ;;  %v1712_v5 = vld [vmem:[%s2635_s0] sm:$0xff]   ;;  %v226_v8 = vld [vmem:[%s2636_s5 + $0x8] sm:$0xff] }
   0x4   :  { %1656 = vmatprep.subr.bf16.mxu1 %v1850_v0  ;;  %1631 = vmatpush3.bf16.msra.mxu0 %v1710_v2  ;;  %v225_v7 = vld [vmem:[%s2636_s5] sm:$0xff]  ;;  %vm281_vm3 = vcmp.gt.f32.partialorder %v226_v8, 0.0  ;;  %s1853_s5 = smov 64   ;;  %v1964_v27 = vld [vmem:[%s2637_s4 + $0x8] sm:$0xff] }
   0x5   :  { %1632 = vmatprep.subr.bf16.mxu0 %v1711_v4  ;;  %1634 = vmatprep.mubr.msk.bf16.mxu0 %vm99_vm1, %v1712_v5  ;;  %vm280_vm2 = vcmp.gt.f32.partialorder %v225_v7, 0.0  ;;  %v283_v10 = vsel %vm281_vm3, 1, %v1852_v3  ;;  %v1955_v22 = vld [vmem:[%s2637_s4] sm:$0xff]  ;;  %v228_v47 = vld [vmem:[%s2638_s1 + $0x8] sm:$0xff] }
   0x6   :  { %1653 = vmatmul.mubr.bf16.vlgmr.msra.gmra.mrb[0].mxu1 %v1852_v3  ;;  %v282_v9 = vsel %vm280_vm2, 1, %v1852_v3  ;;  %v227_v44 = vld [vmem:[%s2638_s1] sm:$0xff]  ;;  %v377_v48 = vsub.f32 1.0, %v228_v47 }
   0x7   :  { %1657 = vmatpush3.bf16.msra.mxu1 %v1908_v1  ;;  %1658 = vmatprep.mubr.msk.bf16.mxu1 %vm1851_vm0, %v1850_v0  ;;  %v376_v46 = vsub.f32 1.0, %v227_v44 }
   0x8   :  { %1662 = vmatprep.subr.bf16.mxu1 %v1850_v0  ;;  %1633 = vmatpush3.bf16.msra.mxu0 %v1711_v4 }
   0x9   :  { %285 = vperm.xlu0 %1707, %v282_v9   ;;  %1680 = vmatprep.subr.bf16.mxu0 %v1850_v0 }
   0xb   :  { %1635 = vmatmul.mubr.msk.bf16.vlgmr.msra.gmra.mrb[0].mxu0 %vm99_vm1, %v1713_v6 }
   0xc   :  { %1681 = vmatpush3.bf16.msra.mxu0 %v1908_v1 }
   0xd   :  { %288 = vperm.xlu0 %1707, %v283_v10   ;;  %1692 = vmatprep.subr.bf16.mxu0 %v1850_v0 }
  0x88   :  { %v1947_v19 = vpop.permute.xlu0 %285 }
  0x89   :  { %vm290_vm4 = vcmp.eq.s32.totalorder %v1947_v19, 1 }
  0x8c   :  { %v1950_v21 = vpop.permute.xlu0 %288 }
  0x8d   :  { %vm291_vm5 = vcmp.eq.s32.totalorder %v1950_v21, 1 }
  0xd9   :  { %v273_v11 = vpop.f32.mrb[0].mxu1 }
  0xda   :  { %294 = vrot.lane.b32.xlu1 %v273_v11, %s1853_s5  ;;  %v1654_v12 = vpop.f32.mrb[1].mxu1 }
  0xdb   :  { %v276_v13 = vpop.f32.mrb[2].mxu1 }
  0xdc   :  { %v1655_v14 = vpop.f32.mrb[3].mxu1 }
  0xde   :  { %296 = vrot.lane.b32.xlu1 %v276_v13, %s1853_s5  ;;  %v1943_v15 = vpop.f32.mrb[0].mxu0 }
  0xdf   :  { %v158_v16 = vpop.f32.mrb[1].mxu0 }
  0xe0   :  { %v1945_v17 = vpop.f32.mrb[2].mxu0 }
  0xe1   :  { %v161_v18 = vpop.f32.mrb[3].mxu0 }
 0x14c   :  { %v295_v20 = vpop.permute.xlu1 %294 }
 0x14d   :  { %v300_v23 = vsel %vm290_vm4, %v273_v11, %v295_v20 }
 0x14e   :  { %v302_v24 = vadd.f32 %v300_v23, %v158_v16 }
 0x150   :  { %v304_v25 = vadd.f32 %v302_v24, %v1955_v22  ;;  %v297_v26 = vpop.permute.xlu1 %296 }
 0x151   :  { %v301_v28 = vsel %vm291_vm5, %v276_v13, %v297_v26 }
 0x152   :  { %1720 = vtanh.f32 %v304_v25  ;;  %v303_v29 = vadd.f32 %v301_v28, %v161_v18  ;;  %v1553_v33 = vmul.f32 -1.442695, %v304_v25 }
 0x154   :  { %v305_v30 = vadd.f32 %v303_v29, %v1964_v27 }
 0x156   :  { %1722 = vtanh.f32 %v305_v30  ;;  %v1554_v34 = vmul.f32 -1.442695, %v305_v30 }
 0x157   :  { %1724 = vpow2.f32 %v1553_v33 }
 0x158   :  { %1726 = vpow2.f32 %v1554_v34 }
 0x15c   :  { %v1721_v31 = vpop.eup %1720 }
 0x15d   :  { %324 = vrot.lane.b32.xlu0 %v1721_v31, %s1854_s21 }
 0x160   :  { %v1723_v32 = vpop.eup %1722 }
 0x161   :  { %326 = vrot.lane.b32.xlu1 %v1723_v32, %s1854_s21  ;;  %v1725_v35 = vpop.eup %1724 }
 0x162   :  { %v312_v36 = vadd.f32 1.0, %v1725_v35  ;;  %v1727_v37 = vpop.eup %1726 }
 0x163   :  { %v313_v38 = vadd.f32 1.0, %v1727_v37 }
 0x164   :  { %1728 = vrcp.f32 %v312_v36 }
 0x165   :  { %1730 = vrcp.f32 %v313_v38 }
 0x16e   :  { %v1729_v39 = vpop.eup %1728 }
 0x16f   :  { %v1731_v42 = vpop.eup %1730  ;;  %v320_v49 = vmul.f32 0.0, %v1729_v39 }
 0x170   :  { %v321_v52 = vmul.f32 0.0, %v1731_v42 }
 0x1cf   :  { %v325_v40 = vpop.permute.xlu0 %324 }
 0x1d0   :  { %v330_v41 = vmul.f32 %v1729_v39, %v325_v40 }
 0x1d2   :  { %334 = vrot.lane.b32.xlu0 %v330_v41, %s1855_s22  ;;  %v1555_v41 = vld [vmem:[%s2638_s1 + $0x10] sm:$0xff] }
 0x1d3   :  { %v327_v43 = vpop.permute.xlu1 %326 }
 0x1d4   :  { %v331_v45 = vmul.f32 %v1731_v42, %v327_v43  ;;  %v1556_v43 = vld [vmem:[%s2638_s1 + $0x18] sm:$0xff] }
 0x1d6   :  { %356 = vperm.xlu0 %1707, %v227_v44   ;;  %336 = vrot.lane.b32.xlu1 %v331_v45, %s1855_s22  ;;  %v533_v44 = vsub.f32 1.0, %v1556_v43 }
 0x1da   :  { %380 = vperm.xlu0 %1707, %v376_v46   ;;  %361 = vperm.xlu1 %1708, %v228_v47  }
 0x1de   :  { %385 = vperm.xlu1 %1708, %v377_v48  }
 0x244   :  { %v335_v50 = vpop.permute.xlu0 %334 }
 0x245   :  { %v1979_v51 = vadd.f32 %v335_v50, %v320_v49 }
 0x247   :  { %1732 = vtanh.f32 %v1979_v51 }
 0x248   :  { %v337_v53 = vpop.permute.xlu1 %336 }
 0x249   :  { %v1982_v54 = vadd.f32 %v337_v53, %v321_v52 }
 0x24b   :  { %1734 = vtanh.f32 %v1982_v54 }
 0x251   :  { %v1733_v55 = vpop.eup %1732 }
 0x252   :  { %346 = vrot.lane.b32.xlu0 %v1733_v55, %s1856_s27 }
 0x255   :  { %v1735_v56 = vpop.eup %1734  ;;  %v1987_v57 = vpop.permute.xlu0 %356 }
 0x256   :  { %348 = vrot.lane.b32.xlu1 %v1735_v56, %s1856_s27  ;;  %v392_v45 = vmul.f32 %v1987_v57, %v1979_v51 }
 0x259   :  { %v1989_v58 = vpop.permute.xlu1 %361  ;;  %v381_v59 = vpop.permute.xlu0 %380 }
 0x25a   :  { %v388_v4 = vmul.f32 0.0, %v381_v59  ;;  %v393_v47 = vmul.f32 %v1989_v58, %v1982_v54 }
 0x25c   :  { %v2036_v46 = vadd.f32 %v392_v45, %v388_v4 }
 0x25d   :  { %v386_v60 = vpop.permute.xlu1 %385 }
 0x25e   :  { %v1994_v5 = vmul.f32 0.0, %v386_v60 }
 0x260   :  { %v2042_v49 = vadd.f32 %v393_v47, %v1994_v5 }
 0x2c4   :  { %v347_v61 = vpop.permute.xlu0 %346 }
 0x2c5   :  { %v352_v62 = vmul.f32 %v1729_v39, %v347_v61  ;;  %v1714_v61 = vld [vmem:[%s2635_s0 + $0x10] sm:$0xff]  }
 0x2c6   :  { %1638 = vmatprep.mubr.msk.bf16.mxu0 %vm99_vm1, %v1714_v61 }
 0x2c7   :  { %v1992_v2 = vmul.f32 %v1987_v57, %v352_v62  ;;  %v1715_v62 = vld [vmem:[%s2635_s0 + $0x18] sm:$0xff]  }
 0x2c8   :  { %v349_v63 = vpop.permute.xlu1 %348  ;;  %1639 = vmatmul.mubr.msk.bf16.gmra.mrb[4].mxu0 %vm99_vm1, %v1715_v62 }
 0x2c9   :  { %v353_v3 = vmul.f32 %v1731_v42, %v349_v63  ;;  %v2000_v7 = vadd.f32 %v388_v4, %v1992_v2  ;;  %v532_v42 = vsub.f32 1.0, %v1555_v41 }
 0x2cb   :  { %v1997_v6 = vmul.f32 %v1989_v58, %v353_v3 }
 0x2cd   :  { %v2004_v8 = vadd.f32 %v1994_v5, %v1997_v6 }
 0x2cf   :  { %v399_v9 = vpack.c.bf16 %v2004_v8, %v2000_v7 }
 0x2d1   :  { %401 = vrot.lane.b32.xlu0 %v399_v9, %s1857_s28 }
 0x343   :  { %v402_v10 = vpop.permute.xlu0 %401 }
 0x344   :  { %1659 = vmatmul.mubr.msk.bf16.vlgmr.msra.gmra.mrb[4].mxu1 %vm235_vm6, %v402_v10 }
 0x345   :  { %1663 = vmatpush3.bf16.msra.mxu1 %v1908_v1  ;;  %1664 = vmatprep.mubr.msk.bf16.mxu1 %vm1851_vm0, %v1850_v0 }
 0x346   :  { %1668 = vmatprep.subr.bf16.mxu1 %v1850_v0 }
 0x417   :  { %v440_v11 = vpop.f32.mrb[4].mxu1 }
 0x418   :  { %449 = vrot.lane.b32.xlu1 %v440_v11, %s1853_s5  ;;  %v1660_v12 = vpop.f32.mrb[5].mxu1 }
 0x419   :  { %v443_v13 = vpop.f32.mrb[6].mxu1 }
 0x41a   :  { %451 = vrot.lane.b32.xlu0 %v443_v13, %s1853_s5  ;;  %v1661_v14 = vpop.f32.mrb[7].mxu1 }
 0x48a   :  { %v450_v16 = vpop.permute.xlu1 %449 }
 0x48b   :  { %v455_v18 = vsel %vm290_vm4, %v440_v11, %v450_v16 }
 0x48c   :  { %v457_v20 = vadd.f32 %v1943_v15, %v455_v18  ;;  %v452_v23 = vpop.permute.xlu0 %451 }
 0x48d   :  { %v456_v24 = vsel %vm291_vm5, %v443_v13, %v452_v23 }
 0x48e   :  { %v459_v25 = vadd.f32 %v457_v20, %v1955_v22  ;;  %v458_v26 = vadd.f32 %v1945_v17, %v456_v24 }
 0x490   :  { %1736 = vtanh.f32 %v459_v25  ;;  %v460_v28 = vadd.f32 %v458_v26, %v1964_v27  ;;  %v1558_v31 = vmul.f32 -1.442695, %v459_v25 }
 0x492   :  { %1738 = vtanh.f32 %v460_v28  ;;  %v1559_v15 = vmul.f32 -1.442695, %v460_v28 }
 0x493   :  { %1740 = vpow2.f32 %v1558_v31 }
 0x494   :  { %1742 = vpow2.f32 %v1559_v15 }
 0x49a   :  { %v1737_v29 = vpop.eup %1736 }
 0x49b   :  { %479 = vrot.lane.b32.xlu1 %v1737_v29, %s1854_s21 }
 0x49c   :  { %v1739_v30 = vpop.eup %1738 }
 0x49d   :  { %481 = vrot.lane.b32.xlu0 %v1739_v30, %s1854_s21  ;;  %v1741_v32 = vpop.eup %1740 }
 0x49e   :  { %v1743_v33 = vpop.eup %1742  ;;  %v467_v34 = vadd.f32 1.0, %v1741_v32 }
 0x49f   :  { %v468_v35 = vadd.f32 1.0, %v1743_v33 }
 0x4a0   :  { %1744 = vrcp.f32 %v467_v34 }
 0x4a1   :  { %1746 = vrcp.f32 %v468_v35 }
 0x4aa   :  { %v1745_v17 = vpop.eup %1744 }
 0x4ab   :  { %v1747_v38 = vpop.eup %1746  ;;  %v475_v48 = vmul.f32 %v1745_v17, %v2036_v46 }
 0x4ac   :  { %v476_v53 = vmul.f32 %v1747_v38, %v2042_v49 }
 0x50d   :  { %v480_v36 = vpop.permute.xlu1 %479 }
 0x50e   :  { %v485_v37 = vmul.f32 %v1745_v17, %v480_v36 }
 0x50f   :  { %v482_v39 = vpop.permute.xlu0 %481 }
 0x510   :  { %489 = vrot.lane.b32.xlu1 %v485_v37, %s1855_s22  ;;  %v486_v40 = vmul.f32 %v1747_v38, %v482_v39 }
 0x512   :  { %491 = vrot.lane.b32.xlu0 %v486_v40, %s1855_s22 }
 0x514   :  { %511 = vperm.xlu1 %1708, %v1555_v41  }
 0x516   :  { %516 = vperm.xlu0 %1707, %v1556_v43  }
 0x518   :  { %536 = vperm.xlu1 %1708, %v532_v42  }
 0x51a   :  { %541 = vperm.xlu0 %1707, %v533_v44  }
 0x582   :  { %v490_v50 = vpop.permute.xlu1 %489 }
 0x583   :  { %v2044_v52 = vadd.f32 %v490_v50, %v475_v48 }
 0x584   :  { %v492_v55 = vpop.permute.xlu0 %491 }
 0x585   :  { %1748 = vtanh.f32 %v2044_v52  ;;  %v2048_v56 = vadd.f32 %v492_v55, %v476_v53  ;;  %v1562_v53 = vld [vmem:[%s2638_s1 + $0x20] sm:$0xff] }
 0x586   :  { %v690_v55 = vsub.f32 1.0, %v1562_v53 }
 0x587   :  { %1750 = vtanh.f32 %v2048_v56 }
 0x58f   :  { %v1749_v51 = vpop.eup %1748 }
 0x590   :  { %501 = vrot.lane.b32.xlu1 %v1749_v51, %s1856_s27  ;;  %v1563_v51 = vld [vmem:[%s2638_s1 + $0x28] sm:$0xff] }
 0x591   :  { %v1751_v54 = vpop.eup %1750 }
 0x592   :  { %503 = vrot.lane.b32.xlu0 %v1751_v54, %s1856_s27  ;;  %v691_v54 = vsub.f32 1.0, %v1563_v51 }
 0x593   :  { %v2053_v57 = vpop.permute.xlu1 %511 }
 0x594   :  { %v548_v62 = vmul.f32 %v2053_v57, %v2044_v52 }
 0x595   :  { %v2055_v58 = vpop.permute.xlu0 %516 }
 0x597   :  { %v2057_v59 = vpop.permute.xlu1 %536 }
 0x598   :  { %v544_v10 = vmul.f32 %v2057_v59, %v2000_v7  ;;  %v2093_v7 = vpop.f32.mrb[4].mxu0  ;;  %v550_v61 = vmul.f32 %v2057_v59, %v2036_v46 }
 0x599   :  { %v2059_v60 = vpop.permute.xlu0 %541 }
 0x59a   :  { %v545_v11 = vmul.f32 %v2059_v60, %v2004_v8  ;;  %v174_v8 = vpop.f32.mrb[5].mxu0 }
 0x59b   :  { %v2095_v20 = vpop.f32.mrb[6].mxu0 }
 0x59c   :  { %v177_v23 = vpop.f32.mrb[7].mxu0 }
 0x602   :  { %v502_v63 = vpop.permute.xlu1 %501 }
 0x603   :  { %v507_v3 = vmul.f32 %v1745_v17, %v502_v63  ;;  %v551_v63 = vmul.f32 %v2059_v60, %v2042_v49 }
 0x604   :  { %v504_v4 = vpop.permute.xlu0 %503 }
 0x605   :  { %v2070_v5 = vmul.f32 %v2053_v57, %v507_v3  ;;  %v508_v9 = vmul.f32 %v1747_v38, %v504_v4  ;;  %v2121_v3 = vadd.f32 %v550_v61, %v548_v62  ;;  %v549_v4 = vmul.f32 %v2055_v58, %v2048_v56 }
 0x607   :  { %v2077_v12 = vmul.f32 %v2055_v58, %v508_v9  ;;  %v2080_v13 = vadd.f32 %v544_v10, %v2070_v5 }
 0x609   :  { %v2083_v14 = vadd.f32 %v545_v11, %v2077_v12  ;;  %v2126_v11 = vadd.f32 %v551_v63, %v549_v4  ;;  %v1569_v63 = vld [vmem:[%s2638_s1 + $0x30] sm:$0xff] }
 0x60a   :  { %v848_v4 = vsub.f32 1.0, %v1569_v63 }
 0x60b   :  { %v557_v16 = vpack.c.bf16 %v2083_v14, %v2080_v13 }
 0x60d   :  { %559 = vrot.lane.b32.xlu1 %v557_v16, %s1857_s28 }
 0x67f   :  { %v560_v18 = vpop.permute.xlu1 %559 }
 0x680   :  { %1665 = vmatmul.mubr.msk.bf16.vlgmr.msra.gmra.mrb[8].mxu1 %vm235_vm6, %v560_v18 }
 0x681   :  { %1669 = vmatpush3.bf16.msra.mxu1 %v1908_v1  ;;  %1670 = vmatprep.mubr.msk.bf16.mxu1 %vm1851_vm0, %v1850_v0 }
 0x682   :  { %1674 = vmatprep.subr.bf16.mxu1 %v1850_v0 }
 0x753   :  { %v598_v24 = vpop.f32.mrb[8].mxu1 }
 0x754   :  { %607 = vrot.lane.b32.xlu0 %v598_v24, %s1853_s5  ;;  %v1666_v25 = vpop.f32.mrb[9].mxu1 }
 0x755   :  { %v601_v26 = vpop.f32.mrb[10].mxu1 }
 0x756   :  { %609 = vrot.lane.b32.xlu1 %v601_v26, %s1853_s5  ;;  %v1667_v28 = vpop.f32.mrb[11].mxu1 }
 0x7c6   :  { %v608_v29 = vpop.permute.xlu0 %607 }
 0x7c7   :  { %v613_v30 = vsel %vm290_vm4, %v598_v24, %v608_v29 }
 0x7c8   :  { %v615_v31 = vadd.f32 %v613_v30, %v174_v8  ;;  %v610_v15 = vpop.permute.xlu1 %609 }
 0x7c9   :  { %v614_v32 = vsel %vm291_vm5, %v601_v26, %v610_v15 }
 0x7ca   :  { %v617_v33 = vadd.f32 %v615_v31, %v1955_v22  ;;  %v616_v34 = vadd.f32 %v614_v32, %v177_v23 }
 0x7cc   :  { %1752 = vtanh.f32 %v617_v33  ;;  %v618_v35 = vadd.f32 %v616_v34, %v1964_v27  ;;  %v1565_v37 = vmul.f32 -1.442695, %v617_v33 }
 0x7ce   :  { %1754 = vtanh.f32 %v618_v35  ;;  %v1566_v38 = vmul.f32 -1.442695, %v618_v35 }
 0x7cf   :  { %1756 = vpow2.f32 %v1565_v37 }
 0x7d0   :  { %1758 = vpow2.f32 %v1566_v38 }
 0x7d6   :  { %v1753_v17 = vpop.eup %1752 }
 0x7d7   :  { %637 = vrot.lane.b32.xlu0 %v1753_v17, %s1854_s21 }
 0x7d8   :  { %v1755_v36 = vpop.eup %1754 }
 0x7d9   :  { %639 = vrot.lane.b32.xlu1 %v1755_v36, %s1854_s21  ;;  %v1757_v39 = vpop.eup %1756 }
 0x7da   :  { %v1759_v40 = vpop.eup %1758  ;;  %v625_v41 = vadd.f32 1.0, %v1757_v39 }
 0x7db   :  { %v626_v42 = vadd.f32 1.0, %v1759_v40 }
 0x7dc   :  { %1760 = vrcp.f32 %v625_v41 }
 0x7dd   :  { %1762 = vrcp.f32 %v626_v42 }
 0x7e6   :  { %v1761_v43 = vpop.eup %1760 }
 0x7e7   :  { %v1763_v47 = vpop.eup %1762  ;;  %v633_v9 = vmul.f32 %v1761_v43, %v2121_v3 }
 0x7e8   :  { %v634_v46 = vmul.f32 %v1763_v47, %v2126_v11 }
 0x849   :  { %v638_v44 = vpop.permute.xlu0 %637 }
 0x84a   :  { %v643_v45 = vmul.f32 %v1761_v43, %v638_v44 }
 0x84b   :  { %v640_v48 = vpop.permute.xlu1 %639 }
 0x84c   :  { %647 = vrot.lane.b32.xlu0 %v643_v45, %s1855_s22  ;;  %v644_v50 = vmul.f32 %v1763_v47, %v640_v48 }
 0x84e   :  { %649 = vrot.lane.b32.xlu1 %v644_v50, %s1855_s22 }
 0x850   :  { %669 = vperm.xlu0 %1707, %v1562_v53  }
 0x852   :  { %674 = vperm.xlu1 %1708, %v1563_v51  }
 0x854   :  { %694 = vperm.xlu0 %1707, %v690_v55  }
 0x856   :  { %699 = vperm.xlu1 %1708, %v691_v54  }
 0x8be   :  { %v648_v10 = vpop.permute.xlu0 %647 }
 0x8bf   :  { %v2128_v16 = vadd.f32 %v648_v10, %v633_v9  ;;  %v1570_v9 = vld [vmem:[%s2638_s1 + $0x38] sm:$0xff] }
 0x8c0   :  { %v650_v52 = vpop.permute.xlu1 %649  ;;  %v849_v10 = vsub.f32 1.0, %v1570_v9 }
 0x8c1   :  { %1764 = vtanh.f32 %v2128_v16  ;;  %v2132_v57 = vadd.f32 %v650_v52, %v634_v46 }
 0x8c3   :  { %1766 = vtanh.f32 %v2132_v57 }
 0x8cb   :  { %v1765_v49 = vpop.eup %1764 }
 0x8cc   :  { %659 = vrot.lane.b32.xlu0 %v1765_v49, %s1856_s27 }
 0x8cd   :  { %v1767_v56 = vpop.eup %1766 }
 0x8ce   :  { %661 = vrot.lane.b32.xlu1 %v1767_v56, %s1856_s27 }
 0x8cf   :  { %v2137_v58 = vpop.permute.xlu0 %669 }
 0x8d0   :  { %v706_v52 = vmul.f32 %v2137_v58, %v2128_v16 }
 0x8d1   :  { %v2139_v59 = vpop.permute.xlu1 %674 }
 0x8d3   :  { %v2141_v60 = vpop.permute.xlu0 %694 }
 0x8d4   :  { %v702_v28 = vmul.f32 %v2141_v60, %v2080_v13  ;;  %v708_v46 = vmul.f32 %v2141_v60, %v2121_v3 }
 0x8d5   :  { %v2143_v18 = vpop.permute.xlu1 %699 }
 0x8d6   :  { %v703_v29 = vmul.f32 %v2143_v18, %v2083_v14  ;;  %v709_v49 = vmul.f32 %v2143_v18, %v2126_v11  ;;  %v2195_v56 = vadd.f32 %v708_v46, %v706_v52 }
 0x93e   :  { %v660_v8 = vpop.permute.xlu0 %659 }
 0x93f   :  { %v665_v23 = vmul.f32 %v1761_v43, %v660_v8  ;;  %v707_v8 = vmul.f32 %v2139_v59, %v2132_v57 }
 0x940   :  { %v662_v24 = vpop.permute.xlu1 %661 }
 0x941   :  { %v2146_v25 = vmul.f32 %v2137_v58, %v665_v23  ;;  %v666_v26 = vmul.f32 %v1763_v47, %v662_v24  ;;  %v2200_v24 = vadd.f32 %v709_v49, %v707_v8 }
 0x943   :  { %v2153_v30 = vmul.f32 %v2139_v59, %v666_v26  ;;  %v2156_v31 = vadd.f32 %v702_v28, %v2146_v25 }
 0x945   :  { %v2159_v15 = vadd.f32 %v703_v29, %v2153_v30 }
 0x947   :  { %v715_v32 = vpack.c.bf16 %v2159_v15, %v2156_v31 }
 0x949   :  { %717 = vrot.lane.b32.xlu0 %v715_v32, %s1857_s28  ;;  %v1716_v32 = vld [vmem:[%s2635_s0 + $0x20] sm:$0xff]  }
 0x94a   :  { %1642 = vmatprep.mubr.msk.bf16.mxu0 %vm99_vm1, %v1716_v32  ;;  %v1576_v32 = vld [vmem:[%s2638_s1 + $0x40] sm:$0xff] }
 0x9bb   :  { %v718_v33 = vpop.permute.xlu0 %717 }
 0x9bc   :  { %1671 = vmatmul.mubr.msk.bf16.vlgmr.msra.gmra.mrb[12].mxu1 %vm235_vm6, %v718_v33  ;;  %v1717_v33 = vld [vmem:[%s2635_s0 + $0x28] sm:$0xff]  }
 0x9bd   :  { %1675 = vmatpush3.bf16.msra.mxu1 %v1908_v1  ;;  %1676 = vmatprep.mubr.msk.bf16.mxu1 %vm1851_vm0, %v1850_v0 }
 0x9be   :  { %1686 = vmatprep.subr.bf16.mxu1 %v1850_v0  ;;  %1643 = vmatmul.mubr.msk.bf16.gmra.mrb[8].mxu0 %vm99_vm1, %v1717_v33  ;;  %v1006_v33 = vsub.f32 1.0, %v1576_v32 }
 0xa8f   :  { %v756_v13 = vpop.f32.mrb[12].mxu1 }
 0xa90   :  { %765 = vrot.lane.b32.xlu1 %v756_v13, %s1853_s5  ;;  %v1672_v14 = vpop.f32.mrb[13].mxu1 }
 0xa91   :  { %v759_v34 = vpop.f32.mrb[14].mxu1 }
 0xa92   :  { %767 = vrot.lane.b32.xlu0 %v759_v34, %s1853_s5  ;;  %v1673_v35 = vpop.f32.mrb[15].mxu1 }
 0xb02   :  { %v766_v17 = vpop.permute.xlu1 %765 }
 0xb03   :  { %v771_v36 = vsel %vm290_vm4, %v756_v13, %v766_v17 }
 0xb04   :  { %v773_v37 = vadd.f32 %v2093_v7, %v771_v36  ;;  %v768_v38 = vpop.permute.xlu0 %767 }
 0xb05   :  { %v772_v39 = vsel %vm291_vm5, %v759_v34, %v768_v38 }
 0xb06   :  { %v775_v40 = vadd.f32 %v773_v37, %v1955_v22  ;;  %v774_v41 = vadd.f32 %v2095_v20, %v772_v39 }
 0xb08   :  { %1768 = vtanh.f32 %v775_v40  ;;  %v776_v42 = vadd.f32 %v774_v41, %v1964_v27  ;;  %v1572_v45 = vmul.f32 -1.442695, %v775_v40 }
 0xb0a   :  { %1770 = vtanh.f32 %v776_v42  ;;  %v1573_v7 = vmul.f32 -1.442695, %v776_v42 }
 0xb0b   :  { %1772 = vpow2.f32 %v1572_v45 }
 0xb0c   :  { %1774 = vpow2.f32 %v1573_v7 }
 0xb12   :  { %v1769_v43 = vpop.eup %1768 }
 0xb13   :  { %795 = vrot.lane.b32.xlu1 %v1769_v43, %s1854_s21 }
 0xb14   :  { %v1771_v44 = vpop.eup %1770 }
 0xb15   :  { %797 = vrot.lane.b32.xlu0 %v1771_v44, %s1854_s21  ;;  %v1773_v47 = vpop.eup %1772 }
 0xb16   :  { %v1775_v48 = vpop.eup %1774  ;;  %v783_v50 = vadd.f32 1.0, %v1773_v47 }
 0xb17   :  { %v784_v53 = vadd.f32 1.0, %v1775_v48 }
 0xb18   :  { %1776 = vrcp.f32 %v783_v50 }
 0xb19   :  { %1778 = vrcp.f32 %v784_v53 }
 0xb22   :  { %v1777_v20 = vpop.eup %1776 }
 0xb23   :  { %v1779_v54 = vpop.eup %1778  ;;  %v791_v23 = vmul.f32 %v1777_v20, %v2195_v56 }
 0xb24   :  { %v792_v3 = vmul.f32 %v1779_v54, %v2200_v24 }
 0xb85   :  { %v796_v55 = vpop.permute.xlu1 %795 }
 0xb86   :  { %v801_v51 = vmul.f32 %v1777_v20, %v796_v55 }
 0xb87   :  { %v798_v61 = vpop.permute.xlu0 %797 }
 0xb88   :  { %805 = vrot.lane.b32.xlu1 %v801_v51, %s1855_s22  ;;  %v802_v62 = vmul.f32 %v1779_v54, %v798_v61 }
 0xb8a   :  { %807 = vrot.lane.b32.xlu0 %v802_v62, %s1855_s22 }
 0xb8c   :  { %827 = vperm.xlu1 %1708, %v1569_v63  }
 0xb8e   :  { %832 = vperm.xlu0 %1707, %v1570_v9  }
 0xb90   :  { %852 = vperm.xlu1 %1708, %v848_v4  }
 0xb92   :  { %857 = vperm.xlu0 %1707, %v849_v10  }
 0xbfa   :  { %v806_v26 = vpop.permute.xlu1 %805 }
 0xbfb   :  { %v2202_v28 = vadd.f32 %v806_v26, %v791_v23 }
 0xbfc   :  { %v808_v16 = vpop.permute.xlu0 %807 }
 0xbfd   :  { %1780 = vtanh.f32 %v2202_v28  ;;  %v2206_v58 = vadd.f32 %v808_v16, %v792_v3 }
 0xbff   :  { %1782 = vtanh.f32 %v2206_v58 }
 0xc07   :  { %v1781_v11 = vpop.eup %1780 }
 0xc08   :  { %817 = vrot.lane.b32.xlu1 %v1781_v11, %s1856_s27 }
 0xc09   :  { %v1783_v57 = vpop.eup %1782 }
 0xc0a   :  { %819 = vrot.lane.b32.xlu0 %v1783_v57, %s1856_s27 }
 0xc0b   :  { %v2211_v59 = vpop.permute.xlu1 %827 }
 0xc0d   :  { %v2213_v60 = vpop.permute.xlu0 %832 }
 0xc0f   :  { %v2215_v18 = vpop.permute.xlu1 %852 }
 0xc10   :  { %v860_v36 = vmul.f32 %v2215_v18, %v2156_v31  ;;  %v2250_v31 = vpop.f32.mrb[8].mxu0 }
 0xc11   :  { %v2217_v29 = vpop.permute.xlu0 %857 }
 0xc12   :  { %v861_v37 = vmul.f32 %v2217_v29, %v2159_v15  ;;  %v190_v15 = vpop.f32.mrb[9].mxu0 }
 0xc13   :  { %v2252_v43 = vpop.f32.mrb[10].mxu0 }
 0xc14   :  { %v193_v44 = vpop.f32.mrb[11].mxu0 }
 0xc7a   :  { %v818_v13 = vpop.permute.xlu1 %817 }
 0xc7b   :  { %v823_v14 = vmul.f32 %v1777_v20, %v818_v13  ;;  %v1577_v13 = vld [vmem:[%s2638_s1 + $0x48] sm:$0xff] }
 0xc7c   :  { %v820_v34 = vpop.permute.xlu0 %819 }
 0xc7d   :  { %v2228_v35 = vmul.f32 %v2211_v59, %v823_v14  ;;  %v824_v17 = vmul.f32 %v1779_v54, %v820_v34  ;;  %v1007_v14 = vsub.f32 1.0, %v1577_v13  ;;  %v866_v34 = vmul.f32 %v2215_v18, %v2195_v56 }
 0xc7f   :  { %v2235_v38 = vmul.f32 %v2213_v60, %v824_v17  ;;  %v2238_v39 = vadd.f32 %v860_v36, %v2228_v35  ;;  %v864_v17 = vmul.f32 %v2211_v59, %v2202_v28  ;;  %v867_v36 = vmul.f32 %v2217_v29, %v2200_v24  ;;  %v1718_v24 = vld [vmem:[%s2635_s0 + $0x30] sm:$0xff]  }
 0xc80   :  { %1646 = vmatprep.mubr.msk.bf16.mxu0 %vm99_vm1, %v1718_v24  ;;  %v1583_v24 = vld [vmem:[%s2638_s1 + $0x50] sm:$0xff] }
 0xc81   :  { %v2241_v40 = vadd.f32 %v861_v37, %v2235_v38  ;;  %v2278_v37 = vadd.f32 %v866_v34, %v864_v17 }
 0xc83   :  { %v873_v41 = vpack.c.bf16 %v2241_v40, %v2238_v39 }
 0xc85   :  { %875 = vrot.lane.b32.xlu1 %v873_v41, %s1857_s28  ;;  %v865_v41 = vmul.f32 %v2213_v60, %v2206_v58  ;;  %v1719_v58 = vld [vmem:[%s2635_s0 + $0x38] sm:$0xff]  }
 0xc86   :  { %1647 = vmatmul.mubr.msk.bf16.gmra.mrb[12].mxu0 %vm99_vm1, %v1719_v58  ;;  %v1164_v58 = vsub.f32 1.0, %v1583_v24 }
 0xc87   :  { %1682 = vmatprep.mubr.msk.bf16.mxu0 %vm1851_vm0, %v1850_v0 }
 0xcf7   :  { %v876_v42 = vpop.permute.xlu1 %875 }
 0xcf8   :  { %1677 = vmatmul.mubr.msk.bf16.vlgmr.msra.gmra.mrb[16].mxu1 %vm235_vm6, %v876_v42 }
 0xcf9   :  { %1687 = vmatpush3.bf16.msra.mxu1 %v1908_v1  ;;  %1688 = vmatprep.mubr.msk.bf16.mxu1 %vm1851_vm0, %v1850_v0 }
 0xdcb   :  { %v914_v45 = vpop.f32.mrb[16].mxu1 }
 0xdcc   :  { %923 = vrot.lane.b32.xlu0 %v914_v45, %s1853_s5  ;;  %v1678_v7 = vpop.f32.mrb[17].mxu1 }
 0xdcd   :  { %v917_v47 = vpop.f32.mrb[18].mxu1 }
 0xdce   :  { %925 = vrot.lane.b32.xlu1 %v917_v47, %s1853_s5  ;;  %v1679_v48 = vpop.f32.mrb[19].mxu1 }
 0xe3e   :  { %v924_v50 = vpop.permute.xlu0 %923 }
 0xe3f   :  { %v929_v53 = vsel %vm290_vm4, %v914_v45, %v924_v50 }
 0xe40   :  { %v931_v20 = vadd.f32 %v929_v53, %v190_v15  ;;  %v926_v55 = vpop.permute.xlu1 %925  ;;  %v2283_v15 = vadd.f32 %v867_v36, %v865_v41 }
 0xe41   :  { %v930_v51 = vsel %vm291_vm5, %v917_v47, %v926_v55 }
 0xe42   :  { %v933_v54 = vadd.f32 %v931_v20, %v1955_v22  ;;  %v932_v61 = vadd.f32 %v930_v51, %v193_v44 }
 0xe44   :  { %1784 = vtanh.f32 %v933_v54  ;;  %v934_v62 = vadd.f32 %v932_v61, %v1964_v27  ;;  %v1579_v9 = vmul.f32 -1.442695, %v933_v54 }
 0xe46   :  { %1786 = vtanh.f32 %v934_v62  ;;  %v1580_v10 = vmul.f32 -1.442695, %v934_v62 }
 0xe47   :  { %1788 = vpow2.f32 %v1579_v9 }
 0xe48   :  { %1790 = vpow2.f32 %v1580_v10  ;;  %v2331_v10 = vpop.f32.mrb[12].mxu0 }
 0xe4e   :  { %v1785_v63 = vpop.eup %1784 }
 0xe4f   :  { %953 = vrot.lane.b32.xlu0 %v1785_v63, %s1854_s21 }
 0xe50   :  { %v1787_v4 = vpop.eup %1786 }
 0xe51   :  { %955 = vrot.lane.b32.xlu1 %v1787_v4, %s1854_s21  ;;  %v1789_v46 = vpop.eup %1788 }
 0xe52   :  { %v1791_v52 = vpop.eup %1790  ;;  %v941_v49 = vadd.f32 1.0, %v1789_v46 }
 0xe53   :  { %v942_v8 = vadd.f32 1.0, %v1791_v52 }
 0xe54   :  { %1792 = vrcp.f32 %v941_v49 }
 0xe55   :  { %1794 = vrcp.f32 %v942_v8 }
 0xe5e   :  { %v1793_v23 = vpop.eup %1792 }
 0xe5f   :  { %v1795_v16 = vpop.eup %1794  ;;  %v949_v42 = vmul.f32 %v1793_v23, %v2278_v37 }
 0xe60   :  { %v950_v56 = vmul.f32 %v1795_v16, %v2283_v15 }
 0xec1   :  { %v954_v26 = vpop.permute.xlu0 %953 }
 0xec2   :  { %v959_v3 = vmul.f32 %v1793_v23, %v954_v26 }
 0xec3   :  { %v956_v11 = vpop.permute.xlu1 %955 }
 0xec4   :  { %963 = vrot.lane.b32.xlu0 %v959_v3, %s1855_s22  ;;  %v960_v57 = vmul.f32 %v1795_v16, %v956_v11 }
 0xec6   :  { %965 = vrot.lane.b32.xlu1 %v960_v57, %s1855_s22 }
 0xec8   :  { %985 = vperm.xlu0 %1707, %v1576_v32  }
 0xeca   :  { %990 = vperm.xlu1 %1708, %v1577_v13  }
 0xecc   :  { %1010 = vperm.xlu0 %1707, %v1006_v33  }
 0xece   :  { %1015 = vperm.xlu1 %1708, %v1007_v14  }
 0xf36   :  { %v964_v44 = vpop.permute.xlu0 %963 }
 0xf37   :  { %v2285_v45 = vadd.f32 %v964_v44, %v949_v42 }
 0xf38   :  { %v966_v28 = vpop.permute.xlu1 %965 }
 0xf39   :  { %1796 = vtanh.f32 %v2285_v45  ;;  %v2289_v59 = vadd.f32 %v966_v28, %v950_v56 }
 0xf3b   :  { %1798 = vtanh.f32 %v2289_v59 }
 0xf43   :  { %v1797_v60 = vpop.eup %1796 }
 0xf44   :  { %975 = vrot.lane.b32.xlu0 %v1797_v60, %s1856_s27  ;;  %v1584_v60 = vld [vmem:[%s2638_s1 + $0x58] sm:$0xff] }
 0xf45   :  { %v1799_v18 = vpop.eup %1798 }
 0xf46   :  { %977 = vrot.lane.b32.xlu1 %v1799_v18, %s1856_s27  ;;  %v1165_v18 = vsub.f32 1.0, %v1584_v60 }
 0xf47   :  { %v2304_v29 = vpop.permute.xlu0 %985 }
 0xf49   :  { %v2306_v7 = vpop.permute.xlu1 %990 }
 0xf4b   :  { %v2308_v47 = vpop.permute.xlu0 %1010 }
 0xf4c   :  { %v1018_v54 = vmul.f32 %v2308_v47, %v2238_v39  ;;  %v2333_v39 = vpop.f32.mrb[13].mxu0 }
 0xf4d   :  { %v2310_v48 = vpop.permute.xlu1 %1015  ;;  %v2335_v46 = vpop.f32.mrb[14].mxu0 }
 0xf4e   :  { %v1019_v61 = vmul.f32 %v2310_v48, %v2241_v40  ;;  %v2337_v40 = vpop.f32.mrb[15].mxu0 }
 0xfb6   :  { %v976_v50 = vpop.permute.xlu0 %975 }
 0xfb7   :  { %v981_v53 = vmul.f32 %v1793_v23, %v976_v50  ;;  %v1024_v50 = vmul.f32 %v2308_v47, %v2278_v37 }
 0xfb8   :  { %v978_v20 = vpop.permute.xlu1 %977 }
 0xfb9   :  { %v2313_v55 = vmul.f32 %v2304_v29, %v981_v53  ;;  %v982_v51 = vmul.f32 %v1795_v16, %v978_v20  ;;  %v1022_v53 = vmul.f32 %v2304_v29, %v2285_v45  ;;  %v1025_v20 = vmul.f32 %v2310_v48, %v2283_v15 }
 0xfbb   :  { %v2320_v62 = vmul.f32 %v2306_v7, %v982_v51  ;;  %v2323_v63 = vadd.f32 %v1018_v54, %v2313_v55  ;;  %v2369_v51 = vadd.f32 %v1024_v50, %v1022_v53  ;;  %v1023_v54 = vmul.f32 %v2306_v7, %v2289_v59 }
 0xfbd   :  { %v2326_v4 = vadd.f32 %v1019_v61, %v2320_v62 }
 0xfbf   :  { %v1031_v9 = vpack.c.bf16 %v2326_v4, %v2323_v63 }
 0xfc1   :  { %1033 = vrot.lane.b32.xlu0 %v1031_v9, %s1857_s28  ;;  %v2374_v9 = vadd.f32 %v1025_v20, %v1023_v54 }
0x1033   :  { %v1034_v52 = vpop.permute.xlu0 %1033 }
0x1034   :  { %1683 = vmatmul.mubr.msk.bf16.vlgmr.msra.gmra.mrb[16].mxu0 %vm235_vm6, %v1034_v52 }
0x1035   :  { %1693 = vmatpush3.bf16.msra.mxu0 %v1908_v1  ;;  %1694 = vmatprep.mubr.msk.bf16.mxu0 %vm1851_vm0, %v1850_v0 }
0x1107   :  { %v1072_v49 = vpop.f32.mrb[16].mxu0 }
0x1108   :  { %1081 = vrot.lane.b32.xlu1 %v1072_v49, %s1853_s5  ;;  %v1684_v8 = vpop.f32.mrb[17].mxu0 }
0x1109   :  { %v1075_v23 = vpop.f32.mrb[18].mxu0 }
0x110a   :  { %1083 = vrot.lane.b32.xlu0 %v1075_v23, %s1853_s5  ;;  %v1685_v26 = vpop.f32.mrb[19].mxu0 }
0x117a   :  { %v1082_v3 = vpop.permute.xlu1 %1081 }
0x117b   :  { %v1087_v16 = vsel %vm290_vm4, %v1072_v49, %v1082_v3 }
0x117c   :  { %v1089_v11 = vadd.f32 %v2250_v31, %v1087_v16  ;;  %v1084_v57 = vpop.permute.xlu0 %1083 }
0x117d   :  { %v1088_v1 = vsel %vm291_vm5, %v1075_v23, %v1084_v57 }
0x117e   :  { %v1091_v0 = vadd.f32 %v1089_v11, %v1955_v22  ;;  %v1090_v32 = vadd.f32 %v2252_v43, %v1088_v1 }
0x1180   :  { %1800 = vtanh.f32 %v1091_v0  ;;  %v1092_v33 = vadd.f32 %v1090_v32, %v1964_v27  ;;  %v1586_v34 = vmul.f32 -1.442695, %v1091_v0 }
0x1182   :  { %1802 = vtanh.f32 %v1092_v33  ;;  %v1587_v31 = vmul.f32 -1.442695, %v1092_v33 }
0x1183   :  { %1804 = vpow2.f32 %v1586_v34 }
0x1184   :  { %1806 = vpow2.f32 %v1587_v31 }
0x118a   :  { %v1801_v13 = vpop.eup %1800 }
0x118b   :  { %1111 = vrot.lane.b32.xlu1 %v1801_v13, %s1854_s21 }
0x118c   :  { %v1803_v14 = vpop.eup %1802 }
0x118d   :  { %1113 = vrot.lane.b32.xlu0 %v1803_v14, %s1854_s21  ;;  %v1805_v17 = vpop.eup %1804 }
0x118e   :  { %v1807_v36 = vpop.eup %1806  ;;  %v1099_v41 = vadd.f32 1.0, %v1805_v17 }
0x118f   :  { %v1100_v22 = vadd.f32 1.0, %v1807_v36 }
0x1190   :  { %1808 = vrcp.f32 %v1099_v41 }
0x1191   :  { %1810 = vrcp.f32 %v1100_v22 }
0x119a   :  { %v1809_v43 = vpop.eup %1808 }
0x119b   :  { %v1811_v44 = vpop.eup %1810  ;;  %v1107_v61 = vmul.f32 %v1809_v43, %v2369_v51 }
0x119c   :  { %v1108_v37 = vmul.f32 %v1811_v44, %v2374_v9 }
0x11fd   :  { %v1112_v42 = vpop.permute.xlu1 %1111 }
0x11fe   :  { %v1117_v27 = vmul.f32 %v1809_v43, %v1112_v42  ;;  %v2423_v42 = vld [vmem:[%s2637_s4] sm:$0xff] }
0x11ff   :  { %v1114_v56 = vpop.permute.xlu0 %1113 }
0x1200   :  { %1121 = vrot.lane.b32.xlu1 %v1117_v27, %s1855_s22  ;;  %v1118_v28 = vmul.f32 %v1811_v44, %v1114_v56  ;;  %v2430_v56 = vld [vmem:[%s2637_s4 + $0x8] sm:$0xff] }
0x1202   :  { %1123 = vrot.lane.b32.xlu0 %v1118_v28, %s1855_s22 }
0x1204   :  { %1143 = vperm.xlu1 %1708, %v1583_v24  }
0x1206   :  { %1148 = vperm.xlu0 %1707, %v1584_v60  }
0x1208   :  { %1168 = vperm.xlu1 %1708, %v1164_v58  }
0x120a   :  { %1173 = vperm.xlu0 %1707, %v1165_v18  }
0x1272   :  { %v1122_v52 = vpop.permute.xlu1 %1121 }
0x1273   :  { %v2376_v49 = vadd.f32 %v1122_v52, %v1107_v61 }
0x1274   :  { %v1124_v45 = vpop.permute.xlu0 %1123 }
0x1275   :  { %1812 = vtanh.f32 %v2376_v49  ;;  %v2380_v29 = vadd.f32 %v1124_v45, %v1108_v37 }
0x1277   :  { %1814 = vtanh.f32 %v2380_v29 }
0x127f   :  { %v1813_v15 = vpop.eup %1812 }
0x1280   :  { %1133 = vrot.lane.b32.xlu1 %v1813_v15, %s1856_s27  ;;  %v1590_v15 = vld [vmem:[%s2638_s1 + $0x60] sm:$0xff] }
0x1281   :  { %v1815_v59 = vpop.eup %1814 }
0x1282   :  { %1135 = vrot.lane.b32.xlu0 %v1815_v59, %s1856_s27  ;;  %v1322_v59 = vsub.f32 1.0, %v1590_v15 }
0x1283   :  { %v2385_v7 = vpop.permute.xlu1 %1143 }
0x1285   :  { %v2387_v47 = vpop.permute.xlu0 %1148 }
0x1287   :  { %v2389_v48 = vpop.permute.xlu1 %1168 }
0x1288   :  { %v1176_v57 = vmul.f32 %v2389_v48, %v2323_v63 }
0x1289   :  { %v2391_v8 = vpop.permute.xlu0 %1173 }
0x128a   :  { %v1177_v1 = vmul.f32 %v2391_v8, %v2326_v4 }
0x12f2   :  { %v1134_v23 = vpop.permute.xlu1 %1133 }
0x12f3   :  { %v1139_v26 = vmul.f32 %v1809_v43, %v1134_v23  ;;  %v1591_v23 = vld [vmem:[%s2638_s1 + $0x68] sm:$0xff] }
0x12f4   :  { %v1136_v3 = vpop.permute.xlu0 %1135 }
0x12f5   :  { %v2394_v16 = vmul.f32 %v2385_v7, %v1139_v26  ;;  %v1140_v11 = vmul.f32 %v1811_v44, %v1136_v3  ;;  %v1323_v26 = vsub.f32 1.0, %v1591_v23  ;;  %v1182_v3 = vmul.f32 %v2389_v48, %v2369_v51 }
0x12f7   :  { %v2401_v0 = vmul.f32 %v2387_v47, %v1140_v11  ;;  %v2404_v32 = vadd.f32 %v1176_v57, %v2394_v16  ;;  %v1180_v11 = vmul.f32 %v2385_v7, %v2376_v49  ;;  %v1183_v57 = vmul.f32 %v2391_v8, %v2374_v9 }
0x12f9   :  { %v2407_v33 = vadd.f32 %v1177_v1, %v2401_v0  ;;  %v2449_v1 = vadd.f32 %v1182_v3, %v1180_v11 }
0x12fb   :  { %v1189_v13 = vpack.c.bf16 %v2407_v33, %v2404_v32 }
0x12fd   :  { %1191 = vrot.lane.b32.xlu1 %v1189_v13, %s1857_s28  ;;  %v1181_v13 = vmul.f32 %v2387_v47, %v2380_v29 }
0x136f   :  { %v1192_v14 = vpop.permute.xlu1 %1191 }
0x1370   :  { %1689 = vmatmul.mubr.msk.bf16.vlgmr.msra.gmra.mrb[20].mxu1 %vm235_vm6, %v1192_v14 }
0x1443   :  { %v1230_v63 = vpop.f32.mrb[20].mxu1 }
0x1444   :  { %1239 = vrot.lane.b32.xlu0 %v1230_v63, %s1853_s5  ;;  %v1690_v4 = vpop.f32.mrb[21].mxu1 }
0x1445   :  { %v1233_v34 = vpop.f32.mrb[22].mxu1 }
0x1446   :  { %1241 = vrot.lane.b32.xlu1 %v1233_v34, %s1853_s5  ;;  %v1691_v31 = vpop.f32.mrb[23].mxu1 }
0x14b6   :  { %v1240_v17 = vpop.permute.xlu0 %1239 }
0x14b7   :  { %v1245_v36 = vsel %vm290_vm4, %v1230_v63, %v1240_v17  ;;  %v2454_v63 = vadd.f32 %v1183_v57, %v1181_v13 }
0x14b8   :  { %v1247_v41 = vadd.f32 %v1245_v36, %v2333_v39  ;;  %v1242_v22 = vpop.permute.xlu1 %1241 }
0x14b9   :  { %v1246_v43 = vsel %vm291_vm5, %v1233_v34, %v1242_v22 }
0x14ba   :  { %v1249_v27 = vadd.f32 %v2423_v42, %v1247_v41  ;;  %v1248_v44 = vadd.f32 %v1246_v43, %v2337_v40 }
0x14bc   :  { %1816 = vtanh.f32 %v1249_v27  ;;  %v1250_v39 = vadd.f32 %v2430_v56, %v1248_v44  ;;  %v1593_v58 = vmul.f32 -1.442695, %v1249_v27 }
0x14be   :  { %1818 = vtanh.f32 %v1250_v39  ;;  %v1594_v60 = vmul.f32 -1.442695, %v1250_v39 }
0x14bf   :  { %1820 = vpow2.f32 %v1593_v58 }
0x14c0   :  { %1822 = vpow2.f32 %v1594_v60 }
0x14c6   :  { %v1817_v28 = vpop.eup %1816 }
0x14c7   :  { %1269 = vrot.lane.b32.xlu0 %v1817_v28, %s1854_s21 }
0x14c8   :  { %v1819_v24 = vpop.eup %1818 }
0x14c9   :  { %1271 = vrot.lane.b32.xlu1 %v1819_v24, %s1854_s21  ;;  %v1821_v40 = vpop.eup %1820 }
0x14ca   :  { %v1823_v18 = vpop.eup %1822  ;;  %v1257_v50 = vadd.f32 1.0, %v1821_v40 }
0x14cb   :  { %v1258_v53 = vadd.f32 1.0, %v1823_v18 }
0x14cc   :  { %1824 = vrcp.f32 %v1257_v50 }
0x14cd   :  { %1826 = vrcp.f32 %v1258_v53 }
0x14d6   :  { %v1825_v20 = vpop.eup %1824 }
0x14d7   :  { %v1827_v52 = vpop.eup %1826  ;;  %v1265_v14 = vmul.f32 %v1825_v20, %v2449_v1 }
0x14d8   :  { %v1266_v51 = vmul.f32 %v1827_v52, %v2454_v63 }
0x1539   :  { %v1270_v54 = vpop.permute.xlu0 %1269 }
0x153a   :  { %v1275_v61 = vmul.f32 %v1825_v20, %v1270_v54 }
0x153b   :  { %v1272_v37 = vpop.permute.xlu1 %1271 }
0x153c   :  { %1279 = vrot.lane.b32.xlu0 %v1275_v61, %s1855_s22  ;;  %v1276_v45 = vmul.f32 %v1827_v52, %v1272_v37 }
0x153e   :  { %1281 = vrot.lane.b32.xlu1 %v1276_v45, %s1855_s22 }
0x1540   :  { %1301 = vperm.xlu0 %1707, %v1590_v15  }
0x1542   :  { %1306 = vperm.xlu1 %1708, %v1591_v23  }
0x1544   :  { %1326 = vperm.xlu0 %1707, %v1322_v59  }
0x1546   :  { %1331 = vperm.xlu1 %1708, %v1323_v26  }
0x15ae   :  { %v1280_v4 = vpop.permute.xlu0 %1279 }
0x15af   :  { %v2456_v34 = vadd.f32 %v1280_v4, %v1265_v14  ;;  %v1597_v14 = vld [vmem:[%s2638_s1 + $0x70] sm:$0xff] }
0x15b0   :  { %v1282_v49 = vpop.permute.xlu1 %1281  ;;  %v1480_v4 = vsub.f32 1.0, %v1597_v14 }
0x15b1   :  { %1828 = vtanh.f32 %v2456_v34  ;;  %v2460_v7 = vadd.f32 %v1282_v49, %v1266_v51  ;;  %v1598_v51 = vld [vmem:[%s2638_s1 + $0x78] sm:$0xff] }
0x15b2   :  { %v1481_v49 = vsub.f32 1.0, %v1598_v51 }
0x15b3   :  { %1830 = vtanh.f32 %v2460_v7 }
0x15bb   :  { %v1829_v9 = vpop.eup %1828 }
0x15bc   :  { %1291 = vrot.lane.b32.xlu0 %v1829_v9, %s1856_s27 }
0x15bd   :  { %v1831_v29 = vpop.eup %1830 }
0x15be   :  { %1293 = vrot.lane.b32.xlu1 %v1831_v29, %s1856_s27 }
0x15bf   :  { %v2465_v47 = vpop.permute.xlu0 %1301 }
0x15c0   :  { %v1338_v29 = vmul.f32 %v2465_v47, %v2456_v34 }
0x15c1   :  { %v2467_v48 = vpop.permute.xlu1 %1306 }
0x15c3   :  { %v1327_v8 = vpop.permute.xlu0 %1326 }
0x15c4   :  { %v1334_v27 = vmul.f32 %v1327_v8, %v2404_v32  ;;  %v1340_v9 = vmul.f32 %v1327_v8, %v2449_v1 }
0x15c5   :  { %v2469_v31 = vpop.permute.xlu1 %1331 }
0x15c6   :  { %v1335_v44 = vmul.f32 %v2469_v31, %v2407_v33 }
0x162e   :  { %v1292_v17 = vpop.permute.xlu0 %1291 }
0x162f   :  { %v1297_v36 = vmul.f32 %v1825_v20, %v1292_v17  ;;  %v1341_v17 = vmul.f32 %v2469_v31, %v2454_v63 }
0x1630   :  { %v1294_v41 = vpop.permute.xlu1 %1293 }
0x1631   :  { %v2472_v22 = vmul.f32 %v2465_v47, %v1297_v36  ;;  %v1298_v43 = vmul.f32 %v1827_v52, %v1294_v41  ;;  %v1342_v36 = vadd.f32 %v1340_v9, %v1338_v29  ;;  %v1339_v41 = vmul.f32 %v2467_v48, %v2460_v7 }
0x1633   :  { %v2478_v39 = vmul.f32 %v2467_v48, %v1298_v43  ;;  %v2481_v28 = vadd.f32 %v1334_v27, %v2472_v22  ;;  %v1343_v27 = vadd.f32 %v1341_v17, %v1339_v41 }
0x1635   :  { %v2484_v24 = vadd.f32 %v1335_v44, %v2478_v39 }
0x1637   :  { %v1347_v58 = vpack.c.bf16 %v2484_v24, %v2481_v28 }
0x1639   :  { %1349 = vrot.lane.b32.xlu0 %v1347_v58, %s1857_s28 }
0x16ab   :  { %v1350_v60 = vpop.permute.xlu0 %1349 }
0x16ac   :  { %1695 = vmatmul.mubr.msk.bf16.vlgmr.msra.gmra.mrb[20].mxu0 %vm235_vm6, %v1350_v60 }
0x177f   :  { %v1388_v32 = vpop.f32.mrb[20].mxu0 }
0x1780   :  { %1397 = vrot.lane.b32.xlu1 %v1388_v32, %s1853_s5  ;;  %v1696_v33 = vpop.f32.mrb[21].mxu0 }
0x1781   :  { %v1391_v40 = vpop.f32.mrb[22].mxu0 }
0x1782   :  { %1399 = vrot.lane.b32.xlu0 %v1391_v40, %s1853_s5  ;;  %v1697_v18 = vpop.f32.mrb[23].mxu0 }
0x17f2   :  { %v1398_v50 = vpop.permute.xlu1 %1397 }
0x17f3   :  { %v1403_v53 = vsel %vm290_vm4, %v1388_v32, %v1398_v50 }
0x17f4   :  { %v1405_v20 = vadd.f32 %v2331_v10, %v1403_v53  ;;  %v1400_v54 = vpop.permute.xlu0 %1399 }
0x17f5   :  { %v1404_v61 = vsel %vm291_vm5, %v1391_v40, %v1400_v54 }
0x17f6   :  { %v1407_v52 = vadd.f32 %v2423_v42, %v1405_v20  ;;  %v1406_v37 = vadd.f32 %v2335_v46, %v1404_v61 }
0x17f8   :  { %1832 = vtanh.f32 %v1407_v52  ;;  %v1408_v45 = vadd.f32 %v2430_v56, %v1406_v37  ;;  %v1600_v19 = vmul.f32 -1.442695, %v1407_v52 }
0x17fa   :  { %1834 = vtanh.f32 %v1408_v45  ;;  %v1601_v10 = vmul.f32 -1.442695, %v1408_v45 }
0x17fb   :  { %1836 = vpow2.f32 %v1600_v19 }
0x17fc   :  { %1838 = vpow2.f32 %v1601_v10 }
0x1802   :  { %v1833_v15 = vpop.eup %1832 }
0x1803   :  { %1427 = vrot.lane.b32.xlu1 %v1833_v15, %s1854_s21 }
0x1804   :  { %v1835_v59 = vpop.eup %1834 }
0x1805   :  { %1429 = vrot.lane.b32.xlu0 %v1835_v59, %s1854_s21  ;;  %v1837_v21 = vpop.eup %1836 }
0x1806   :  { %v1839_v23 = vpop.eup %1838  ;;  %v1415_v26 = vadd.f32 1.0, %v1837_v21 }
0x1807   :  { %v1416_v42 = vadd.f32 1.0, %v1839_v23 }
0x1808   :  { %1840 = vrcp.f32 %v1415_v26 }
0x1809   :  { %1842 = vrcp.f32 %v1416_v42 }
0x1812   :  { %v1841_v46 = vpop.eup %1840 }
0x1813   :  { %v1843_v11 = vpop.eup %1842  ;;  %v1423_v43 = vmul.f32 %v1841_v46, %v1342_v36 }
0x1814   :  { %v1424_v60 = vmul.f32 %v1843_v11, %v1343_v27 }
0x1875   :  { %v1428_v3 = vpop.permute.xlu1 %1427 }
0x1876   :  { %v1433_v56 = vmul.f32 %v1841_v46, %v1428_v3 }
0x1877   :  { %v1430_v57 = vpop.permute.xlu0 %1429 }
0x1878   :  { %1437 = vrot.lane.b32.xlu1 %v1433_v56, %s1855_s22  ;;  %v1434_v13 = vmul.f32 %v1843_v11, %v1430_v57 }
0x187a   :  { %1439 = vrot.lane.b32.xlu0 %v1434_v13, %s1855_s22 }
0x187c   :  { %1459 = vperm.xlu1 %1708, %v1597_v14  }
0x187e   :  { %1464 = vperm.xlu0 %1707, %v1598_v51  }
0x1880   :  { %1484 = vperm.xlu1 %1708, %v1480_v4  }
0x1882   :  { %1489 = vperm.xlu0 %1707, %v1481_v49  }
0x18ea   :  { %v1438_v44 = vpop.permute.xlu1 %1437 }
0x18eb   :  { %v1443_v58 = vadd.f32 %v1438_v44, %v1423_v43 }
0x18ec   :  { %v1440_v32 = vpop.permute.xlu0 %1439 }
0x18ed   :  { %1844 = vtanh.f32 %v1443_v58  ;;  %v1444_v33 = vadd.f32 %v1440_v32, %v1424_v60 }
0x18ef   :  { %1846 = vtanh.f32 %v1444_v33 }
0x18f7   :  { %v1845_v1 = vpop.eup %1844 }
0x18f8   :  { %1449 = vrot.lane.b32.xlu1 %v1845_v1, %s1856_s27 }
0x18f9   :  { %v1847_v34 = vpop.eup %1846 }
0x18fa   :  { %1451 = vrot.lane.b32.xlu0 %v1847_v34, %s1856_s27 }
0x18fc   :  { %368 = vrot.lane.b32.xlu1 %v1992_v2, %s1857_s28  ;;  %v1460_v2 = vpop.permute.xlu1 %1459 }
0x18fd   :  { %v1496_v31 = vmul.f32 %v1460_v2, %v1443_v58 }
0x18fe   :  { %370 = vrot.lane.b32.xlu0 %v1997_v6, %s1857_s28  ;;  %v1465_v6 = vpop.permute.xlu0 %1464 }
0x18ff   :  { %v1497_v40 = vmul.f32 %v1465_v6, %v1444_v33 }
0x1900   :  { %523 = vrot.lane.b32.xlu1 %v2070_v5, %s1857_s28  ;;  %v1485_v5 = vpop.permute.xlu1 %1484 }
0x1901   :  { %v1498_v63 = vmul.f32 %v1485_v5, %v1342_v36 }
0x1902   :  { %525 = vrot.lane.b32.xlu0 %v2077_v12, %s1857_s28  ;;  %v1490_v12 = vpop.permute.xlu0 %1489 }
0x1903   :  { %v1493_v48 = vmul.f32 %v1490_v12, %v2484_v24 }
0x1904   :  { %681 = vrot.lane.b32.xlu1 %v2146_v25, %s1857_s28 }
0x1906   :  { %683 = vrot.lane.b32.xlu0 %v2153_v30, %s1857_s28 }
0x1908   :  { %839 = vrot.lane.b32.xlu1 %v2228_v35, %s1857_s28 }
0x190a   :  { %841 = vrot.lane.b32.xlu0 %v2235_v38, %s1857_s28 }
0x190c   :  { %997 = vrot.lane.b32.xlu1 %v2313_v55, %s1857_s28 }
0x190e   :  { %999 = vrot.lane.b32.xlu0 %v2320_v62, %s1857_s28 }
0x1910   :  { %1155 = vrot.lane.b32.xlu1 %v2394_v16, %s1857_s28  ;;  %v1492_v16 = vmul.f32 %v1485_v5, %v2481_v28  ;;  %v1500_v28 = vadd.f32 %v1498_v63, %v1496_v31 }
0x1912   :  { %1157 = vrot.lane.b32.xlu0 %v2401_v0, %s1857_s28 }
0x1914   :  { %1313 = vrot.lane.b32.xlu1 %v2472_v22, %s1857_s28  ;;  %v1499_v22 = vmul.f32 %v1490_v12, %v1343_v27 }
0x1916   :  { %1315 = vrot.lane.b32.xlu0 %v2478_v39, %s1857_s28  ;;  %v1501_v50 = vadd.f32 %v1499_v22, %v1497_v40 }
0x196a   :  { %v1450_v25 = vpop.permute.xlu1 %1449 }
0x196b   :  { %v1455_v30 = vmul.f32 %v1841_v46, %v1450_v25 }
0x196c   :  { %v1452_v38 = vpop.permute.xlu0 %1451 }
0x196d   :  { %v1467_v35 = vmul.f32 %v1460_v2, %v1455_v30  ;;  %v1456_v55 = vmul.f32 %v1843_v11, %v1452_v38 }
0x196e   :  { %v369_v62 = vpop.permute.xlu1 %368 }
0x196f   :  { %374 = vst.msk [vmem:[%s2639_s6] sm:$0xff] %vm235_vm6, %v369_v62  ;;  %1471 = vrot.lane.b32.xlu1 %v1467_v35, %s1857_s28  ;;  %v1468_v0 = vmul.f32 %v1465_v6, %v1456_v55  ;;  %v1494_v7 = vadd.f32 %v1492_v16, %v1467_v35 }
0x1970   :  { %v371_v47 = vpop.permute.xlu0 %370 }
0x1971   :  { %375 = vst.msk [vmem:[%s2639_s6 + $0x8] sm:$0xff] %vm235_vm6, %v371_v47  ;;  %1473 = vrot.lane.b32.xlu0 %v1468_v0, %s1857_s28  ;;  %v1495_v39 = vadd.f32 %v1493_v48, %v1468_v0 }
0x1972   :  { %v524_v8 = vpop.permute.xlu1 %523 }
0x1973   :  { %1560 = vst.msk [vmem:[%s2639_s6 + $0x10] sm:$0xff] %vm235_vm6, %v524_v8  ;;  %1504 = vrot.lane.b32.xlu1 %v1494_v7, %s1857_s28 }
0x1974   :  { %v526_v24 = vpop.permute.xlu0 %525 }
0x1975   :  { %1561 = vst.msk [vmem:[%s2639_s6 + $0x18] sm:$0xff] %vm235_vm6, %v526_v24  ;;  %1506 = vrot.lane.b32.xlu0 %v1495_v39, %s1857_s28 }
0x1976   :  { %v682_v18 = vpop.permute.xlu1 %681 }
0x1977   :  { %1567 = vst.msk [vmem:[%s2639_s6 + $0x20] sm:$0xff] %vm235_vm6, %v682_v18  ;;  %1514 = vrot.lane.b32.xlu1 %v1500_v28, %s1858_s13 }
0x1978   :  { %v684_v53 = vpop.permute.xlu0 %683 }
0x1979   :  { %1568 = vst.msk [vmem:[%s2639_s6 + $0x28] sm:$0xff] %vm235_vm6, %v684_v53  ;;  %1516 = vrot.lane.b32.xlu0 %v1501_v50, %s1858_s13 }
0x197a   :  { %v840_v20 = vpop.permute.xlu1 %839 }
0x197b   :  { %1574 = vst.msk [vmem:[%s2639_s6 + $0x30] sm:$0xff] %vm235_vm6, %v840_v20 }
0x197c   :  { %v842_v54 = vpop.permute.xlu0 %841 }
0x197d   :  { %1575 = vst.msk [vmem:[%s2639_s6 + $0x38] sm:$0xff] %vm235_vm6, %v842_v54 }
0x197e   :  { %v998_v61 = vpop.permute.xlu1 %997 }
0x197f   :  { %1581 = vst.msk [vmem:[%s2639_s6 + $0x40] sm:$0xff] %vm235_vm6, %v998_v61 }
0x1980   :  { %v1000_v52 = vpop.permute.xlu0 %999 }
0x1981   :  { %1582 = vst.msk [vmem:[%s2639_s6 + $0x48] sm:$0xff] %vm235_vm6, %v1000_v52 }
0x1982   :  { %v1156_v37 = vpop.permute.xlu1 %1155 }
0x1983   :  { %1588 = vst.msk [vmem:[%s2639_s6 + $0x50] sm:$0xff] %vm235_vm6, %v1156_v37 }
0x1984   :  { %v1158_v45 = vpop.permute.xlu0 %1157 }
0x1985   :  { %1589 = vst.msk [vmem:[%s2639_s6 + $0x58] sm:$0xff] %vm235_vm6, %v1158_v45 }
0x1986   :  { %v1314_v15 = vpop.permute.xlu1 %1313 }
0x1987   :  { %1595 = vst.msk [vmem:[%s2639_s6 + $0x60] sm:$0xff] %vm235_vm6, %v1314_v15 }
0x1988   :  { %v1316_v59 = vpop.permute.xlu0 %1315 }
0x1989   :  { %1596 = vst.msk [vmem:[%s2639_s6 + $0x68] sm:$0xff] %vm235_vm6, %v1316_v59 }
0x19e1   :  { %v1472_v19 = vpop.permute.xlu1 %1471 }
0x19e2   :  { %1602 = vst.msk [vmem:[%s2639_s6 + $0x70] sm:$0xff] %vm235_vm6, %v1472_v19 }
0x19e3   :  { %v1474_v10 = vpop.permute.xlu0 %1473 }
0x19e4   :  { %1603 = vst.msk [vmem:[%s2639_s6 + $0x78] sm:$0xff] %vm235_vm6, %v1474_v10 }
0x19e5   :  { %v1505_v21 = vpop.permute.xlu1 %1504 }
0x19e6   :  { %1510 = vst.msk [vmem:[%s2640_s7] sm:$0xff] %vm235_vm6, %v1505_v21 }
0x19e7   :  { %v1507_v23 = vpop.permute.xlu0 %1506 }
0x19e8   :  { %1511 = vst.msk [vmem:[%s2640_s7 + $0x8] sm:$0xff] %vm235_vm6, %v1507_v23 }
0x19e9   :  { %v1515_v26 = vpop.permute.xlu1 %1514 }
0x19ea   :  { %1520 = vst.msk [vmem:[%s2641_s8] sm:$0xff] %vm235_vm6, %v1515_v26 }
0x19eb   :  { %v1517_v42 = vpop.permute.xlu0 %1516 }
0x19ec   :  { %1521 = vst.msk [vmem:[%s2641_s8 + $0x8] sm:$0xff] %vm235_vm6, %v1517_v42 }

// kernel: seq2seq_forward.3
= control target key start
LH: loop header
LB: loop body
LE: loop exit
PB: predicated region body
PF: predicated region fallthrough
CT: control target
= control target key end

     0   :  { %s3379_s17 = smov 32   ;;  %v3380_v2 = vmov 0   ;;  %vm43_vm0 = vcmask 261120   ;;  %v3381_v4 = vmov 0.0   ;;  %s4399_s0 = inlined_call_operand.vmem [shape: f32[8,32], index: 0, kind: input, shape index: {}]   ;;  %s4400_s1 = inlined_call_operand.vmem [shape: f32[8,32], index: 1, kind: input, shape index: {}]   ;;  %s4401_s2 = inlined_call_operand.vmem [shape: bf16[64,32], index: 2, kind: input, shape index: {}]   ;;  %s4402_s3 = inlined_call_operand.vmem [shape: bf16[40,64], index: 3, kind: input, shape index: {}]   ;;  %s4403_s4 = inlined_call_operand.vmem [shape: f32[8,64], index: 4, kind: input, shape index: {}]   ;;  %s4404_s5 = inlined_call_operand.vmem [shape: bf16[192,128], index: 5, kind: input, shape index: {}]   ;;  %s4405_s6 = inlined_call_operand.vmem [shape: f32[1,128], index: 6, kind: input, shape index: {}]   ;;  %s4406_s7 = inlined_call_operand.vmem [shape: bf16[32,40], index: 7, kind: input, shape index: {}]   ;;  %s4407_s8 = inlined_call_operand.vmem [shape: bf16[64,128], index: 8, kind: input, shape index: {}]   ;;  %s4408_s9 = inlined_call_operand.vmem [shape: f32[1,128], index: 9, kind: input, shape index: {}]   ;;  %s4409_s10 = inlined_call_operand.hbm [shape: f32[8,8,128], index: 10, kind: output, shape index: {}]  }
   0x1   :  { %v45_v0 = vld [vmem:[%s4399_s0] sm:$0xff]  ;;  %197 = vmatprep.subr.bf16.mxu0 %v3380_v2  ;;  %v3457_v3 = vld [vmem:[%s4404_s5 + $0x8] sm:$0xff]   ;;  %2845 = vmatprep.subr.bf16.mxu1 %v3381_v4  ;;  %44 = vst.msk [vmem:[#allocation2 + $0x8] sm:$0xff] %vm43_vm0, %v3381_v4  ;;  %v3467_v5 = vld [vmem:[%s4404_s5 + $0x10] sm:$0xff]  }
   0x2   :  { %v3449_v1 = vld [vmem:[%s4404_s5] sm:$0xff]   ;;  %47 = vrot.lane.b32.xlu0 %v45_v0, %s3379_s17  ;;  %v3474_v6 = vld [vmem:[%s4404_s5 + $0x18] sm:$0xff]   ;;  %v3491_v9 = vld [vmem:[%s4404_s5 + $0x28] sm:$0xff]  }
   0x3   :  { %198 = vmatpush1.bf16.msra.mxu0 %v3449_v1  ;;  %v3480_v7 = vld [vmem:[%s4404_s5 + $0x20] sm:$0xff]  }
   0x4   :  { %199 = vmatprep.subr.bf16.mxu0 %v3380_v2  ;;  %v52_v8 = vld [vmem:[%s4400_s1] sm:$0xff] }
   0x5   :  { %245 = vrot.lane.b32.xlu1 %v52_v8, %s3379_s17 }
   0x7   :  { %200 = vmatpush1.bf16.msra.mxu0 %v3457_v3 }
   0x8   :  { %201 = vmatprep.subr.bf16.mxu0 %v3380_v2 }
   0xb   :  { %202 = vmatpush1.bf16.msra.mxu0 %v3467_v5 }
   0xc   :  { %203 = vmatprep.subr.bf16.mxu0 %v3380_v2 }
   0xf   :  { %204 = vmatpush1.bf16.msra.mxu0 %v3474_v6 }
  0x10   :  { %205 = vmatprep.subr.bf16.mxu0 %v3380_v2 }
  0x13   :  { %206 = vmatpush1.bf16.msra.mxu0 %v3480_v7 }
  0x14   :  { %207 = vmatprep.subr.bf16.mxu0 %v3380_v2 }
  0x15   :  { %15 = vsyncpa [#allocation4], 0  ;;  %v3499_v10 = vld [vmem:[%s4404_s5 + $0x30] sm:$0xff]   ;;  %v3506_v11 = vld [vmem:[%s4404_s5 + $0x38] sm:$0xff]   ;;  %v37_v16 = vlaneseq  ;;  %vm50_vm1 = vcmask 523520   ;;  %vm193_vm3 = vcmask 523264  }
  0x16   :  { %v3513_v12 = vld [vmem:[%s4404_s5 + $0x40] sm:$0xff]   ;;  %v3520_v13 = vld [vmem:[%s4404_s5 + $0x48] sm:$0xff]   ;;  %v3527_v14 = vld [vmem:[%s4404_s5 + $0x50] sm:$0xff]   ;;  %v3382_v21 = vmov 1.0|1.0   ;;  %s3383_s22 = smov 64  }
  0x17   :  { %208 = vmatpush1.bf16.msra.mxu0 %v3491_v9  ;;  %v3534_v15 = vld [vmem:[%s4404_s5 + $0x58] sm:$0xff]   ;;  %v3539_v17 = vand.u32 127, %v37_v16  ;;  %v3572_v22 = vld [vmem:[%s4405_s6] ss:$0 sm:$0xff]  ;;  %vm3384_vm5 = vmmov 0   ;;  %v3591_v40 = vld [vmem:[%s4406_s7 + $0x8] sm:$0xff]  }
  0x18   :  { %209 = vmatprep.subr.bf16.mxu0 %v3380_v2  ;;  %v3583_v39 = vld [vmem:[%s4406_s7] sm:$0xff]   ;;  %2849 = vmatprep.mubr.msk.bf16.mxu1 %vm3384_vm5, %v3381_v4  ;;  %v3608_v47 = vld [vmem:[%s4402_s3 + $0x8] sm:$0xff]   ;;  %v3205_v48 = vld [vmem:[%s4402_s3 + $0x10] ss:$0 sps:$4 sm:$0xff]   ;;  %vm344_vm6 = vcmask 1043456   ;;  %vm340_vm7 = vcmask 326656  }
  0x19   :  { %vm39_vm2 = vcmp.eq.s32.totalorder %v3539_v17, 1  ;;  %2846 = vmatpush3.bf16.msra.mxu1 %v3583_v39  ;;  %v3601_v45 = vld [vmem:[%s4402_s3] sm:$0xff]   ;;  %v3618_v49 = vsel %vm344_vm6, %v3205_v48, 0 }
  0x1a   :  { %vm3339_vm4 = vmpackc.low %vm39_vm2, %vm39_vm2  ;;  %2847 = vmatprep.subr.bf16.mxu1 %v3381_v4  ;;  %v3628_v55 = vld [vmem:[%s4403_s4] sm:$0xff] }
  0x1b   :  { %210 = vmatpush1.bf16.msra.mxu0 %v3499_v10 }
  0x1c   :  { %211 = vmatprep.subr.bf16.mxu0 %v3380_v2 }
  0x1d   :  { %2848 = vmatpush3.bf16.msra.mxu1 %v3591_v40 }
  0x1e   :  { %2853 = vmatprep.subr.bf16.mxu1 %v3381_v4 }
  0x1f   :  { %212 = vmatpush1.bf16.msra.mxu0 %v3506_v11 }
  0x20   :  { %213 = vmatprep.subr.bf16.mxu0 %v3380_v2 }
  0x23   :  { %214 = vmatpush1.bf16.msra.mxu0 %v3513_v12 }
  0x24   :  { %215 = vmatprep.subr.bf16.mxu0 %v3380_v2 }
  0x27   :  { %216 = vmatpush1.bf16.msra.mxu0 %v3520_v13 }
  0x28   :  { %217 = vmatprep.subr.bf16.mxu0 %v3380_v2 }
  0x2b   :  { %218 = vmatpush1.bf16.msra.mxu0 %v3527_v14 }
  0x2c   :  { %219 = vmatprep.subr.bf16.mxu0 %v3380_v2 }
  0x2f   :  { %220 = vmatpush1.bf16.msra.mxu0 %v3534_v15 }
  0x30   :  { %572 = vmatprep.subr.bf16.mxu0 %v3380_v2 }
  0x74   :  { %v48_v18 = vpop.permute.xlu0 %47 }
  0x75   :  { %51 = vst.msk [vmem:[#allocation2 + $0x8] sm:$0xff] %vm50_vm1, %v48_v18  ;;  %v3637_v18 = vld [vmem:[%s4401_s2] sm:$0xff]  }
  0x77   :  { %v246_v35 = vpop.permute.xlu1 %245 }
  0x7c   :  { %v118_v19 = vld [vmem:[#allocation2 + $0x8] sm:$0xff] }
  0x7d   :  { %v120_v20 = vpack.c.bf16 %v118_v19, %v118_v19  ;;  %v3644_v19 = vld [vmem:[%s4401_s2 + $0x8] sm:$0xff]  }
  0x7f   :  { %2640 = vmatprep.mubr.msk.bf16.mxu0 %vm193_vm3, %v120_v20  ;;  %v3651_v20 = vld [vmem:[%s4401_s2 + $0x10] sm:$0xff]  }
  0x80   :  { %3340 = vmatmul.mubr.msk.bf16.vlgmr.msra.gmra.mrb[0].mxu0 %vm3339_vm4, %v3382_v21 }
  0x81   :  { %573 = vmatpush1.bf16.msra.mxu0 %v3449_v1 }
  0x82   :  { %574 = vmatprep.subr.bf16.mxu0 %v3380_v2 }
  0x85   :  { %575 = vmatpush1.bf16.msra.mxu0 %v3457_v3 }
  0x86   :  { %576 = vmatprep.subr.bf16.mxu0 %v3380_v2 }
  0x89   :  { %577 = vmatpush1.bf16.msra.mxu0 %v3467_v5 }
  0x8a   :  { %578 = vmatprep.subr.bf16.mxu0 %v3380_v2 }
  0x8d   :  { %579 = vmatpush1.bf16.msra.mxu0 %v3474_v6 }
  0x8e   :  { %580 = vmatprep.subr.bf16.mxu0 %v3380_v2 }
  0x91   :  { %581 = vmatpush1.bf16.msra.mxu0 %v3480_v7 }
  0x92   :  { %582 = vmatprep.subr.bf16.mxu0 %v3380_v2 }
  0x95   :  { %583 = vmatpush1.bf16.msra.mxu0 %v3491_v9 }
  0x96   :  { %584 = vmatprep.subr.bf16.mxu0 %v3380_v2 }
  0x99   :  { %585 = vmatpush1.bf16.msra.mxu0 %v3499_v10 }
  0x9a   :  { %586 = vmatprep.subr.bf16.mxu0 %v3380_v2 }
  0x9d   :  { %587 = vmatpush1.bf16.msra.mxu0 %v3506_v11 }
  0x9e   :  { %588 = vmatprep.subr.bf16.mxu0 %v3380_v2 }
  0xa1   :  { %589 = vmatpush1.bf16.msra.mxu0 %v3513_v12 }
  0xa2   :  { %590 = vmatprep.subr.bf16.mxu0 %v3380_v2 }
  0xa5   :  { %591 = vmatpush1.bf16.msra.mxu0 %v3520_v13 }
  0xa6   :  { %592 = vmatprep.subr.bf16.mxu0 %v3380_v2 }
  0xa9   :  { %593 = vmatpush1.bf16.msra.mxu0 %v3527_v14 }
  0xaa   :  { %594 = vmatprep.subr.bf16.mxu0 %v3380_v2 }
  0xad   :  { %595 = vmatpush1.bf16.msra.mxu0 %v3534_v15 }
  0xae   :  { %864 = vmatprep.subr.bf16.mxu0 %v3380_v2 }
 0x153   :  { %v231_v23 = vpop.f32.mrb[0].mxu0 }
 0x154   :  { %v232_v24 = vadd.f32 %v3572_v22, %v231_v23  ;;  %v233_v25 = vpop.f32.mrb[1].mxu0  ;;  %v3658_v23 = vld [vmem:[%s4401_s2 + $0x18] sm:$0xff]  }
 0x155   :  { %v234_v26 = vpop.f32.mrb[2].mxu0 }
 0x156   :  { %3214 = vtanh.f32 %v232_v24  ;;  %v235_v27 = vpop.f32.mrb[3].mxu0  ;;  %v2641_v29 = vmul.f32 -1.442695, %v232_v24 }
 0x157   :  { %v3665_v27 = vld [vmem:[%s4407_s8] sm:$0xff]  }
 0x158   :  { %3216 = vpow2.f32 %v2641_v29  ;;  %v3675_v29 = vld [vmem:[%s4407_s8 + $0x8] sm:$0xff]  }
 0x160   :  { %v3215_v28 = vpop.eup %3214 }
 0x161   :  { %250 = vrot.lane.b32.xlu0 %v3215_v28, %s3383_s22 }
 0x162   :  { %v3217_v30 = vpop.eup %3216 }
 0x163   :  { %v240_v31 = vadd.f32 1.0, %v3217_v30  ;;  %v3682_v30 = vld [vmem:[%s4407_s8 + $0x10] sm:$0xff]  }
 0x165   :  { %3218 = vrcp.f32 %v240_v31  ;;  %v3688_v31 = vld [vmem:[%s4407_s8 + $0x18] sm:$0xff]  }
 0x16f   :  { %v3219_v32 = vpop.eup %3218 }
 0x170   :  { %v248_v36 = vmul.f32 %v3219_v32, %v246_v35 }
 0x1d3   :  { %v251_v33 = vpop.permute.xlu0 %250 }
 0x1d4   :  { %v253_v34 = vmul.f32 %v3219_v32, %v251_v33 }
 0x1d6   :  { %255 = vrot.lane.b32.xlu1 %v253_v34, %s3379_s17 }
 0x248   :  { %v256_v37 = vpop.permute.xlu1 %255 }
 0x249   :  { %v3577_v38 = vadd.f32 %v256_v37, %v248_v36 }
 0x24b   :  { %3220 = vtanh.f32 %v3577_v38 }
 0x255   :  { %v3221_v41 = vpop.eup %3220 }
 0x256   :  { %261 = vrot.lane.b32.xlu0 %v3221_v41, %s3383_s22 }
 0x2c8   :  { %v262_v42 = vpop.permute.xlu0 %261 }
 0x2c9   :  { %v264_v43 = vmul.f32 %v3219_v32, %v262_v42  ;;  %v3706_v42 = vld [vmem:[%s4408_s9] ss:$0 sm:$0xff] }
 0x2cb   :  { %v265_v44 = vpack.c.bf16 %v264_v43, %v264_v43 }
 0x2cd   :  { %267 = vrot.lane.b32.xlu1 %v265_v44, %s3379_s17 }
 0x33f   :  { %v268_v46 = vpop.permute.xlu1 %267 }
 0x340   :  { %2850 = vmatmul.mubr.msk.bf16.vlgmr.msra.gmra.mrb[0].mxu1 %vm43_vm0, %v268_v46 }
 0x341   :  { %2854 = vmatpush3.bf16.msra.mxu1 %v3601_v45  ;;  %2859 = vmatprep.mubr.msk.bf16.mxu1 %vm3384_vm5, %v3381_v4 }
 0x342   :  { %2855 = vmatprep.subr.bf16.mxu1 %v3381_v4 }
 0x345   :  { %2856 = vmatpush3.bf16.msra.mxu1 %v3608_v47 }
 0x346   :  { %2857 = vmatprep.subr.bf16.mxu1 %v3381_v4 }
 0x349   :  { %2858 = vmatpush3.bf16.msra.mxu1 %v3618_v49 }
 0x34a   :  { %2863 = vmatprep.subr.bf16.mxu1 %v3381_v4 }
 0x413   :  { %v318_v50 = vpop.f32.mrb[0].mxu1 }
 0x414   :  { %v324_v51 = vpack.c.bf16 %v318_v50, %v318_v50  ;;  %v2851_v52 = vpop.f32.mrb[1].mxu1 }
 0x415   :  { %v321_v53 = vpop.f32.mrb[2].mxu1 }
 0x416   :  { %v2852_v54 = vpop.f32.mrb[3].mxu1  ;;  %2860 = vmatmul.mubr.msk.bf16.vlgmr.msra.gmra.mrb[4].mxu1 %vm340_vm7, %v324_v51 }
 0x417   :  { %2871 = vmatprep.mubr.msk.bf16.mxu1 %vm3384_vm5, %v3381_v4  ;;  %2864 = vmatpush3.bf16.msra.mxu1 %v3637_v18 }
 0x418   :  { %2865 = vmatprep.subr.bf16.mxu1 %v3381_v4 }
 0x41b   :  { %2866 = vmatpush3.bf16.msra.mxu1 %v3644_v19 }
 0x41c   :  { %2867 = vmatprep.subr.bf16.mxu1 %v3381_v4 }
 0x41f   :  { %2868 = vmatpush3.bf16.msra.mxu1 %v3651_v20 }
 0x420   :  { %2869 = vmatprep.subr.bf16.mxu1 %v3381_v4 }
 0x423   :  { %2870 = vmatpush3.bf16.msra.mxu1 %v3658_v23 }
 0x424   :  { %2875 = vmatprep.subr.bf16.mxu1 %v3381_v4 }
 0x4e9   :  { %v382_v56 = vpop.f32.mrb[4].mxu1 }
 0x4ea   :  { %v383_v57 = vadd.f32 %v382_v56, %v3628_v55  ;;  %v2861_v58 = vpop.f32.mrb[5].mxu1 }
 0x4eb   :  { %v385_v59 = vpop.f32.mrb[6].mxu1 }
 0x4ec   :  { %v2862_v60 = vpop.f32.mrb[7].mxu1  ;;  %v388_v61 = vsel %vm193_vm3, %v383_v57, -inf }
 0x4ed   :  { %389 = vmax.xlane.f32.xlu0 %v388_v61 }
 0x503   :  { %469 = vrot.lane.b32.xlu0 %v264_v43, %s3383_s22 }
 0x57a   :  { %v390_v62 = vpop.xlane.xlu0 %389 }
 0x57b   :  { %v391_v63 = vsub.f32 %v383_v57, %v390_v62 }
 0x57d   :  { %v392_v0 = vmul.f32 1.442695, %v391_v63 }
 0x57e   :  { %v470_v33 = vpop.permute.xlu0 %469 }
 0x57f   :  { %3222 = vpow2.f32 %v392_v0 }
 0x589   :  { %v3223_v8 = vpop.eup %3222 }
 0x58a   :  { %v394_v16 = vsel %vm193_vm3, %v3223_v8, 0.0 }
 0x58b   :  { %395 = vadd.xlane.f32.xlu1 %v394_v16 }
 0x618   :  { %v396_v24 = vpop.xlane.xlu1 %395 }
 0x619   :  { %3224 = vrcp.f32 %v396_v24 }
 0x623   :  { %v3225_v25 = vpop.eup %3224 }
 0x624   :  { %v398_v26 = vmul.f32 %v3225_v25, %v3223_v8 }
 0x626   :  { %v399_v28 = vpack.c.bf16 %v398_v26, %v398_v26 }
 0x628   :  { %2872 = vmatmul.mubr.msk.bf16.vlgmr.msra.gmra.mrb[8].mxu1 %vm193_vm3, %v399_v28 }
 0x629   :  { %2876 = vmatpush3.bf16.msra.mxu1 %v3665_v27  ;;  %2883 = vmatprep.mubr.msk.bf16.mxu1 %vm3384_vm5, %v3381_v4 }
 0x62a   :  { %2877 = vmatprep.subr.bf16.mxu1 %v3381_v4 }
 0x62d   :  { %2878 = vmatpush3.bf16.msra.mxu1 %v3675_v29 }
 0x62e   :  { %2879 = vmatprep.subr.bf16.mxu1 %v3381_v4 }
 0x631   :  { %2880 = vmatpush3.bf16.msra.mxu1 %v3682_v30 }
 0x632   :  { %2881 = vmatprep.subr.bf16.mxu1 %v3381_v4 }
 0x635   :  { %2882 = vmatpush3.bf16.msra.mxu1 %v3688_v31 }
 0x636   :  { %2887 = vmatprep.subr.bf16.mxu1 %v3381_v4 }
 0x6fb   :  { %v461_v32 = vpop.f32.mrb[8].mxu1 }
 0x6fc   :  { %467 = vst.msk [vmem:[#allocation2 + $0x8] sm:$0xff] %vm43_vm0, %v461_v32  ;;  %v2873_v34 = vpop.f32.mrb[9].mxu1 }
 0x6fd   :  { %472 = vst.msk [vmem:[#allocation2 + $0x8] sm:$0xff] %vm50_vm1, %v470_v33  ;;  %v464_v35 = vpop.f32.mrb[10].mxu1 }
 0x6fe   :  { %v2874_v36 = vpop.f32.mrb[11].mxu1 }
 0x704   :  { %v473_v37 = vld [vmem:[#allocation2 + $0x8] sm:$0xff] }
 0x705   :  { %v474_v41 = vpack.c.bf16 %v473_v37, %v473_v37 }
 0x707   :  { %2884 = vmatmul.mubr.msk.bf16.vlgmr.msra.gmra.mrb[12].mxu1 %vm193_vm3, %v474_v41  ;;  %2660 = vmatprep.mubr.msk.bf16.mxu0 %vm193_vm3, %v474_v41 }
 0x708   :  { %2888 = vmatpush3.bf16.msra.mxu1 %v3583_v39  ;;  %2891 = vmatprep.mubr.msk.bf16.mxu1 %vm3384_vm5, %v3381_v4 }
 0x709   :  { %2889 = vmatprep.subr.bf16.mxu1 %v3381_v4 }
 0x70c   :  { %2890 = vmatpush3.bf16.msra.mxu1 %v3591_v40 }
 0x70d   :  { %2895 = vmatprep.subr.bf16.mxu1 %v3381_v4 }
 0x7da   :  { %v536_v43 = vpop.f32.mrb[12].mxu1 }
 0x7db   :  { %v537_v44 = vadd.f32 %v3706_v42, %v536_v43  ;;  %v2885_v46 = vpop.f32.mrb[13].mxu1 }
 0x7dc   :  { %v539_v48 = vpop.f32.mrb[14].mxu1 }
 0x7dd   :  { %542 = vst [vmem:[#allocation3] sm:$0xff] %v537_v44  ;;  %543 = vmax.xlane.f32.xlu1 %v537_v44  ;;  %v2886_v50 = vpop.f32.mrb[15].mxu1 }
 0x86a   :  { %v544_v51 = vpop.xlane.xlu1 %543 }
 0x86b   :  { %vm545_vm8 = vcmp.ge.f32.partialorder %v537_v44, %v544_v51 }
 0x86c   :  { %v546_v52 = vsel %vm545_vm8, %v3539_v17, 128 }
 0x86d   :  { %v548_v53 = vshra.s32 %v546_v52, 16  ;;  %v547_v56 = vand.u32 65535, %v546_v52 }
 0x86f   :  { %v550_v54 = vcvt.s32.f32 %v548_v53  ;;  %v549_v58 = vcvt.s32.f32 %v547_v56 }
 0x871   :  { %551 = vmin.xlane.f32.xlu1 %v550_v54 }
 0x8fe   :  { %v552_v57 = vpop.xlane.xlu1 %551 }
 0x8ff   :  { %vm553_vm9 = vcmp.eq.f32.partialorder %v550_v54, %v552_v57  ;;  %v558_v60 = vcvt.f32.s32 %v552_v57 }
 0x900   :  { %v554_v59 = vsel %vm553_vm9, %v549_v58, inf }
 0x901   :  { %555 = vmin.xlane.f32.xlu1 %v554_v59  ;;  %v559_v62 = vshll.u32 %v558_v60, 16 }
 0x98e   :  { %v556_v61 = vpop.xlane.xlu1 %555 }
 0x98f   :  { %v557_v63 = vcvt.f32.s32 %v556_v61 }
 0x991   :  { %v560_v0 = vadd.s32 %v559_v62, %v557_v63 }
 0x993   :  { %vm561_vm10 = vcmp.eq.s32.totalorder %v3539_v17, %v560_v0 }
 0x994   :  { %vm3341_vm11 = vmpackc.low %vm561_vm10, %vm561_vm10 }
 0x995   :  { %3342 = vmatmul.mubr.msk.bf16.vlgmr.msra.gmra.mrb[4].mxu0 %vm3341_vm11, %v3382_v21 }
 0x996   :  { %865 = vmatpush1.bf16.msra.mxu0 %v3449_v1 }
 0x997   :  { %866 = vmatprep.subr.bf16.mxu0 %v3380_v2 }
 0x99a   :  { %867 = vmatpush1.bf16.msra.mxu0 %v3457_v3 }
 0x99b   :  { %868 = vmatprep.subr.bf16.mxu0 %v3380_v2 }
 0x99e   :  { %869 = vmatpush1.bf16.msra.mxu0 %v3467_v5 }
 0x99f   :  { %870 = vmatprep.subr.bf16.mxu0 %v3380_v2 }
 0x9a2   :  { %871 = vmatpush1.bf16.msra.mxu0 %v3474_v6 }
 0x9a3   :  { %872 = vmatprep.subr.bf16.mxu0 %v3380_v2 }
 0x9a6   :  { %873 = vmatpush1.bf16.msra.mxu0 %v3480_v7 }
 0x9a7   :  { %874 = vmatprep.subr.bf16.mxu0 %v3380_v2 }
 0x9aa   :  { %875 = vmatpush1.bf16.msra.mxu0 %v3491_v9 }
 0x9ab   :  { %876 = vmatprep.subr.bf16.mxu0 %v3380_v2 }
 0x9ae   :  { %877 = vmatpush1.bf16.msra.mxu0 %v3499_v10 }
 0x9af   :  { %878 = vmatprep.subr.bf16.mxu0 %v3380_v2 }
 0x9b2   :  { %879 = vmatpush1.bf16.msra.mxu0 %v3506_v11 }
 0x9b3   :  { %880 = vmatprep.subr.bf16.mxu0 %v3380_v2 }
 0x9b6   :  { %881 = vmatpush1.bf16.msra.mxu0 %v3513_v12 }
 0x9b7   :  { %882 = vmatprep.subr.bf16.mxu0 %v3380_v2 }
 0x9ba   :  { %883 = vmatpush1.bf16.msra.mxu0 %v3520_v13 }
 0x9bb   :  { %884 = vmatprep.subr.bf16.mxu0 %v3380_v2 }
 0x9be   :  { %885 = vmatpush1.bf16.msra.mxu0 %v3527_v14 }
 0x9bf   :  { %886 = vmatprep.subr.bf16.mxu0 %v3380_v2 }
 0x9c2   :  { %887 = vmatpush1.bf16.msra.mxu0 %v3534_v15 }
 0x9c3   :  { %1156 = vmatprep.subr.bf16.mxu0 %v3380_v2 }
 0xa68   :  { %v606_v8 = vpop.f32.mrb[4].mxu0 }
 0xa69   :  { %v607_v16 = vadd.f32 %v3572_v22, %v606_v8  ;;  %v608_v24 = vpop.f32.mrb[5].mxu0 }
 0xa6a   :  { %v609_v25 = vpop.f32.mrb[6].mxu0 }
 0xa6b   :  { %3226 = vtanh.f32 %v607_v16  ;;  %v610_v26 = vpop.f32.mrb[7].mxu0  ;;  %v2661_v32 = vmul.f32 -1.442695, %v607_v16 }
 0xa6d   :  { %3228 = vpow2.f32 %v2661_v32 }
 0xa75   :  { %v3227_v28 = vpop.eup %3226 }
 0xa76   :  { %621 = vrot.lane.b32.xlu1 %v3227_v28, %s3383_s22 }
 0xa77   :  { %v3229_v33 = vpop.eup %3228 }
 0xa78   :  { %v615_v34 = vadd.f32 1.0, %v3229_v33 }
 0xa7a   :  { %3230 = vrcp.f32 %v615_v34 }
 0xa84   :  { %v3231_v35 = vpop.eup %3230 }
 0xa85   :  { %v619_v41 = vmul.f32 %v3231_v35, %v3577_v38 }
 0xae8   :  { %v622_v36 = vpop.permute.xlu1 %621 }
 0xae9   :  { %v624_v37 = vmul.f32 %v3231_v35, %v622_v36 }
 0xaeb   :  { %626 = vrot.lane.b32.xlu0 %v624_v37, %s3379_s17 }
 0xb5d   :  { %v627_v43 = vpop.permute.xlu0 %626 }
 0xb5e   :  { %v3740_v44 = vadd.f32 %v627_v43, %v619_v41 }
 0xb60   :  { %3232 = vtanh.f32 %v3740_v44 }
 0xb6a   :  { %v3233_v46 = vpop.eup %3232 }
 0xb6b   :  { %632 = vrot.lane.b32.xlu0 %v3233_v46, %s3383_s22 }
 0xbdd   :  { %v633_v48 = vpop.permute.xlu0 %632 }
 0xbde   :  { %v635_v50 = vmul.f32 %v3231_v35, %v633_v48 }
 0xbe0   :  { %v636_v51 = vpack.c.bf16 %v635_v50, %v635_v50 }
 0xbe2   :  { %638 = vrot.lane.b32.xlu0 %v636_v51, %s3379_s17 }
 0xc54   :  { %v639_v52 = vpop.permute.xlu0 %638 }
 0xc55   :  { %2892 = vmatmul.mubr.msk.bf16.vlgmr.msra.gmra.mrb[16].mxu1 %vm43_vm0, %v639_v52 }
 0xc56   :  { %2896 = vmatpush3.bf16.msra.mxu1 %v3601_v45  ;;  %2901 = vmatprep.mubr.msk.bf16.mxu1 %vm3384_vm5, %v3381_v4 }
 0xc57   :  { %2897 = vmatprep.subr.bf16.mxu1 %v3381_v4 }
 0xc5a   :  { %2898 = vmatpush3.bf16.msra.mxu1 %v3608_v47 }
 0xc5b   :  { %2899 = vmatprep.subr.bf16.mxu1 %v3381_v4 }
 0xc5e   :  { %2900 = vmatpush3.bf16.msra.mxu1 %v3618_v49 }
 0xc5f   :  { %2905 = vmatprep.subr.bf16.mxu1 %v3381_v4 }
 0xd28   :  { %v677_v38 = vpop.f32.mrb[16].mxu1 }
 0xd29   :  { %v683_v53 = vpack.c.bf16 %v677_v38, %v677_v38  ;;  %v2893_v54 = vpop.f32.mrb[17].mxu1 }
 0xd2a   :  { %v680_v56 = vpop.f32.mrb[18].mxu1 }
 0xd2b   :  { %v2894_v57 = vpop.f32.mrb[19].mxu1  ;;  %2902 = vmatmul.mubr.msk.bf16.vlgmr.msra.gmra.mrb[20].mxu1 %vm340_vm7, %v683_v53 }
 0xd2c   :  { %2906 = vmatpush3.bf16.msra.mxu1 %v3637_v18  ;;  %2913 = vmatprep.mubr.msk.bf16.mxu1 %vm3384_vm5, %v3381_v4 }
 0xd2d   :  { %2907 = vmatprep.subr.bf16.mxu1 %v3381_v4 }
 0xd30   :  { %2908 = vmatpush3.bf16.msra.mxu1 %v3644_v19 }
 0xd31   :  { %2909 = vmatprep.subr.bf16.mxu1 %v3381_v4 }
 0xd34   :  { %2910 = vmatpush3.bf16.msra.mxu1 %v3651_v20 }
 0xd35   :  { %2911 = vmatprep.subr.bf16.mxu1 %v3381_v4 }
 0xd38   :  { %2912 = vmatpush3.bf16.msra.mxu1 %v3658_v23 }
 0xd39   :  { %2917 = vmatprep.subr.bf16.mxu1 %v3381_v4 }
 0xdfe   :  { %v721_v58 = vpop.f32.mrb[20].mxu1 }
 0xdff   :  { %v722_v59 = vadd.f32 %v721_v58, %v3628_v55  ;;  %v2903_v60 = vpop.f32.mrb[21].mxu1 }
 0xe00   :  { %v724_v61 = vpop.f32.mrb[22].mxu1 }
 0xe01   :  { %v2904_v62 = vpop.f32.mrb[23].mxu1  ;;  %v727_v63 = vsel %vm193_vm3, %v722_v59, -inf }
 0xe02   :  { %728 = vmax.xlane.f32.xlu0 %v727_v63 }
 0xe18   :  { %784 = vrot.lane.b32.xlu0 %v635_v50, %s3383_s22 }
 0xe8f   :  { %v729_v0 = vpop.xlane.xlu0 %728 }
 0xe90   :  { %v730_v8 = vsub.f32 %v722_v59, %v729_v0 }
 0xe92   :  { %v731_v16 = vmul.f32 1.442695, %v730_v8 }
 0xe93   :  { %v785_v35 = vpop.permute.xlu0 %784 }
 0xe94   :  { %3234 = vpow2.f32 %v731_v16 }
 0xe9e   :  { %v3235_v24 = vpop.eup %3234 }
 0xe9f   :  { %v733_v25 = vsel %vm193_vm3, %v3235_v24, 0.0 }
 0xea0   :  { %734 = vadd.xlane.f32.xlu1 %v733_v25 }
 0xf2d   :  { %v735_v26 = vpop.xlane.xlu1 %734 }
 0xf2e   :  { %3236 = vrcp.f32 %v735_v26 }
 0xf38   :  { %v3237_v28 = vpop.eup %3236 }
 0xf39   :  { %v737_v32 = vmul.f32 %v3237_v28, %v3235_v24 }
 0xf3b   :  { %v738_v33 = vpack.c.bf16 %v737_v32, %v737_v32 }
 0xf3d   :  { %2914 = vmatmul.mubr.msk.bf16.vlgmr.msra.gmra.mrb[24].mxu1 %vm193_vm3, %v738_v33 }
 0xf3e   :  { %2918 = vmatpush3.bf16.msra.mxu1 %v3665_v27  ;;  %2925 = vmatprep.mubr.msk.bf16.mxu1 %vm3384_vm5, %v3381_v4 }
 0xf3f   :  { %2919 = vmatprep.subr.bf16.mxu1 %v3381_v4 }
 0xf42   :  { %2920 = vmatpush3.bf16.msra.mxu1 %v3675_v29 }
 0xf43   :  { %2921 = vmatprep.subr.bf16.mxu1 %v3381_v4 }
 0xf46   :  { %2922 = vmatpush3.bf16.msra.mxu1 %v3682_v30 }
 0xf47   :  { %2923 = vmatprep.subr.bf16.mxu1 %v3381_v4 }
 0xf4a   :  { %2924 = vmatpush3.bf16.msra.mxu1 %v3688_v31 }
 0xf4b   :  { %2929 = vmatprep.subr.bf16.mxu1 %v3381_v4 }
0x1010   :  { %v776_v34 = vpop.f32.mrb[24].mxu1 }
0x1011   :  { %782 = vst.msk [vmem:[#allocation2 + $0x8] sm:$0xff] %vm43_vm0, %v776_v34  ;;  %v2915_v36 = vpop.f32.mrb[25].mxu1 }
0x1012   :  { %787 = vst.msk [vmem:[#allocation2 + $0x8] sm:$0xff] %vm50_vm1, %v785_v35  ;;  %v779_v37 = vpop.f32.mrb[26].mxu1 }
0x1013   :  { %v2916_v41 = vpop.f32.mrb[27].mxu1 }
0x1019   :  { %v788_v43 = vld [vmem:[#allocation2 + $0x8] sm:$0xff] }
0x101a   :  { %v789_v46 = vpack.c.bf16 %v788_v43, %v788_v43 }
0x101c   :  { %2926 = vmatmul.mubr.msk.bf16.vlgmr.msra.gmra.mrb[28].mxu1 %vm193_vm3, %v789_v46  ;;  %2667 = vmatprep.mubr.msk.bf16.mxu0 %vm193_vm3, %v789_v46 }
0x101d   :  { %2930 = vmatpush3.bf16.msra.mxu1 %v3583_v39  ;;  %2933 = vmatprep.mubr.msk.bf16.mxu1 %vm3384_vm5, %v3381_v4 }
0x101e   :  { %2931 = vmatprep.subr.bf16.mxu1 %v3381_v4 }
0x1021   :  { %2932 = vmatpush3.bf16.msra.mxu1 %v3591_v40 }
0x1022   :  { %2937 = vmatprep.subr.bf16.mxu1 %v3381_v4 }
0x10ef   :  { %v827_v48 = vpop.f32.mrb[28].mxu1 }
0x10f0   :  { %v828_v50 = vadd.f32 %v3706_v42, %v827_v48  ;;  %v2927_v51 = vpop.f32.mrb[29].mxu1 }
0x10f1   :  { %v830_v52 = vpop.f32.mrb[30].mxu1 }
0x10f2   :  { %834 = vst [vmem:[#allocation3 + $0x8] sm:$0xff] %v828_v50  ;;  %835 = vmax.xlane.f32.xlu1 %v828_v50  ;;  %v2928_v38 = vpop.f32.mrb[31].mxu1 }
0x117f   :  { %v836_v53 = vpop.xlane.xlu1 %835 }
0x1180   :  { %vm837_vm12 = vcmp.ge.f32.partialorder %v828_v50, %v836_v53 }
0x1181   :  { %v838_v54 = vsel %vm837_vm12, %v3539_v17, 128 }
0x1182   :  { %v840_v56 = vshra.s32 %v838_v54, 16  ;;  %v839_v58 = vand.u32 65535, %v838_v54 }
0x1184   :  { %v842_v57 = vcvt.s32.f32 %v840_v56  ;;  %v841_v60 = vcvt.s32.f32 %v839_v58 }
0x1186   :  { %843 = vmin.xlane.f32.xlu1 %v842_v57 }
0x1213   :  { %v844_v59 = vpop.xlane.xlu1 %843 }
0x1214   :  { %vm845_vm13 = vcmp.eq.f32.partialorder %v842_v57, %v844_v59  ;;  %v850_v62 = vcvt.f32.s32 %v844_v59 }
0x1215   :  { %v846_v61 = vsel %vm845_vm13, %v841_v60, inf }
0x1216   :  { %847 = vmin.xlane.f32.xlu1 %v846_v61  ;;  %v851_v0 = vshll.u32 %v850_v62, 16 }
0x12a3   :  { %v848_v63 = vpop.xlane.xlu1 %847 }
0x12a4   :  { %v849_v8 = vcvt.f32.s32 %v848_v63 }
0x12a6   :  { %v852_v16 = vadd.s32 %v851_v0, %v849_v8 }
0x12a8   :  { %vm853_vm14 = vcmp.eq.s32.totalorder %v3539_v17, %v852_v16 }
0x12a9   :  { %vm3343_vm15 = vmpackc.low %vm853_vm14, %vm853_vm14 }
0x12aa   :  { %3344 = vmatmul.mubr.msk.bf16.vlgmr.msra.gmra.mrb[8].mxu0 %vm3343_vm15, %v3382_v21 }
0x12ab   :  { %1157 = vmatpush1.bf16.msra.mxu0 %v3449_v1 }
0x12ac   :  { %1158 = vmatprep.subr.bf16.mxu0 %v3380_v2 }
0x12af   :  { %1159 = vmatpush1.bf16.msra.mxu0 %v3457_v3 }
0x12b0   :  { %1160 = vmatprep.subr.bf16.mxu0 %v3380_v2 }
0x12b3   :  { %1161 = vmatpush1.bf16.msra.mxu0 %v3467_v5 }
0x12b4   :  { %1162 = vmatprep.subr.bf16.mxu0 %v3380_v2 }
0x12b7   :  { %1163 = vmatpush1.bf16.msra.mxu0 %v3474_v6 }
0x12b8   :  { %1164 = vmatprep.subr.bf16.mxu0 %v3380_v2 }
0x12bb   :  { %1165 = vmatpush1.bf16.msra.mxu0 %v3480_v7 }
0x12bc   :  { %1166 = vmatprep.subr.bf16.mxu0 %v3380_v2 }
0x12bf   :  { %1167 = vmatpush1.bf16.msra.mxu0 %v3491_v9 }
0x12c0   :  { %1168 = vmatprep.subr.bf16.mxu0 %v3380_v2 }
0x12c3   :  { %1169 = vmatpush1.bf16.msra.mxu0 %v3499_v10 }
0x12c4   :  { %1170 = vmatprep.subr.bf16.mxu0 %v3380_v2 }
0x12c7   :  { %1171 = vmatpush1.bf16.msra.mxu0 %v3506_v11 }
0x12c8   :  { %1172 = vmatprep.subr.bf16.mxu0 %v3380_v2 }
0x12cb   :  { %1173 = vmatpush1.bf16.msra.mxu0 %v3513_v12 }
0x12cc   :  { %1174 = vmatprep.subr.bf16.mxu0 %v3380_v2 }
0x12cf   :  { %1175 = vmatpush1.bf16.msra.mxu0 %v3520_v13 }
0x12d0   :  { %1176 = vmatprep.subr.bf16.mxu0 %v3380_v2 }
0x12d3   :  { %1177 = vmatpush1.bf16.msra.mxu0 %v3527_v14 }
0x12d4   :  { %1178 = vmatprep.subr.bf16.mxu0 %v3380_v2 }
0x12d7   :  { %1179 = vmatpush1.bf16.msra.mxu0 %v3534_v15 }
0x12d8   :  { %3001 = vmatprep.subr.bf16.mxu0 %v3381_v4 }
0x137d   :  { %v898_v1 = vpop.f32.mrb[8].mxu0 }
0x137e   :  { %v899_v3 = vadd.f32 %v3572_v22, %v898_v1  ;;  %v900_v5 = vpop.f32.mrb[9].mxu0 }
0x137f   :  { %v901_v6 = vpop.f32.mrb[10].mxu0 }
0x1380   :  { %3238 = vtanh.f32 %v899_v3  ;;  %v902_v7 = vpop.f32.mrb[11].mxu0  ;;  %v2668_v10 = vmul.f32 -1.442695, %v899_v3 }
0x1382   :  { %3240 = vpow2.f32 %v2668_v10 }
0x138a   :  { %v3239_v9 = vpop.eup %3238 }
0x138b   :  { %913 = vrot.lane.b32.xlu1 %v3239_v9, %s3383_s22 }
0x138c   :  { %v3241_v11 = vpop.eup %3240 }
0x138d   :  { %v907_v12 = vadd.f32 1.0, %v3241_v11 }
0x138f   :  { %3242 = vrcp.f32 %v907_v12 }
0x1399   :  { %v3243_v13 = vpop.eup %3242 }
0x139a   :  { %v911_v24 = vmul.f32 %v3243_v13, %v3740_v44 }
0x13fd   :  { %v914_v14 = vpop.permute.xlu1 %913 }
0x13fe   :  { %v916_v15 = vmul.f32 %v3243_v13, %v914_v14 }
0x1400   :  { %918 = vrot.lane.b32.xlu0 %v916_v15, %s3379_s17 }
0x1472   :  { %v919_v25 = vpop.permute.xlu0 %918 }
0x1473   :  { %v3822_v26 = vadd.f32 %v919_v25, %v911_v24 }
0x1475   :  { %3244 = vtanh.f32 %v3822_v26 }
0x147f   :  { %v3245_v28 = vpop.eup %3244 }
0x1480   :  { %924 = vrot.lane.b32.xlu0 %v3245_v28, %s3383_s22 }
0x14f2   :  { %v925_v32 = vpop.permute.xlu0 %924 }
0x14f3   :  { %v927_v33 = vmul.f32 %v3243_v13, %v925_v32 }
0x14f5   :  { %v928_v34 = vpack.c.bf16 %v927_v33, %v927_v33 }
0x14f7   :  { %930 = vrot.lane.b32.xlu0 %v928_v34, %s3379_s17 }
0x1569   :  { %v931_v35 = vpop.permute.xlu0 %930 }
0x156a   :  { %2934 = vmatmul.mubr.msk.bf16.vlgmr.msra.gmra.mrb[32].mxu1 %vm43_vm0, %v931_v35 }
0x156b   :  { %2938 = vmatpush3.bf16.msra.mxu1 %v3601_v45  ;;  %2943 = vmatprep.mubr.msk.bf16.mxu1 %vm3384_vm5, %v3381_v4 }
0x156c   :  { %2939 = vmatprep.subr.bf16.mxu1 %v3381_v4 }
0x156f   :  { %2940 = vmatpush3.bf16.msra.mxu1 %v3608_v47 }
0x1570   :  { %2941 = vmatprep.subr.bf16.mxu1 %v3381_v4 }
0x1573   :  { %2942 = vmatpush3.bf16.msra.mxu1 %v3618_v49 }
0x1574   :  { %2947 = vmatprep.subr.bf16.mxu1 %v3381_v4 }
0x163d   :  { %v969_v44 = vpop.f32.mrb[32].mxu1 }
0x163e   :  { %v975_v36 = vpack.c.bf16 %v969_v44, %v969_v44  ;;  %v2935_v37 = vpop.f32.mrb[33].mxu1 }
0x163f   :  { %v972_v41 = vpop.f32.mrb[34].mxu1 }
0x1640   :  { %v2936_v43 = vpop.f32.mrb[35].mxu1  ;;  %2944 = vmatmul.mubr.msk.bf16.vlgmr.msra.gmra.mrb[36].mxu1 %vm340_vm7, %v975_v36 }
0x1641   :  { %2948 = vmatpush3.bf16.msra.mxu1 %v3637_v18  ;;  %2955 = vmatprep.mubr.msk.bf16.mxu1 %vm3384_vm5, %v3381_v4 }
0x1642   :  { %2949 = vmatprep.subr.bf16.mxu1 %v3381_v4 }
0x1645   :  { %2950 = vmatpush3.bf16.msra.mxu1 %v3644_v19 }
0x1646   :  { %2951 = vmatprep.subr.bf16.mxu1 %v3381_v4 }
0x1649   :  { %2952 = vmatpush3.bf16.msra.mxu1 %v3651_v20 }
0x164a   :  { %2953 = vmatprep.subr.bf16.mxu1 %v3381_v4 }
0x164d   :  { %2954 = vmatpush3.bf16.msra.mxu1 %v3658_v23 }
0x164e   :  { %2959 = vmatprep.subr.bf16.mxu1 %v3381_v4 }
0x1713   :  { %v1013_v46 = vpop.f32.mrb[36].mxu1 }
0x1714   :  { %v1014_v48 = vadd.f32 %v1013_v46, %v3628_v55  ;;  %v2945_v50 = vpop.f32.mrb[37].mxu1 }
0x1715   :  { %v1016_v51 = vpop.f32.mrb[38].mxu1 }
0x1716   :  { %v2946_v52 = vpop.f32.mrb[39].mxu1  ;;  %v1019_v38 = vsel %vm193_vm3, %v1014_v48, -inf }
0x1717   :  { %1020 = vmax.xlane.f32.xlu0 %v1019_v38 }
0x172d   :  { %1076 = vrot.lane.b32.xlu0 %v927_v33, %s3383_s22 }
0x17a4   :  { %v1021_v53 = vpop.xlane.xlu0 %1020 }
0x17a5   :  { %v1022_v54 = vsub.f32 %v1014_v48, %v1021_v53 }
0x17a7   :  { %v1023_v56 = vmul.f32 1.442695, %v1022_v54 }
0x17a8   :  { %v1077_v0 = vpop.permute.xlu0 %1076 }
0x17a9   :  { %3246 = vpow2.f32 %v1023_v56 }
0x17b3   :  { %v3247_v57 = vpop.eup %3246 }
0x17b4   :  { %v1025_v58 = vsel %vm193_vm3, %v3247_v57, 0.0 }
0x17b5   :  { %1026 = vadd.xlane.f32.xlu1 %v1025_v58 }
0x1842   :  { %v1027_v59 = vpop.xlane.xlu1 %1026 }
0x1843   :  { %3248 = vrcp.f32 %v1027_v59 }
0x184d   :  { %v3249_v60 = vpop.eup %3248 }
0x184e   :  { %v1029_v61 = vmul.f32 %v3249_v60, %v3247_v57 }
0x1850   :  { %v1030_v62 = vpack.c.bf16 %v1029_v61, %v1029_v61 }
0x1852   :  { %2956 = vmatmul.mubr.msk.bf16.vlgmr.msra.gmra.mrb[40].mxu1 %vm193_vm3, %v1030_v62 }
0x1853   :  { %2960 = vmatpush3.bf16.msra.mxu1 %v3665_v27  ;;  %2967 = vmatprep.mubr.msk.bf16.mxu1 %vm3384_vm5, %v3381_v4 }
0x1854   :  { %2961 = vmatprep.subr.bf16.mxu1 %v3381_v4 }
0x1857   :  { %2962 = vmatpush3.bf16.msra.mxu1 %v3675_v29 }
0x1858   :  { %2963 = vmatprep.subr.bf16.mxu1 %v3381_v4 }
0x185b   :  { %2964 = vmatpush3.bf16.msra.mxu1 %v3682_v30 }
0x185c   :  { %2965 = vmatprep.subr.bf16.mxu1 %v3381_v4 }
0x185f   :  { %2966 = vmatpush3.bf16.msra.mxu1 %v3688_v31 }
0x1860   :  { %2971 = vmatprep.subr.bf16.mxu1 %v3381_v4 }
0x1925   :  { %v1068_v63 = vpop.f32.mrb[40].mxu1 }
0x1926   :  { %1074 = vst.msk [vmem:[#allocation2 + $0x8] sm:$0xff] %vm43_vm0, %v1068_v63  ;;  %v2957_v8 = vpop.f32.mrb[41].mxu1 }
0x1927   :  { %1079 = vst.msk [vmem:[#allocation2 + $0x8] sm:$0xff] %vm50_vm1, %v1077_v0  ;;  %v1071_v16 = vpop.f32.mrb[42].mxu1 }
0x1928   :  { %v2958_v1 = vpop.f32.mrb[43].mxu1 }
0x192e   :  { %v1080_v3 = vld [vmem:[#allocation2 + $0x8] sm:$0xff] }
0x192f   :  { %v1081_v5 = vpack.c.bf16 %v1080_v3, %v1080_v3 }
0x1931   :  { %2968 = vmatmul.mubr.msk.bf16.vlgmr.msra.gmra.mrb[44].mxu1 %vm193_vm3, %v1081_v5  ;;  %2674 = vmatprep.mubr.msk.bf16.mxu0 %vm193_vm3, %v1081_v5 }
0x1932   :  { %2972 = vmatpush3.bf16.msra.mxu1 %v3583_v39  ;;  %2975 = vmatprep.mubr.msk.bf16.mxu1 %vm3384_vm5, %v3381_v4 }
0x1933   :  { %2973 = vmatprep.subr.bf16.mxu1 %v3381_v4 }
0x1936   :  { %2974 = vmatpush3.bf16.msra.mxu1 %v3591_v40 }
0x1937   :  { %2979 = vmatprep.subr.bf16.mxu1 %v3381_v4 }
0x1a04   :  { %v1119_v6 = vpop.f32.mrb[44].mxu1 }
0x1a05   :  { %v1120_v7 = vadd.f32 %v3706_v42, %v1119_v6  ;;  %v2969_v9 = vpop.f32.mrb[45].mxu1  ;;  %v3923_v6 = vld [vmem:[%s4404_s5] sm:$0xff]  }
0x1a06   :  { %v1122_v10 = vpop.f32.mrb[46].mxu1  ;;  %v3937_v9 = vld [vmem:[%s4404_s5 + $0x10] sm:$0xff]  }
0x1a07   :  { %1126 = vst [vmem:[#allocation3 + $0x10] sm:$0xff] %v1120_v7  ;;  %1127 = vmax.xlane.f32.xlu1 %v1120_v7  ;;  %v2970_v11 = vpop.f32.mrb[47].mxu1  ;;  %v3944_v10 = vld [vmem:[%s4404_s5 + $0x18] sm:$0xff]  }
0x1a08   :  { %v3951_v11 = vld [vmem:[%s4404_s5 + $0x20] sm:$0xff]  }
0x1a94   :  { %v1128_v12 = vpop.xlane.xlu1 %1127 }
0x1a95   :  { %vm1129_vm2 = vcmp.ge.f32.partialorder %v1120_v7, %v1128_v12  ;;  %v3930_v7 = vld [vmem:[%s4404_s5 + $0x8] sm:$0xff]  }
0x1a96   :  { %v1130_v39 = vsel %vm1129_vm2, %v3539_v17, 128  ;;  %v3958_v12 = vld [vmem:[%s4404_s5 + $0x28] sm:$0xff]  }
0x1a97   :  { %v1132_v13 = vshra.s32 %v1130_v39, 16  ;;  %v1131_v15 = vand.u32 65535, %v1130_v39  ;;  %v3965_v39 = vld [vmem:[%s4404_s5 + $0x30] sm:$0xff]  }
0x1a99   :  { %v1134_v14 = vcvt.s32.f32 %v1132_v13  ;;  %v1133_v40 = vcvt.s32.f32 %v1131_v15  ;;  %v3972_v13 = vld [vmem:[%s4404_s5 + $0x38] sm:$0xff]   ;;  %v3986_v15 = vld [vmem:[%s4404_s5 + $0x48] sm:$0xff]  }
0x1a9b   :  { %1135 = vmin.xlane.f32.xlu1 %v1134_v14 }
0x1b28   :  { %v1136_v24 = vpop.xlane.xlu1 %1135 }
0x1b29   :  { %vm1137_vm4 = vcmp.eq.f32.partialorder %v1134_v14, %v1136_v24  ;;  %v1142_v28 = vcvt.f32.s32 %v1136_v24  ;;  %v3979_v14 = vld [vmem:[%s4404_s5 + $0x40] sm:$0xff]   ;;  %v3993_v24 = vld [vmem:[%s4404_s5 + $0x50] sm:$0xff]  }
0x1b2a   :  { %v1138_v25 = vsel %vm1137_vm4, %v1133_v40, inf  ;;  %v4000_v40 = vld [vmem:[%s4404_s5 + $0x58] sm:$0xff]  }
0x1b2b   :  { %1139 = vmin.xlane.f32.xlu1 %v1138_v25  ;;  %v1143_v33 = vshll.u32 %v1142_v28, 16 }
0x1bb8   :  { %v1140_v32 = vpop.xlane.xlu1 %1139 }
0x1bb9   :  { %v1141_v34 = vcvt.f32.s32 %v1140_v32 }
0x1bbb   :  { %v1144_v35 = vadd.s32 %v1143_v33, %v1141_v34 }
0x1bbd   :  { %vm1145_vm6 = vcmp.eq.s32.totalorder %v3539_v17, %v1144_v35 }
0x1bbe   :  { %vm3345_vm8 = vmpackc.low %vm1145_vm6, %vm1145_vm6 }
0x1bbf   :  { %3346 = vmatmul.mubr.msk.bf16.vlgmr.msra.gmra.mrb[12].mxu0 %vm3345_vm8, %v3382_v21 }
0x1bc0   :  { %3002 = vmatpush3.bf16.msra.mxu0 %v3665_v27  ;;  %3009 = vmatprep.mubr.msk.bf16.mxu0 %vm3384_vm5, %v3381_v4 }
0x1bc1   :  { %3003 = vmatprep.subr.bf16.mxu0 %v3381_v4 }
0x1bc4   :  { %3004 = vmatpush3.bf16.msra.mxu0 %v3675_v29 }
0x1bc5   :  { %3005 = vmatprep.subr.bf16.mxu0 %v3381_v4 }
0x1bc8   :  { %3006 = vmatpush3.bf16.msra.mxu0 %v3682_v30 }
0x1bc9   :  { %3007 = vmatprep.subr.bf16.mxu0 %v3381_v4 }
0x1bcc   :  { %3008 = vmatpush3.bf16.msra.mxu0 %v3688_v31 }
0x1bcd   :  { %3021 = vmatprep.subr.bf16.mxu0 %v3381_v4 }
0x1c92   :  { %v1190_v44 = vpop.f32.mrb[12].mxu0 }
0x1c93   :  { %v1191_v27 = vadd.f32 %v3572_v22, %v1190_v44  ;;  %v1192_v36 = vpop.f32.mrb[13].mxu0 }
0x1c94   :  { %v1193_v37 = vpop.f32.mrb[14].mxu0  ;;  %v4020_v36 = vld [vmem:[%s4402_s3 + $0x8] sm:$0xff]  }
0x1c95   :  { %3250 = vtanh.f32 %v1191_v27  ;;  %v1194_v41 = vpop.f32.mrb[15].mxu0  ;;  %v2675_v29 = vmul.f32 -1.442695, %v1191_v27  ;;  %v4011_v27 = vld [vmem:[%s4402_s3] sm:$0xff]  }
0x1c97   :  { %3252 = vpow2.f32 %v2675_v29 }
0x1c9f   :  { %v3251_v43 = vpop.eup %3250 }
0x1ca0   :  { %1205 = vrot.lane.b32.xlu1 %v3251_v43, %s3383_s22 }
0x1ca1   :  { %v3253_v46 = vpop.eup %3252 }
0x1ca2   :  { %v1199_v30 = vadd.f32 1.0, %v3253_v46 }
0x1ca4   :  { %3254 = vrcp.f32 %v1199_v30 }
0x1cae   :  { %v3255_v48 = vpop.eup %3254 }
0x1caf   :  { %v1203_v51 = vmul.f32 %v3255_v48, %v3822_v26 }
0x1d12   :  { %v1206_v50 = vpop.permute.xlu1 %1205 }
0x1d13   :  { %v1208_v31 = vmul.f32 %v3255_v48, %v1206_v50 }
0x1d15   :  { %1210 = vrot.lane.b32.xlu0 %v1208_v31, %s3379_s17 }
0x1d87   :  { %v1211_v22 = vpop.permute.xlu0 %1210 }
0x1d88   :  { %v3890_v52 = vadd.f32 %v1211_v22, %v1203_v51 }
0x1d8a   :  { %3256 = vtanh.f32 %v3890_v52 }
0x1d94   :  { %v3257_v38 = vpop.eup %3256 }
0x1d95   :  { %1216 = vrot.lane.b32.xlu0 %v3257_v38, %s3383_s22 }
0x1e07   :  { %v1217_v53 = vpop.permute.xlu0 %1216 }
0x1e08   :  { %v1219_v54 = vmul.f32 %v3255_v48, %v1217_v53 }
0x1e0a   :  { %v1220_v56 = vpack.c.bf16 %v1219_v54, %v1219_v54 }
0x1e0c   :  { %1222 = vrot.lane.b32.xlu0 %v1220_v56, %s3379_s17 }
0x1e7e   :  { %v1223_v57 = vpop.permute.xlu0 %1222 }
0x1e7f   :  { %2976 = vmatmul.mubr.msk.bf16.vlgmr.msra.gmra.mrb[48].mxu1 %vm43_vm0, %v1223_v57 }
0x1e80   :  { %2980 = vmatpush3.bf16.msra.mxu1 %v3601_v45  ;;  %2985 = vmatprep.mubr.msk.bf16.mxu1 %vm3384_vm5, %v3381_v4 }
0x1e81   :  { %2981 = vmatprep.subr.bf16.mxu1 %v3381_v4 }
0x1e84   :  { %2982 = vmatpush3.bf16.msra.mxu1 %v3608_v47 }
0x1e85   :  { %2983 = vmatprep.subr.bf16.mxu1 %v3381_v4 }
0x1e88   :  { %2984 = vmatpush3.bf16.msra.mxu1 %v3618_v49 }
0x1e89   :  { %2989 = vmatprep.subr.bf16.mxu1 %v3381_v4 }
0x1f52   :  { %v1261_v26 = vpop.f32.mrb[48].mxu1 }
0x1f53   :  { %v1267_v58 = vpack.c.bf16 %v1261_v26, %v1261_v26  ;;  %v2977_v59 = vpop.f32.mrb[49].mxu1 }
0x1f54   :  { %v1264_v60 = vpop.f32.mrb[50].mxu1  ;;  %v4042_v59 = vld [vmem:[%s4406_s7 + $0x8] sm:$0xff]  }
0x1f55   :  { %v2978_v61 = vpop.f32.mrb[51].mxu1  ;;  %2986 = vmatmul.mubr.msk.bf16.vlgmr.msra.gmra.mrb[52].mxu1 %vm340_vm7, %v1267_v58  ;;  %v4033_v58 = vld [vmem:[%s4406_s7] sm:$0xff]  }
0x1f56   :  { %2990 = vmatpush3.bf16.msra.mxu1 %v3637_v18  ;;  %2997 = vmatprep.mubr.msk.bf16.mxu1 %vm3384_vm5, %v3381_v4  ;;  %v4049_v61 = vld [vmem:[%s4405_s6] ss:$0 sm:$0xff] }
0x1f57   :  { %2991 = vmatprep.subr.bf16.mxu1 %v3381_v4 }
0x1f5a   :  { %2992 = vmatpush3.bf16.msra.mxu1 %v3644_v19 }
0x1f5b   :  { %2993 = vmatprep.subr.bf16.mxu1 %v3381_v4 }
0x1f5e   :  { %2994 = vmatpush3.bf16.msra.mxu1 %v3651_v20 }
0x1f5f   :  { %2995 = vmatprep.subr.bf16.mxu1 %v3381_v4 }
0x1f62   :  { %2996 = vmatpush3.bf16.msra.mxu1 %v3658_v23 }
0x1f63   :  { %1448 = vmatprep.subr.bf16.mxu1 %v3380_v2 }
0x2028   :  { %v1305_v45 = vpop.f32.mrb[52].mxu1 }
0x2029   :  { %v1306_v47 = vadd.f32 %v1305_v45, %v3628_v55  ;;  %v2987_v18 = vpop.f32.mrb[53].mxu1 }
0x202a   :  { %v1308_v62 = vpop.f32.mrb[54].mxu1 }
0x202b   :  { %v2988_v63 = vpop.f32.mrb[55].mxu1  ;;  %v1311_v0 = vsel %vm193_vm3, %v1306_v47, -inf }
0x202c   :  { %1312 = vmax.xlane.f32.xlu0 %v1311_v0 }
0x2042   :  { %1368 = vrot.lane.b32.xlu0 %v1219_v54, %s3383_s22 }
0x20b9   :  { %v1313_v19 = vpop.xlane.xlu0 %1312 }
0x20ba   :  { %v1314_v8 = vsub.f32 %v1306_v47, %v1313_v19 }
0x20bc   :  { %v1315_v20 = vmul.f32 1.442695, %v1314_v8 }
0x20bd   :  { %v1369_v28 = vpop.permute.xlu0 %1368 }
0x20be   :  { %3258 = vpow2.f32 %v1315_v20 }
0x20c8   :  { %v3259_v16 = vpop.eup %3258 }
0x20c9   :  { %v1317_v23 = vsel %vm193_vm3, %v3259_v16, 0.0 }
0x20ca   :  { %1318 = vadd.xlane.f32.xlu1 %v1317_v23 }
0x2157   :  { %v1319_v1 = vpop.xlane.xlu1 %1318 }
0x2158   :  { %3260 = vrcp.f32 %v1319_v1 }
0x2162   :  { %v3261_v3 = vpop.eup %3260 }
0x2163   :  { %v1321_v55 = vmul.f32 %v3261_v3, %v3259_v16 }
0x2165   :  { %v1322_v5 = vpack.c.bf16 %v1321_v55, %v1321_v55 }
0x2167   :  { %2998 = vmatmul.mubr.msk.bf16.vlgmr.msra.gmra.mrb[56].mxu1 %vm193_vm3, %v1322_v5 }
0x2168   :  { %1449 = vmatpush1.bf16.msra.mxu1 %v3923_v6 }
0x2169   :  { %1450 = vmatprep.subr.bf16.mxu1 %v3380_v2 }
0x216c   :  { %1451 = vmatpush1.bf16.msra.mxu1 %v3930_v7 }
0x216d   :  { %1452 = vmatprep.subr.bf16.mxu1 %v3380_v2 }
0x2170   :  { %1453 = vmatpush1.bf16.msra.mxu1 %v3937_v9 }
0x2171   :  { %1454 = vmatprep.subr.bf16.mxu1 %v3380_v2 }
0x2174   :  { %1455 = vmatpush1.bf16.msra.mxu1 %v3944_v10 }
0x2175   :  { %1456 = vmatprep.subr.bf16.mxu1 %v3380_v2 }
0x2178   :  { %1457 = vmatpush1.bf16.msra.mxu1 %v3951_v11 }
0x2179   :  { %1458 = vmatprep.subr.bf16.mxu1 %v3380_v2 }
0x217c   :  { %1459 = vmatpush1.bf16.msra.mxu1 %v3958_v12 }
0x217d   :  { %1460 = vmatprep.subr.bf16.mxu1 %v3380_v2 }
0x2180   :  { %1461 = vmatpush1.bf16.msra.mxu1 %v3965_v39 }
0x2181   :  { %1462 = vmatprep.subr.bf16.mxu1 %v3380_v2 }
0x2184   :  { %1463 = vmatpush1.bf16.msra.mxu1 %v3972_v13 }
0x2185   :  { %1464 = vmatprep.subr.bf16.mxu1 %v3380_v2 }
0x2188   :  { %1465 = vmatpush1.bf16.msra.mxu1 %v3979_v14 }
0x2189   :  { %1466 = vmatprep.subr.bf16.mxu1 %v3380_v2 }
0x218c   :  { %1467 = vmatpush1.bf16.msra.mxu1 %v3986_v15 }
0x218d   :  { %1468 = vmatprep.subr.bf16.mxu1 %v3380_v2 }
0x2190   :  { %1469 = vmatpush1.bf16.msra.mxu1 %v3993_v24 }
0x2191   :  { %1470 = vmatprep.subr.bf16.mxu1 %v3380_v2 }
0x2194   :  { %1471 = vmatpush1.bf16.msra.mxu1 %v4000_v40 }
0x2195   :  { %3013 = vmatprep.subr.bf16.mxu1 %v3381_v4 }
0x223a   :  { %v1360_v25 = vpop.f32.mrb[56].mxu1 }
0x223b   :  { %1366 = vst.msk [vmem:[#allocation2 + $0x8] sm:$0xff] %vm43_vm0, %v1360_v25  ;;  %v2999_v32 = vpop.f32.mrb[57].mxu1 }
0x223c   :  { %1371 = vst.msk [vmem:[#allocation2 + $0x8] sm:$0xff] %vm50_vm1, %v1369_v28  ;;  %v1363_v33 = vpop.f32.mrb[58].mxu1 }
0x223d   :  { %v3000_v34 = vpop.f32.mrb[59].mxu1 }
0x223e   :  { %v4073_v34 = vld [vmem:[%s4407_s8 + $0x8] sm:$0xff]  }
0x2243   :  { %v1372_v35 = vld [vmem:[#allocation2 + $0x8] sm:$0xff] }
0x2244   :  { %v1373_v44 = vpack.c.bf16 %v1372_v35, %v1372_v35  ;;  %v4080_v35 = vld [vmem:[%s4407_s8 + $0x10] sm:$0xff]  }
0x2246   :  { %3010 = vmatmul.mubr.msk.bf16.vlgmr.msra.gmra.mrb[16].mxu0 %vm193_vm3, %v1373_v44  ;;  %2681 = vmatprep.mubr.msk.bf16.mxu1 %vm193_vm3, %v1373_v44  ;;  %v4087_v44 = vld [vmem:[%s4407_s8 + $0x18] sm:$0xff]  }
0x2247   :  { %3022 = vmatpush3.bf16.msra.mxu0 %v4011_v27  ;;  %3027 = vmatprep.mubr.msk.bf16.mxu0 %vm3384_vm5, %v3381_v4 }
0x2248   :  { %3023 = vmatprep.subr.bf16.mxu0 %v3381_v4 }
0x224b   :  { %3024 = vmatpush3.bf16.msra.mxu0 %v4020_v36 }
0x224c   :  { %3025 = vmatprep.subr.bf16.mxu0 %v3381_v4 }
0x224f   :  { %3026 = vmatpush3.bf16.msra.mxu0 %v3618_v49 }
0x2250   :  { %3031 = vmatprep.subr.bf16.mxu0 %v3381_v4 }
0x2319   :  { %v1411_v37 = vpop.f32.mrb[16].mxu0 }
0x231a   :  { %v1412_v41 = vadd.f32 %v3706_v42, %v1411_v37  ;;  %v3011_v43 = vpop.f32.mrb[17].mxu0 }
0x231b   :  { %v1414_v29 = vpop.f32.mrb[18].mxu0 }
0x231c   :  { %1418 = vst [vmem:[#allocation3 + $0x18] sm:$0xff] %v1412_v41  ;;  %1419 = vmax.xlane.f32.xlu1 %v1412_v41  ;;  %v3012_v46 = vpop.f32.mrb[19].mxu0 }
0x23a9   :  { %v1420_v30 = vpop.xlane.xlu1 %1419 }
0x23aa   :  { %vm1421_vm9 = vcmp.ge.f32.partialorder %v1412_v41, %v1420_v30  ;;  %v4095_v30 = vld [vmem:[%s4401_s2] sm:$0xff]  }
0x23ab   :  { %v1422_v48 = vsel %vm1421_vm9, %v3539_v17, 128 }
0x23ac   :  { %v1424_v50 = vshra.s32 %v1422_v48, 16  ;;  %v1423_v51 = vand.u32 65535, %v1422_v48  ;;  %v4104_v48 = vld [vmem:[%s4401_s2 + $0x8] sm:$0xff]  }
0x23ae   :  { %v1426_v31 = vcvt.s32.f32 %v1424_v50  ;;  %v1425_v38 = vcvt.s32.f32 %v1423_v51  ;;  %v4111_v50 = vld [vmem:[%s4401_s2 + $0x10] sm:$0xff]  }
0x23b0   :  { %1427 = vmin.xlane.f32.xlu1 %v1426_v31 }
0x243d   :  { %v1428_v22 = vpop.xlane.xlu1 %1427 }
0x243e   :  { %vm1429_vm10 = vcmp.eq.f32.partialorder %v1426_v31, %v1428_v22  ;;  %v1434_v54 = vcvt.f32.s32 %v1428_v22  ;;  %v4118_v31 = vld [vmem:[%s4401_s2 + $0x18] sm:$0xff]   ;;  %v4125_v22 = vld [vmem:[%s4403_s4] sm:$0xff] }
0x243f   :  { %v1430_v53 = vsel %vm1429_vm10, %v1425_v38, inf }
0x2440   :  { %1431 = vmin.xlane.f32.xlu1 %v1430_v53  ;;  %v1435_v56 = vshll.u32 %v1434_v54, 16 }
0x24cd   :  { %v1432_v42 = vpop.xlane.xlu1 %1431 }
0x24ce   :  { %v1433_v57 = vcvt.f32.s32 %v1432_v42 }
0x24d0   :  { %v1436_v26 = vadd.s32 %v1435_v56, %v1433_v57 }
0x24d2   :  { %vm1437_vm11 = vcmp.eq.s32.totalorder %v3539_v17, %v1436_v26 }
0x24d3   :  { %vm3347_vm12 = vmpackc.low %vm1437_vm11, %vm1437_vm11 }
0x24d4   :  { %3348 = vmatmul.mubr.msk.bf16.vlgmr.msra.gmra.mrb[60].mxu1 %vm3347_vm12, %v3382_v21 }
0x24d5   :  { %3014 = vmatpush3.bf16.msra.mxu1 %v4033_v58  ;;  %3017 = vmatprep.mubr.msk.bf16.mxu1 %vm3384_vm5, %v3381_v4 }
0x24d6   :  { %3015 = vmatprep.subr.bf16.mxu1 %v3381_v4 }
0x24d9   :  { %3016 = vmatpush3.bf16.msra.mxu1 %v4042_v59 }
0x24da   :  { %3043 = vmatprep.subr.bf16.mxu1 %v3381_v4 }
0x25a7   :  { %v1482_v60 = vpop.f32.mrb[60].mxu1 }
0x25a8   :  { %v1483_v45 = vadd.f32 %v4049_v61, %v1482_v60  ;;  %v1484_v47 = vpop.f32.mrb[61].mxu1 }
0x25a9   :  { %v1485_v18 = vpop.f32.mrb[62].mxu1 }
0x25aa   :  { %3262 = vtanh.f32 %v1483_v45  ;;  %v1486_v62 = vpop.f32.mrb[63].mxu1  ;;  %v2682_v0 = vmul.f32 -1.442695, %v1483_v45 }
0x25ac   :  { %3264 = vpow2.f32 %v2682_v0 }
0x25b4   :  { %v3263_v63 = vpop.eup %3262 }
0x25b5   :  { %1497 = vrot.lane.b32.xlu1 %v3263_v63, %s3383_s22 }
0x25b6   :  { %v3265_v19 = vpop.eup %3264 }
0x25b7   :  { %v1491_v8 = vadd.f32 1.0, %v3265_v19 }
0x25b9   :  { %3266 = vrcp.f32 %v1491_v8 }
0x25c3   :  { %v3267_v20 = vpop.eup %3266 }
0x25c4   :  { %v1495_v1 = vmul.f32 %v3267_v20, %v3890_v52  ;;  %v4064_v52 = vld [vmem:[%s4407_s8] sm:$0xff]  }
0x2627   :  { %v1498_v16 = vpop.permute.xlu1 %1497 }
0x2628   :  { %v1500_v23 = vmul.f32 %v3267_v20, %v1498_v16 }
0x262a   :  { %1502 = vrot.lane.b32.xlu0 %v1500_v23, %s3379_s17 }
0x269c   :  { %v1503_v3 = vpop.permute.xlu0 %1502 }
0x269d   :  { %v4055_v55 = vadd.f32 %v1503_v3, %v1495_v1 }
0x269f   :  { %3268 = vtanh.f32 %v4055_v55 }
0x26a9   :  { %v3269_v5 = vpop.eup %3268 }
0x26aa   :  { %1508 = vrot.lane.b32.xlu0 %v3269_v5, %s3383_s22 }
0x271c   :  { %v1509_v25 = vpop.permute.xlu0 %1508 }
0x271d   :  { %v1511_v28 = vmul.f32 %v3267_v20, %v1509_v25  ;;  %v4169_v25 = vld [vmem:[%s4408_s9] ss:$0 sm:$0xff] }
0x271f   :  { %v1512_v32 = vpack.c.bf16 %v1511_v28, %v1511_v28 }
0x2721   :  { %1514 = vrot.lane.b32.xlu0 %v1512_v32, %s3379_s17 }
0x2793   :  { %v1515_v33 = vpop.permute.xlu0 %1514 }
0x2794   :  { %3018 = vmatmul.mubr.msk.bf16.vlgmr.msra.gmra.mrb[64].mxu1 %vm43_vm0, %v1515_v33 }
0x2795   :  { %3044 = vmatpush3.bf16.msra.mxu1 %v4064_v52  ;;  %3051 = vmatprep.mubr.msk.bf16.mxu1 %vm3384_vm5, %v3381_v4 }
0x2796   :  { %3045 = vmatprep.subr.bf16.mxu1 %v3381_v4 }
0x2799   :  { %3046 = vmatpush3.bf16.msra.mxu1 %v4073_v34 }
0x279a   :  { %3047 = vmatprep.subr.bf16.mxu1 %v3381_v4 }
0x279d   :  { %3048 = vmatpush3.bf16.msra.mxu1 %v4080_v35 }
0x279e   :  { %3049 = vmatprep.subr.bf16.mxu1 %v3381_v4 }
0x27a1   :  { %3050 = vmatpush3.bf16.msra.mxu1 %v4087_v44 }
0x27a2   :  { %3055 = vmatprep.subr.bf16.mxu1 %v3381_v4 }
0x2867   :  { %v1553_v37 = vpop.f32.mrb[64].mxu1 }
0x2868   :  { %v1559_v41 = vpack.c.bf16 %v1553_v37, %v1553_v37  ;;  %v3019_v43 = vpop.f32.mrb[65].mxu1 }
0x2869   :  { %v1556_v29 = vpop.f32.mrb[66].mxu1 }
0x286a   :  { %v3020_v46 = vpop.f32.mrb[67].mxu1  ;;  %3028 = vmatmul.mubr.msk.bf16.vlgmr.msra.gmra.mrb[20].mxu0 %vm340_vm7, %v1559_v41 }
0x286b   :  { %3032 = vmatpush3.bf16.msra.mxu0 %v4095_v30  ;;  %3039 = vmatprep.mubr.msk.bf16.mxu0 %vm3384_vm5, %v3381_v4 }
0x286c   :  { %3033 = vmatprep.subr.bf16.mxu0 %v3381_v4 }
0x286f   :  { %3034 = vmatpush3.bf16.msra.mxu0 %v4104_v48 }
0x2870   :  { %3035 = vmatprep.subr.bf16.mxu0 %v3381_v4 }
0x2873   :  { %3036 = vmatpush3.bf16.msra.mxu0 %v4111_v50 }
0x2874   :  { %3037 = vmatprep.subr.bf16.mxu0 %v3381_v4 }
0x2877   :  { %3038 = vmatpush3.bf16.msra.mxu0 %v4118_v31 }
0x2878   :  { %1740 = vmatprep.subr.bf16.mxu0 %v3380_v2 }
0x293d   :  { %v1597_v51 = vpop.f32.mrb[20].mxu0 }
0x293e   :  { %v1598_v38 = vadd.f32 %v4125_v22, %v1597_v51  ;;  %v3029_v53 = vpop.f32.mrb[21].mxu0 }
0x293f   :  { %v1600_v54 = vpop.f32.mrb[22].mxu0 }
0x2940   :  { %v3030_v42 = vpop.f32.mrb[23].mxu0  ;;  %v1603_v56 = vsel %vm193_vm3, %v1598_v38, -inf }
0x2941   :  { %1604 = vmax.xlane.f32.xlu0 %v1603_v56 }
0x2957   :  { %1660 = vrot.lane.b32.xlu0 %v1511_v28, %s3383_s22 }
0x29ce   :  { %v1605_v57 = vpop.xlane.xlu0 %1604 }
0x29cf   :  { %v1606_v26 = vsub.f32 %v1598_v38, %v1605_v57 }
0x29d1   :  { %v1607_v60 = vmul.f32 1.442695, %v1606_v26 }
0x29d2   :  { %v1661_v8 = vpop.permute.xlu0 %1660 }
0x29d3   :  { %3270 = vpow2.f32 %v1607_v60 }
0x29dd   :  { %v3271_v45 = vpop.eup %3270 }
0x29de   :  { %v1609_v47 = vsel %vm193_vm3, %v3271_v45, 0.0 }
0x29df   :  { %1610 = vadd.xlane.f32.xlu1 %v1609_v47 }
0x2a6c   :  { %v1611_v18 = vpop.xlane.xlu1 %1610 }
0x2a6d   :  { %3272 = vrcp.f32 %v1611_v18 }
0x2a77   :  { %v3273_v62 = vpop.eup %3272 }
0x2a78   :  { %v1613_v63 = vmul.f32 %v3273_v62, %v3271_v45 }
0x2a7a   :  { %v1614_v0 = vpack.c.bf16 %v1613_v63, %v1613_v63 }
0x2a7c   :  { %3040 = vmatmul.mubr.msk.bf16.vlgmr.msra.gmra.mrb[24].mxu0 %vm193_vm3, %v1614_v0 }
0x2a7d   :  { %1741 = vmatpush1.bf16.msra.mxu0 %v3923_v6 }
0x2a7e   :  { %1742 = vmatprep.subr.bf16.mxu0 %v3380_v2 }
0x2a81   :  { %1743 = vmatpush1.bf16.msra.mxu0 %v3930_v7 }
0x2a82   :  { %1744 = vmatprep.subr.bf16.mxu0 %v3380_v2 }
0x2a85   :  { %1745 = vmatpush1.bf16.msra.mxu0 %v3937_v9 }
0x2a86   :  { %1746 = vmatprep.subr.bf16.mxu0 %v3380_v2 }
0x2a89   :  { %1747 = vmatpush1.bf16.msra.mxu0 %v3944_v10 }
0x2a8a   :  { %1748 = vmatprep.subr.bf16.mxu0 %v3380_v2 }
0x2a8d   :  { %1749 = vmatpush1.bf16.msra.mxu0 %v3951_v11 }
0x2a8e   :  { %1750 = vmatprep.subr.bf16.mxu0 %v3380_v2 }
0x2a91   :  { %1751 = vmatpush1.bf16.msra.mxu0 %v3958_v12 }
0x2a92   :  { %1752 = vmatprep.subr.bf16.mxu0 %v3380_v2 }
0x2a95   :  { %1753 = vmatpush1.bf16.msra.mxu0 %v3965_v39 }
0x2a96   :  { %1754 = vmatprep.subr.bf16.mxu0 %v3380_v2 }
0x2a99   :  { %1755 = vmatpush1.bf16.msra.mxu0 %v3972_v13 }
0x2a9a   :  { %1756 = vmatprep.subr.bf16.mxu0 %v3380_v2 }
0x2a9d   :  { %1757 = vmatpush1.bf16.msra.mxu0 %v3979_v14 }
0x2a9e   :  { %1758 = vmatprep.subr.bf16.mxu0 %v3380_v2 }
0x2aa1   :  { %1759 = vmatpush1.bf16.msra.mxu0 %v3986_v15 }
0x2aa2   :  { %1760 = vmatprep.subr.bf16.mxu0 %v3380_v2 }
0x2aa5   :  { %1761 = vmatpush1.bf16.msra.mxu0 %v3993_v24 }
0x2aa6   :  { %1762 = vmatprep.subr.bf16.mxu0 %v3380_v2 }
0x2aa9   :  { %1763 = vmatpush1.bf16.msra.mxu0 %v4000_v40 }
0x2aaa   :  { %3085 = vmatprep.subr.bf16.mxu0 %v3381_v4 }
0x2b4f   :  { %v1652_v19 = vpop.f32.mrb[24].mxu0 }
0x2b50   :  { %1658 = vst.msk [vmem:[#allocation2 + $0x8] sm:$0xff] %vm43_vm0, %v1652_v19  ;;  %v3041_v20 = vpop.f32.mrb[25].mxu0 }
0x2b51   :  { %1663 = vst.msk [vmem:[#allocation2 + $0x8] sm:$0xff] %vm50_vm1, %v1661_v8  ;;  %v1655_v16 = vpop.f32.mrb[26].mxu0 }
0x2b52   :  { %v3042_v23 = vpop.f32.mrb[27].mxu0 }
0x2b58   :  { %v1664_v1 = vld [vmem:[#allocation2 + $0x8] sm:$0xff] }
0x2b59   :  { %v1665_v3 = vpack.c.bf16 %v1664_v1, %v1664_v1 }
0x2b5b   :  { %3052 = vmatmul.mubr.msk.bf16.vlgmr.msra.gmra.mrb[68].mxu1 %vm193_vm3, %v1665_v3  ;;  %2688 = vmatprep.mubr.msk.bf16.mxu0 %vm193_vm3, %v1665_v3 }
0x2b5c   :  { %3056 = vmatpush3.bf16.msra.mxu1 %v4033_v58  ;;  %3059 = vmatprep.mubr.msk.bf16.mxu1 %vm3384_vm5, %v3381_v4 }
0x2b5d   :  { %3057 = vmatprep.subr.bf16.mxu1 %v3381_v4 }
0x2b60   :  { %3058 = vmatpush3.bf16.msra.mxu1 %v4042_v59 }
0x2b61   :  { %3063 = vmatprep.subr.bf16.mxu1 %v3381_v4 }
0x2c2e   :  { %v1703_v5 = vpop.f32.mrb[68].mxu1 }
0x2c2f   :  { %v1704_v28 = vadd.f32 %v4169_v25, %v1703_v5  ;;  %v3053_v32 = vpop.f32.mrb[69].mxu1 }
0x2c30   :  { %v1706_v33 = vpop.f32.mrb[70].mxu1 }
0x2c31   :  { %1710 = vst [vmem:[#allocation3 + $0x20] sm:$0xff] %v1704_v28  ;;  %1711 = vmax.xlane.f32.xlu1 %v1704_v28  ;;  %v3054_v37 = vpop.f32.mrb[71].mxu1 }
0x2cbe   :  { %v1712_v41 = vpop.xlane.xlu1 %1711 }
0x2cbf   :  { %vm1713_vm13 = vcmp.ge.f32.partialorder %v1704_v28, %v1712_v41 }
0x2cc0   :  { %v1714_v43 = vsel %vm1713_vm13, %v3539_v17, 128 }
0x2cc1   :  { %v1716_v29 = vshra.s32 %v1714_v43, 16  ;;  %v1715_v51 = vand.u32 65535, %v1714_v43 }
0x2cc3   :  { %v1718_v46 = vcvt.s32.f32 %v1716_v29  ;;  %v1717_v53 = vcvt.s32.f32 %v1715_v51 }
0x2cc5   :  { %1719 = vmin.xlane.f32.xlu1 %v1718_v46 }
0x2d52   :  { %v1720_v38 = vpop.xlane.xlu1 %1719 }
0x2d53   :  { %vm1721_vm14 = vcmp.eq.f32.partialorder %v1718_v46, %v1720_v38  ;;  %v1726_v42 = vcvt.f32.s32 %v1720_v38 }
0x2d54   :  { %v1722_v54 = vsel %vm1721_vm14, %v1717_v53, inf }
0x2d55   :  { %1723 = vmin.xlane.f32.xlu1 %v1722_v54  ;;  %v1727_v57 = vshll.u32 %v1726_v42, 16 }
0x2de2   :  { %v1724_v56 = vpop.xlane.xlu1 %1723 }
0x2de3   :  { %v1725_v26 = vcvt.f32.s32 %v1724_v56 }
0x2de5   :  { %v1728_v60 = vadd.s32 %v1727_v57, %v1725_v26 }
0x2de7   :  { %vm1729_vm15 = vcmp.eq.s32.totalorder %v3539_v17, %v1728_v60 }
0x2de8   :  { %vm3349_vm2 = vmpackc.low %vm1729_vm15, %vm1729_vm15 }
0x2de9   :  { %3350 = vmatmul.mubr.msk.bf16.vlgmr.msra.gmra.mrb[28].mxu0 %vm3349_vm2, %v3382_v21 }
0x2dea   :  { %3086 = vmatpush3.bf16.msra.mxu0 %v4064_v52  ;;  %3093 = vmatprep.mubr.msk.bf16.mxu0 %vm3384_vm5, %v3381_v4 }
0x2deb   :  { %3087 = vmatprep.subr.bf16.mxu0 %v3381_v4 }
0x2dee   :  { %3088 = vmatpush3.bf16.msra.mxu0 %v4073_v34 }
0x2def   :  { %3089 = vmatprep.subr.bf16.mxu0 %v3381_v4 }
0x2df2   :  { %3090 = vmatpush3.bf16.msra.mxu0 %v4080_v35 }
0x2df3   :  { %3091 = vmatprep.subr.bf16.mxu0 %v3381_v4 }
0x2df6   :  { %3092 = vmatpush3.bf16.msra.mxu0 %v4087_v44 }
0x2df7   :  { %3097 = vmatprep.subr.bf16.mxu0 %v3381_v4 }
0x2ebc   :  { %v1774_v45 = vpop.f32.mrb[28].mxu0 }
0x2ebd   :  { %v1775_v47 = vadd.f32 %v4049_v61, %v1774_v45  ;;  %v1776_v18 = vpop.f32.mrb[29].mxu0 }
0x2ebe   :  { %v1777_v62 = vpop.f32.mrb[30].mxu0 }
0x2ebf   :  { %3274 = vtanh.f32 %v1775_v47  ;;  %v1778_v63 = vpop.f32.mrb[31].mxu0  ;;  %v2689_v19 = vmul.f32 -1.442695, %v1775_v47 }
0x2ec1   :  { %3276 = vpow2.f32 %v2689_v19 }
0x2ec9   :  { %v3275_v0 = vpop.eup %3274 }
0x2eca   :  { %1789 = vrot.lane.b32.xlu1 %v3275_v0, %s3383_s22 }
0x2ecb   :  { %v3277_v8 = vpop.eup %3276 }
0x2ecc   :  { %v1783_v20 = vadd.f32 1.0, %v3277_v8 }
0x2ece   :  { %3278 = vrcp.f32 %v1783_v20 }
0x2ed8   :  { %v3279_v16 = vpop.eup %3278 }
0x2ed9   :  { %v1787_v3 = vmul.f32 %v3279_v16, %v4055_v55 }
0x2f3c   :  { %v1790_v23 = vpop.permute.xlu1 %1789 }
0x2f3d   :  { %v1792_v1 = vmul.f32 %v3279_v16, %v1790_v23 }
0x2f3f   :  { %1794 = vrot.lane.b32.xlu0 %v1792_v1, %s3379_s17 }
0x2fb1   :  { %v1795_v5 = vpop.permute.xlu0 %1794 }
0x2fb2   :  { %v4189_v28 = vadd.f32 %v1795_v5, %v1787_v3 }
0x2fb4   :  { %3280 = vtanh.f32 %v4189_v28 }
0x2fbe   :  { %v3281_v32 = vpop.eup %3280 }
0x2fbf   :  { %1800 = vrot.lane.b32.xlu0 %v3281_v32, %s3383_s22 }
0x3031   :  { %v1801_v33 = vpop.permute.xlu0 %1800 }
0x3032   :  { %v1803_v37 = vmul.f32 %v3279_v16, %v1801_v33 }
0x3034   :  { %v1804_v41 = vpack.c.bf16 %v1803_v37, %v1803_v37 }
0x3036   :  { %1806 = vrot.lane.b32.xlu0 %v1804_v41, %s3379_s17 }
0x30a8   :  { %v1807_v43 = vpop.permute.xlu0 %1806 }
0x30a9   :  { %3060 = vmatmul.mubr.msk.bf16.vlgmr.msra.gmra.mrb[72].mxu1 %vm43_vm0, %v1807_v43 }
0x30aa   :  { %3064 = vmatpush3.bf16.msra.mxu1 %v4011_v27  ;;  %3069 = vmatprep.mubr.msk.bf16.mxu1 %vm3384_vm5, %v3381_v4 }
0x30ab   :  { %3065 = vmatprep.subr.bf16.mxu1 %v3381_v4 }
0x30ae   :  { %3066 = vmatpush3.bf16.msra.mxu1 %v4020_v36 }
0x30af   :  { %3067 = vmatprep.subr.bf16.mxu1 %v3381_v4 }
0x30b2   :  { %3068 = vmatpush3.bf16.msra.mxu1 %v3618_v49 }
0x30b3   :  { %3073 = vmatprep.subr.bf16.mxu1 %v3381_v4 }
0x317c   :  { %v1845_v55 = vpop.f32.mrb[72].mxu1 }
0x317d   :  { %v1851_v29 = vpack.c.bf16 %v1845_v55, %v1845_v55  ;;  %v3061_v46 = vpop.f32.mrb[73].mxu1 }
0x317e   :  { %v1848_v51 = vpop.f32.mrb[74].mxu1 }
0x317f   :  { %v3062_v38 = vpop.f32.mrb[75].mxu1  ;;  %3070 = vmatmul.mubr.msk.bf16.vlgmr.msra.gmra.mrb[76].mxu1 %vm340_vm7, %v1851_v29 }
0x3180   :  { %3074 = vmatpush3.bf16.msra.mxu1 %v4095_v30  ;;  %3081 = vmatprep.mubr.msk.bf16.mxu1 %vm3384_vm5, %v3381_v4 }
0x3181   :  { %3075 = vmatprep.subr.bf16.mxu1 %v3381_v4 }
0x3184   :  { %3076 = vmatpush3.bf16.msra.mxu1 %v4104_v48 }
0x3185   :  { %3077 = vmatprep.subr.bf16.mxu1 %v3381_v4 }
0x3188   :  { %3078 = vmatpush3.bf16.msra.mxu1 %v4111_v50 }
0x3189   :  { %3079 = vmatprep.subr.bf16.mxu1 %v3381_v4 }
0x318c   :  { %3080 = vmatpush3.bf16.msra.mxu1 %v4118_v31 }
0x318d   :  { %2032 = vmatprep.subr.bf16.mxu1 %v3380_v2 }
0x3252   :  { %v1889_v53 = vpop.f32.mrb[76].mxu1 }
0x3253   :  { %v1890_v54 = vadd.f32 %v4125_v22, %v1889_v53  ;;  %v3071_v42 = vpop.f32.mrb[77].mxu1 }
0x3254   :  { %v1892_v56 = vpop.f32.mrb[78].mxu1 }
0x3255   :  { %v3072_v57 = vpop.f32.mrb[79].mxu1  ;;  %v1895_v26 = vsel %vm193_vm3, %v1890_v54, -inf }
0x3256   :  { %1896 = vmax.xlane.f32.xlu0 %v1895_v26 }
0x326c   :  { %1952 = vrot.lane.b32.xlu0 %v1803_v37, %s3383_s22 }
0x32e3   :  { %v1897_v60 = vpop.xlane.xlu0 %1896 }
0x32e4   :  { %v1898_v45 = vsub.f32 %v1890_v54, %v1897_v60 }
0x32e6   :  { %v1899_v47 = vmul.f32 1.442695, %v1898_v45 }
0x32e7   :  { %v1953_v16 = vpop.permute.xlu0 %1952 }
0x32e8   :  { %3282 = vpow2.f32 %v1899_v47 }
0x32f2   :  { %v3283_v18 = vpop.eup %3282 }
0x32f3   :  { %v1901_v62 = vsel %vm193_vm3, %v3283_v18, 0.0 }
0x32f4   :  { %1902 = vadd.xlane.f32.xlu1 %v1901_v62 }
0x3381   :  { %v1903_v63 = vpop.xlane.xlu1 %1902 }
0x3382   :  { %3284 = vrcp.f32 %v1903_v63 }
0x338c   :  { %v3285_v0 = vpop.eup %3284 }
0x338d   :  { %v1905_v19 = vmul.f32 %v3285_v0, %v3283_v18 }
0x338f   :  { %v1906_v8 = vpack.c.bf16 %v1905_v19, %v1905_v19 }
0x3391   :  { %3082 = vmatmul.mubr.msk.bf16.vlgmr.msra.gmra.mrb[80].mxu1 %vm193_vm3, %v1906_v8 }
0x3392   :  { %2033 = vmatpush1.bf16.msra.mxu1 %v3923_v6 }
0x3393   :  { %2034 = vmatprep.subr.bf16.mxu1 %v3380_v2 }
0x3396   :  { %2035 = vmatpush1.bf16.msra.mxu1 %v3930_v7 }
0x3397   :  { %2036 = vmatprep.subr.bf16.mxu1 %v3380_v2 }
0x339a   :  { %2037 = vmatpush1.bf16.msra.mxu1 %v3937_v9 }
0x339b   :  { %2038 = vmatprep.subr.bf16.mxu1 %v3380_v2 }
0x339e   :  { %2039 = vmatpush1.bf16.msra.mxu1 %v3944_v10 }
0x339f   :  { %2040 = vmatprep.subr.bf16.mxu1 %v3380_v2 }
0x33a2   :  { %2041 = vmatpush1.bf16.msra.mxu1 %v3951_v11 }
0x33a3   :  { %2042 = vmatprep.subr.bf16.mxu1 %v3380_v2 }
0x33a6   :  { %2043 = vmatpush1.bf16.msra.mxu1 %v3958_v12 }
0x33a7   :  { %2044 = vmatprep.subr.bf16.mxu1 %v3380_v2 }
0x33aa   :  { %2045 = vmatpush1.bf16.msra.mxu1 %v3965_v39 }
0x33ab   :  { %2046 = vmatprep.subr.bf16.mxu1 %v3380_v2 }
0x33ae   :  { %2047 = vmatpush1.bf16.msra.mxu1 %v3972_v13 }
0x33af   :  { %2048 = vmatprep.subr.bf16.mxu1 %v3380_v2 }
0x33b2   :  { %2049 = vmatpush1.bf16.msra.mxu1 %v3979_v14 }
0x33b3   :  { %2050 = vmatprep.subr.bf16.mxu1 %v3380_v2 }
0x33b6   :  { %2051 = vmatpush1.bf16.msra.mxu1 %v3986_v15 }
0x33b7   :  { %2052 = vmatprep.subr.bf16.mxu1 %v3380_v2 }
0x33ba   :  { %2053 = vmatpush1.bf16.msra.mxu1 %v3993_v24 }
0x33bb   :  { %2054 = vmatprep.subr.bf16.mxu1 %v3380_v2 }
0x33be   :  { %2055 = vmatpush1.bf16.msra.mxu1 %v4000_v40 }
0x33bf   :  { %3127 = vmatprep.subr.bf16.mxu1 %v3381_v4 }
0x3464   :  { %v1944_v20 = vpop.f32.mrb[80].mxu1 }
0x3465   :  { %1950 = vst.msk [vmem:[#allocation2 + $0x8] sm:$0xff] %vm43_vm0, %v1944_v20  ;;  %v3083_v23 = vpop.f32.mrb[81].mxu1 }
0x3466   :  { %1955 = vst.msk [vmem:[#allocation2 + $0x8] sm:$0xff] %vm50_vm1, %v1953_v16  ;;  %v1947_v1 = vpop.f32.mrb[82].mxu1 }
0x3467   :  { %v3084_v3 = vpop.f32.mrb[83].mxu1 }
0x346d   :  { %v1956_v5 = vld [vmem:[#allocation2 + $0x8] sm:$0xff] }
0x346e   :  { %v1957_v32 = vpack.c.bf16 %v1956_v5, %v1956_v5 }
0x3470   :  { %3094 = vmatmul.mubr.msk.bf16.vlgmr.msra.gmra.mrb[32].mxu0 %vm193_vm3, %v1957_v32  ;;  %2695 = vmatprep.mubr.msk.bf16.mxu1 %vm193_vm3, %v1957_v32 }
0x3471   :  { %3098 = vmatpush3.bf16.msra.mxu0 %v4033_v58  ;;  %3101 = vmatprep.mubr.msk.bf16.mxu0 %vm3384_vm5, %v3381_v4 }
0x3472   :  { %3099 = vmatprep.subr.bf16.mxu0 %v3381_v4 }
0x3475   :  { %3100 = vmatpush3.bf16.msra.mxu0 %v4042_v59 }
0x3476   :  { %3105 = vmatprep.subr.bf16.mxu0 %v3381_v4 }
0x3543   :  { %v1995_v33 = vpop.f32.mrb[32].mxu0 }
0x3544   :  { %v1996_v37 = vadd.f32 %v4169_v25, %v1995_v33  ;;  %v3095_v41 = vpop.f32.mrb[33].mxu0 }
0x3545   :  { %v1998_v43 = vpop.f32.mrb[34].mxu0 }
0x3546   :  { %2002 = vst [vmem:[#allocation3 + $0x28] sm:$0xff] %v1996_v37  ;;  %2003 = vmax.xlane.f32.xlu1 %v1996_v37  ;;  %v3096_v55 = vpop.f32.mrb[35].mxu0 }
0x35d3   :  { %v2004_v29 = vpop.xlane.xlu1 %2003 }
0x35d4   :  { %vm2005_vm4 = vcmp.ge.f32.partialorder %v1996_v37, %v2004_v29 }
0x35d5   :  { %v2006_v46 = vsel %vm2005_vm4, %v3539_v17, 128 }
0x35d6   :  { %v2008_v51 = vshra.s32 %v2006_v46, 16  ;;  %v2007_v53 = vand.u32 65535, %v2006_v46 }
0x35d8   :  { %v2010_v38 = vcvt.s32.f32 %v2008_v51  ;;  %v2009_v42 = vcvt.s32.f32 %v2007_v53 }
0x35da   :  { %2011 = vmin.xlane.f32.xlu1 %v2010_v38 }
0x3667   :  { %v2012_v54 = vpop.xlane.xlu1 %2011 }
0x3668   :  { %vm2013_vm6 = vcmp.eq.f32.partialorder %v2010_v38, %v2012_v54  ;;  %v2018_v57 = vcvt.f32.s32 %v2012_v54 }
0x3669   :  { %v2014_v56 = vsel %vm2013_vm6, %v2009_v42, inf }
0x366a   :  { %2015 = vmin.xlane.f32.xlu1 %v2014_v56  ;;  %v2019_v60 = vshll.u32 %v2018_v57, 16 }
0x36f7   :  { %v2016_v26 = vpop.xlane.xlu1 %2015 }
0x36f8   :  { %v2017_v45 = vcvt.f32.s32 %v2016_v26 }
0x36fa   :  { %v2020_v47 = vadd.s32 %v2019_v60, %v2017_v45 }
0x36fc   :  { %vm2021_vm8 = vcmp.eq.s32.totalorder %v3539_v17, %v2020_v47 }
0x36fd   :  { %vm3351_vm9 = vmpackc.low %vm2021_vm8, %vm2021_vm8 }
0x36fe   :  { %3352 = vmatmul.mubr.msk.bf16.vlgmr.msra.gmra.mrb[84].mxu1 %vm3351_vm9, %v3382_v21 }
0x36ff   :  { %3128 = vmatpush3.bf16.msra.mxu1 %v4064_v52  ;;  %3135 = vmatprep.mubr.msk.bf16.mxu1 %vm3384_vm5, %v3381_v4 }
0x3700   :  { %3129 = vmatprep.subr.bf16.mxu1 %v3381_v4 }
0x3703   :  { %3130 = vmatpush3.bf16.msra.mxu1 %v4073_v34 }
0x3704   :  { %3131 = vmatprep.subr.bf16.mxu1 %v3381_v4 }
0x3707   :  { %3132 = vmatpush3.bf16.msra.mxu1 %v4080_v35 }
0x3708   :  { %3133 = vmatprep.subr.bf16.mxu1 %v3381_v4 }
0x370b   :  { %3134 = vmatpush3.bf16.msra.mxu1 %v4087_v44 }
0x370c   :  { %3139 = vmatprep.subr.bf16.mxu1 %v3381_v4 }
0x37d1   :  { %v2066_v18 = vpop.f32.mrb[84].mxu1 }
0x37d2   :  { %v2067_v62 = vadd.f32 %v4049_v61, %v2066_v18  ;;  %v2068_v63 = vpop.f32.mrb[85].mxu1 }
0x37d3   :  { %v2069_v0 = vpop.f32.mrb[86].mxu1 }
0x37d4   :  { %3286 = vtanh.f32 %v2067_v62  ;;  %v2070_v19 = vpop.f32.mrb[87].mxu1  ;;  %v2696_v20 = vmul.f32 -1.442695, %v2067_v62 }
0x37d6   :  { %3288 = vpow2.f32 %v2696_v20 }
0x37de   :  { %v3287_v8 = vpop.eup %3286 }
0x37df   :  { %2081 = vrot.lane.b32.xlu1 %v3287_v8, %s3383_s22 }
0x37e0   :  { %v3289_v16 = vpop.eup %3288 }
0x37e1   :  { %v2075_v23 = vadd.f32 1.0, %v3289_v16 }
0x37e3   :  { %3290 = vrcp.f32 %v2075_v23 }
0x37ed   :  { %v3291_v1 = vpop.eup %3290 }
0x37ee   :  { %v2079_v32 = vmul.f32 %v3291_v1, %v4189_v28 }
0x3851   :  { %v2082_v3 = vpop.permute.xlu1 %2081 }
0x3852   :  { %v2084_v5 = vmul.f32 %v3291_v1, %v2082_v3 }
0x3854   :  { %2086 = vrot.lane.b32.xlu0 %v2084_v5, %s3379_s17 }
0x38c6   :  { %v2087_v33 = vpop.permute.xlu0 %2086 }
0x38c7   :  { %v4271_v37 = vadd.f32 %v2087_v33, %v2079_v32 }
0x38c9   :  { %3292 = vtanh.f32 %v4271_v37 }
0x38d3   :  { %v3293_v41 = vpop.eup %3292 }
0x38d4   :  { %2092 = vrot.lane.b32.xlu0 %v3293_v41, %s3383_s22 }
0x3946   :  { %v2093_v43 = vpop.permute.xlu0 %2092 }
0x3947   :  { %v2095_v55 = vmul.f32 %v3291_v1, %v2093_v43 }
0x3949   :  { %v2096_v29 = vpack.c.bf16 %v2095_v55, %v2095_v55 }
0x394b   :  { %2098 = vrot.lane.b32.xlu0 %v2096_v29, %s3379_s17 }
0x39bd   :  { %v2099_v46 = vpop.permute.xlu0 %2098 }
0x39be   :  { %3102 = vmatmul.mubr.msk.bf16.vlgmr.msra.gmra.mrb[36].mxu0 %vm43_vm0, %v2099_v46 }
0x39bf   :  { %3106 = vmatpush3.bf16.msra.mxu0 %v4011_v27  ;;  %3111 = vmatprep.mubr.msk.bf16.mxu0 %vm3384_vm5, %v3381_v4 }
0x39c0   :  { %3107 = vmatprep.subr.bf16.mxu0 %v3381_v4 }
0x39c3   :  { %3108 = vmatpush3.bf16.msra.mxu0 %v4020_v36 }
0x39c4   :  { %3109 = vmatprep.subr.bf16.mxu0 %v3381_v4 }
0x39c7   :  { %3110 = vmatpush3.bf16.msra.mxu0 %v3618_v49 }
0x39c8   :  { %3115 = vmatprep.subr.bf16.mxu0 %v3381_v4 }
0x3a91   :  { %v2137_v28 = vpop.f32.mrb[36].mxu0 }
0x3a92   :  { %v2143_v51 = vpack.c.bf16 %v2137_v28, %v2137_v28  ;;  %v3103_v38 = vpop.f32.mrb[37].mxu0 }
0x3a93   :  { %v2140_v53 = vpop.f32.mrb[38].mxu0 }
0x3a94   :  { %v3104_v54 = vpop.f32.mrb[39].mxu0  ;;  %3112 = vmatmul.mubr.msk.bf16.vlgmr.msra.gmra.mrb[40].mxu0 %vm340_vm7, %v2143_v51 }
0x3a95   :  { %3116 = vmatpush3.bf16.msra.mxu0 %v4095_v30  ;;  %3123 = vmatprep.mubr.msk.bf16.mxu0 %vm3384_vm5, %v3381_v4 }
0x3a96   :  { %3117 = vmatprep.subr.bf16.mxu0 %v3381_v4 }
0x3a99   :  { %3118 = vmatpush3.bf16.msra.mxu0 %v4104_v48 }
0x3a9a   :  { %3119 = vmatprep.subr.bf16.mxu0 %v3381_v4 }
0x3a9d   :  { %3120 = vmatpush3.bf16.msra.mxu0 %v4111_v50 }
0x3a9e   :  { %3121 = vmatprep.subr.bf16.mxu0 %v3381_v4 }
0x3aa1   :  { %3122 = vmatpush3.bf16.msra.mxu0 %v4118_v31 }
0x3aa2   :  { %2324 = vmatprep.subr.bf16.mxu0 %v3380_v2 }
0x3b67   :  { %v2181_v27 = vpop.f32.mrb[40].mxu0 }
0x3b68   :  { %v2182_v36 = vadd.f32 %v4125_v22, %v2181_v27  ;;  %v3113_v42 = vpop.f32.mrb[41].mxu0 }
0x3b69   :  { %v2184_v56 = vpop.f32.mrb[42].mxu0 }
0x3b6a   :  { %v3114_v57 = vpop.f32.mrb[43].mxu0  ;;  %v2187_v26 = vsel %vm193_vm3, %v2182_v36, -inf }
0x3b6b   :  { %2188 = vmax.xlane.f32.xlu0 %v2187_v26 }
0x3b81   :  { %2244 = vrot.lane.b32.xlu0 %v2095_v55, %s3383_s22 }
0x3bf8   :  { %v2189_v60 = vpop.xlane.xlu0 %2188 }
0x3bf9   :  { %v2190_v45 = vsub.f32 %v2182_v36, %v2189_v60  ;;  %v3337_v60 = vld [vmem:[%s4402_s3] sm:$0xff]  }
0x3bfb   :  { %v2191_v47 = vmul.f32 1.442695, %v2190_v45 }
0x3bfd   :  { %3294 = vpow2.f32 %v2191_v47 }
0x3c07   :  { %v3295_v18 = vpop.eup %3294 }
0x3c08   :  { %v2193_v62 = vsel %vm193_vm3, %v3295_v18, 0.0 }
0x3c09   :  { %2194 = vadd.xlane.f32.xlu1 %v2193_v62 }
0x3c96   :  { %v2195_v63 = vpop.xlane.xlu1 %2194 }
0x3c97   :  { %3296 = vrcp.f32 %v2195_v63 }
0x3ca1   :  { %v3297_v0 = vpop.eup %3296 }
0x3ca2   :  { %v2197_v19 = vmul.f32 %v3297_v0, %v3295_v18 }
0x3ca4   :  { %v2198_v8 = vpack.c.bf16 %v2197_v19, %v2197_v19 }
0x3ca6   :  { %3124 = vmatmul.mubr.msk.bf16.vlgmr.msra.gmra.mrb[44].mxu0 %vm193_vm3, %v2198_v8 }
0x3ca7   :  { %2325 = vmatpush1.bf16.msra.mxu0 %v3923_v6 }
0x3ca8   :  { %2326 = vmatprep.subr.bf16.mxu0 %v3380_v2 }
0x3cab   :  { %2327 = vmatpush1.bf16.msra.mxu0 %v3930_v7  ;;  %v2245_v7 = vpop.permute.xlu0 %2244 }
0x3cac   :  { %2328 = vmatprep.subr.bf16.mxu0 %v3380_v2 }
0x3caf   :  { %2329 = vmatpush1.bf16.msra.mxu0 %v3937_v9 }
0x3cb0   :  { %2330 = vmatprep.subr.bf16.mxu0 %v3380_v2 }
0x3cb3   :  { %2331 = vmatpush1.bf16.msra.mxu0 %v3944_v10 }
0x3cb4   :  { %2332 = vmatprep.subr.bf16.mxu0 %v3380_v2 }
0x3cb7   :  { %2333 = vmatpush1.bf16.msra.mxu0 %v3951_v11 }
0x3cb8   :  { %2334 = vmatprep.subr.bf16.mxu0 %v3380_v2 }
0x3cbb   :  { %2335 = vmatpush1.bf16.msra.mxu0 %v3958_v12 }
0x3cbc   :  { %2336 = vmatprep.subr.bf16.mxu0 %v3380_v2 }
0x3cbf   :  { %2337 = vmatpush1.bf16.msra.mxu0 %v3965_v39 }
0x3cc0   :  { %2338 = vmatprep.subr.bf16.mxu0 %v3380_v2 }
0x3cc3   :  { %2339 = vmatpush1.bf16.msra.mxu0 %v3972_v13 }
0x3cc4   :  { %2340 = vmatprep.subr.bf16.mxu0 %v3380_v2 }
0x3cc7   :  { %2341 = vmatpush1.bf16.msra.mxu0 %v3979_v14 }
0x3cc8   :  { %2342 = vmatprep.subr.bf16.mxu0 %v3380_v2 }
0x3ccb   :  { %2343 = vmatpush1.bf16.msra.mxu0 %v3986_v15 }
0x3ccc   :  { %2344 = vmatprep.subr.bf16.mxu0 %v3380_v2 }
0x3ccf   :  { %2345 = vmatpush1.bf16.msra.mxu0 %v3993_v24 }
0x3cd0   :  { %2346 = vmatprep.subr.bf16.mxu0 %v3380_v2 }
0x3cd3   :  { %2347 = vmatpush1.bf16.msra.mxu0 %v4000_v40 }
0x3cd4   :  { %3169 = vmatprep.subr.bf16.mxu0 %v3381_v4 }
0x3d79   :  { %v2236_v6 = vpop.f32.mrb[44].mxu0 }
0x3d7a   :  { %2242 = vst.msk [vmem:[#allocation2 + $0x8] sm:$0xff] %vm43_vm0, %v2236_v6  ;;  %v3125_v9 = vpop.f32.mrb[45].mxu0 }
0x3d7b   :  { %2247 = vst.msk [vmem:[#allocation2 + $0x8] sm:$0xff] %vm50_vm1, %v2245_v7  ;;  %v2239_v10 = vpop.f32.mrb[46].mxu0 }
0x3d7c   :  { %v3126_v11 = vpop.f32.mrb[47].mxu0 }
0x3d82   :  { %v2248_v12 = vld [vmem:[#allocation2 + $0x8] sm:$0xff] }
0x3d83   :  { %v2249_v39 = vpack.c.bf16 %v2248_v12, %v2248_v12 }
0x3d85   :  { %3136 = vmatmul.mubr.msk.bf16.vlgmr.msra.gmra.mrb[88].mxu1 %vm193_vm3, %v2249_v39  ;;  %2702 = vmatprep.mubr.msk.bf16.mxu0 %vm193_vm3, %v2249_v39 }
0x3d86   :  { %3140 = vmatpush3.bf16.msra.mxu1 %v4033_v58  ;;  %3143 = vmatprep.mubr.msk.bf16.mxu1 %vm3384_vm5, %v3381_v4 }
0x3d87   :  { %3141 = vmatprep.subr.bf16.mxu1 %v3381_v4 }
0x3d8a   :  { %3142 = vmatpush3.bf16.msra.mxu1 %v4042_v59 }
0x3d8b   :  { %3147 = vmatprep.subr.bf16.mxu1 %v3381_v4 }
0x3e58   :  { %v2287_v2 = vpop.f32.mrb[88].mxu1 }
0x3e59   :  { %v2288_v13 = vadd.f32 %v4169_v25, %v2287_v2  ;;  %v3137_v14 = vpop.f32.mrb[89].mxu1 }
0x3e5a   :  { %v2290_v15 = vpop.f32.mrb[90].mxu1 }
0x3e5b   :  { %2294 = vst [vmem:[#allocation3 + $0x30] sm:$0xff] %v2288_v13  ;;  %2295 = vmax.xlane.f32.xlu1 %v2288_v13  ;;  %v3138_v24 = vpop.f32.mrb[91].mxu1 }
0x3ee8   :  { %v2296_v40 = vpop.xlane.xlu1 %2295 }
0x3ee9   :  { %vm2297_vm10 = vcmp.ge.f32.partialorder %v2288_v13, %v2296_v40 }
0x3eea   :  { %v2298_v58 = vsel %vm2297_vm10, %v3539_v17, 128 }
0x3eeb   :  { %v2300_v20 = vshra.s32 %v2298_v58, 16  ;;  %v2299_v23 = vand.u32 65535, %v2298_v58 }
0x3eed   :  { %v2302_v16 = vcvt.s32.f32 %v2300_v20  ;;  %v2301_v59 = vcvt.s32.f32 %v2299_v23 }
0x3eef   :  { %2303 = vmin.xlane.f32.xlu1 %v2302_v16 }
0x3f7c   :  { %v2304_v1 = vpop.xlane.xlu1 %2303 }
0x3f7d   :  { %vm2305_vm11 = vcmp.eq.f32.partialorder %v2302_v16, %v2304_v1  ;;  %v2310_v5 = vcvt.f32.s32 %v2304_v1 }
0x3f7e   :  { %v2306_v3 = vsel %vm2305_vm11, %v2301_v59, inf }
0x3f7f   :  { %2307 = vmin.xlane.f32.xlu1 %v2306_v3  ;;  %v2311_v33 = vshll.u32 %v2310_v5, 16 }
0x400c   :  { %v2308_v32 = vpop.xlane.xlu1 %2307 }
0x400d   :  { %v2309_v41 = vcvt.f32.s32 %v2308_v32 }
0x400f   :  { %v2312_v43 = vadd.s32 %v2311_v33, %v2309_v41 }
0x4011   :  { %vm2313_vm12 = vcmp.eq.s32.totalorder %v3539_v17, %v2312_v43 }
0x4012   :  { %vm3353_vm13 = vmpackc.low %vm2313_vm12, %vm2313_vm12 }
0x4013   :  { %3354 = vmatmul.mubr.msk.bf16.vlgmr.msra.gmra.mrb[48].mxu0 %vm3353_vm13, %v3382_v21 }
0x4014   :  { %3170 = vmatpush3.bf16.msra.mxu0 %v4064_v52  ;;  %3177 = vmatprep.mubr.msk.bf16.mxu0 %vm3384_vm5, %v3381_v4 }
0x4015   :  { %3171 = vmatprep.subr.bf16.mxu0 %v3381_v4 }
0x4018   :  { %3172 = vmatpush3.bf16.msra.mxu0 %v4073_v34 }
0x4019   :  { %3173 = vmatprep.subr.bf16.mxu0 %v3381_v4 }
0x401c   :  { %3174 = vmatpush3.bf16.msra.mxu0 %v4080_v35 }
0x401d   :  { %3175 = vmatprep.subr.bf16.mxu0 %v3381_v4 }
0x4020   :  { %3176 = vmatpush3.bf16.msra.mxu0 %v4087_v44 }
0x40e6   :  { %v2358_v55 = vpop.f32.mrb[48].mxu0 }
0x40e7   :  { %v2359_v21 = vadd.f32 %v4049_v61, %v2358_v55  ;;  %v2360_v29 = vpop.f32.mrb[49].mxu0 }
0x40e8   :  { %v2361_v52 = vpop.f32.mrb[50].mxu0 }
0x40e9   :  { %3298 = vtanh.f32 %v2359_v21  ;;  %v2362_v46 = vpop.f32.mrb[51].mxu0  ;;  %v2703_v51 = vmul.f32 -1.442695, %v2359_v21 }
0x40eb   :  { %3300 = vpow2.f32 %v2703_v51 }
0x40f3   :  { %v3299_v28 = vpop.eup %3298 }
0x40f4   :  { %2373 = vrot.lane.b32.xlu1 %v3299_v28, %s3383_s22 }
0x40f5   :  { %v3301_v34 = vpop.eup %3300 }
0x40f6   :  { %v2367_v38 = vadd.f32 1.0, %v3301_v34 }
0x40f8   :  { %3302 = vrcp.f32 %v2367_v38 }
0x4102   :  { %v3303_v35 = vpop.eup %3302 }
0x4103   :  { %v2371_v44 = vmul.f32 %v3303_v35, %v4271_v37  ;;  %v3338_v37 = vld [vmem:[%s4402_s3 + $0x8] sm:$0xff]   ;;  %s3385_s3 = smov [#allocation3]  }
0x4166   :  { %v2374_v53 = vpop.permute.xlu1 %2373 }
0x4167   :  { %v2376_v54 = vmul.f32 %v3303_v35, %v2374_v53 }
0x4169   :  { %2378 = vrot.lane.b32.xlu0 %v2376_v54, %s3379_s17 }
0x41db   :  { %v2379_v61 = vpop.permute.xlu0 %2378 }
0x41dc   :  { %v2381_v27 = vadd.f32 %v2379_v61, %v2371_v44 }
0x41de   :  { %3304 = vtanh.f32 %v2381_v27 }
0x41e8   :  { %v3305_v36 = vpop.eup %3304 }
0x41e9   :  { %2384 = vrot.lane.b32.xlu0 %v3305_v36, %s3383_s22 }
0x425b   :  { %v2385_v42 = vpop.permute.xlu0 %2384 }
0x425c   :  { %v2387_v56 = vmul.f32 %v3303_v35, %v2385_v42 }
0x425e   :  { %v2388_v57 = vpack.c.bf16 %v2387_v56, %v2387_v56 }
0x4260   :  { %2390 = vrot.lane.b32.xlu0 %v2388_v57, %s3379_s17  ;;  %s2614_s17 = sshll.u32 %s3385_s3, 4  ;;  %s2615_s17 = int_to_ptr.vmem [resolvable:$true] %s2614_s17 }
0x4261   :  { %p3360_p1 = scmp.lt.s32.totalorder %s2615_s17, %s2615_s17 }
0x42d2   :  { %v2391_v26 = vpop.permute.xlu0 %2390 }
0x42d3   :  { %3144 = vmatmul.mubr.msk.bf16.vlgmr.msra.gmra.mrb[92].mxu1 %vm43_vm0, %v2391_v26 }
0x42d4   :  { %3148 = vmatpush3.bf16.msra.mxu1 %v3337_v60  ;;  %3153 = vmatprep.mubr.msk.bf16.mxu1 %vm3384_vm5, %v3381_v4 }
0x42d5   :  { %3149 = vmatprep.subr.bf16.mxu1 %v3381_v4 }
0x42d8   :  { %3150 = vmatpush3.bf16.msra.mxu1 %v3338_v37 }
0x42d9   :  { %3151 = vmatprep.subr.bf16.mxu1 %v3381_v4 }
0x42dc   :  { %3152 = vmatpush3.bf16.msra.mxu1 %v3618_v49 }
0x42dd   :  { %3157 = vmatprep.subr.bf16.mxu1 %v3381_v4 }
0x43a6   :  { %v2429_v45 = vpop.f32.mrb[92].mxu1 }
0x43a7   :  { %v2435_v47 = vpack.c.bf16 %v2429_v45, %v2429_v45  ;;  %v3145_v18 = vpop.f32.mrb[93].mxu1 }
0x43a8   :  { %v2432_v62 = vpop.f32.mrb[94].mxu1 }
0x43a9   :  { %v3146_v63 = vpop.f32.mrb[95].mxu1  ;;  %3154 = vmatmul.mubr.msk.bf16.vlgmr.msra.gmra.mrb[96].mxu1 %vm340_vm7, %v2435_v47 }
0x43aa   :  { %3158 = vmatpush3.bf16.msra.mxu1 %v4095_v30  ;;  %3165 = vmatprep.mubr.msk.bf16.mxu1 %vm3384_vm5, %v3381_v4 }
0x43ab   :  { %3159 = vmatprep.subr.bf16.mxu1 %v3381_v4 }
0x43ae   :  { %3160 = vmatpush3.bf16.msra.mxu1 %v4104_v48 }
0x43af   :  { %3161 = vmatprep.subr.bf16.mxu1 %v3381_v4 }
0x43b2   :  { %3162 = vmatpush3.bf16.msra.mxu1 %v4111_v50 }
0x43b3   :  { %3163 = vmatprep.subr.bf16.mxu1 %v3381_v4 }
0x43b6   :  { %3164 = vmatpush3.bf16.msra.mxu1 %v4118_v31 }
0x447c   :  { %v2473_v49 = vpop.f32.mrb[96].mxu1 }
0x447d   :  { %v2474_v0 = vadd.f32 %v4125_v22, %v2473_v49  ;;  %v3155_v19 = vpop.f32.mrb[97].mxu1 }
0x447e   :  { %v2476_v30 = vpop.f32.mrb[98].mxu1 }
0x447f   :  { %v3156_v8 = vpop.f32.mrb[99].mxu1  ;;  %v2479_v6 = vsel %vm193_vm3, %v2474_v0, -inf }
0x4480   :  { %2480 = vmax.xlane.f32.xlu0 %v2479_v6 }
0x4496   :  { %2536 = vrot.lane.b32.xlu0 %v2387_v56, %s3383_s22  ;;  %s3355_s22 = scalar_lea.vmem %s2615_s17, 1024 }
0x4497   :  { %p3356_p0 = scmp.ne.s32.totalorder %s2615_s17, %s3355_s22  ;;  %p3361_p2 = scmp.lt.s32.totalorder %s3355_s22, %s3355_s22 }
0x4499   :  { %p3362_p3 = por %p3361_p2, %p3360_p1 }
0x449b   :  { %p3363_p4 = pnand %p3362_p3, %p3356_p0 }
0x450d   :  { %v2481_v48 = vpop.xlane.xlu0 %2480 }
0x450e   :  { %v2482_v7 = vsub.f32 %v2474_v0, %v2481_v48 }
0x4510   :  { %v2483_v9 = vmul.f32 1.442695, %v2482_v7 }
0x4511   :  { %v2537_v39 = vpop.permute.xlu0 %2536 }
0x4512   :  { %3306 = vpow2.f32 %v2483_v9 }
0x451c   :  { %v3307_v50 = vpop.eup %3306 }
0x451d   :  { %v2485_v4 = vsel %vm193_vm3, %v3307_v50, 0.0 }
0x451e   :  { %2486 = vadd.xlane.f32.xlu1 %v2485_v4 }
0x45ab   :  { %v2487_v31 = vpop.xlane.xlu1 %2486 }
0x45ac   :  { %3308 = vrcp.f32 %v2487_v31 }
0x45b6   :  { %v3309_v10 = vpop.eup %3308 }
0x45b7   :  { %v2489_v22 = vmul.f32 %v3309_v10, %v3307_v50 }
0x45b9   :  { %v2490_v11 = vpack.c.bf16 %v2489_v22, %v2489_v22 }
0x45bb   :  { %3166 = vmatmul.mubr.msk.bf16.vlgmr.msra.gmra.mrb[100].mxu1 %vm193_vm3, %v2490_v11 }
0x468e   :  { %v2528_v12 = vpop.f32.mrb[100].mxu1 }
0x468f   :  { %2534 = vst.msk [vmem:[#allocation2 + $0x8] sm:$0xff] %vm43_vm0, %v2528_v12  ;;  %v3167_v2 = vpop.f32.mrb[101].mxu1 }
0x4690   :  { %2539 = vst.msk [vmem:[#allocation2 + $0x8] sm:$0xff] %vm50_vm1, %v2537_v39  ;;  %v2531_v13 = vpop.f32.mrb[102].mxu1 }
0x4691   :  { %v3168_v14 = vpop.f32.mrb[103].mxu1 }
0x4697   :  { %v2540_v15 = vld [vmem:[#allocation2 + $0x8] sm:$0xff] }
0x4698   :  { %v2541_v24 = vpack.c.bf16 %v2540_v15, %v2540_v15 }
0x469a   :  { %3178 = vmatmul.mubr.msk.bf16.vlgmr.msra.gmra.mrb[52].mxu0 %vm193_vm3, %v2541_v24 }
0x476d   :  { %v2579_v40 = vpop.f32.mrb[52].mxu0 }
0x476e   :  { %v2580_v58 = vadd.f32 %v4169_v25, %v2579_v40  ;;  %v3179_v20 = vpop.f32.mrb[53].mxu0 }
0x476f   :  { %v2582_v16 = vpop.f32.mrb[54].mxu0 }
0x4770   :  { %2586 = vst [vmem:[#allocation3 + $0x38] sm:$0xff] %v2580_v58  ;;  %2587 = vmax.xlane.f32.xlu1 %v2580_v58  ;;  %v3180_v23 = vpop.f32.mrb[55].mxu0 }
0x47fd   :  { %v2588_v1 = vpop.xlane.xlu1 %2587 }
0x47fe   :  { %vm2589_vm5 = vcmp.ge.f32.partialorder %v2580_v58, %v2588_v1 }
0x47ff   :  { %v2590_v59 = vsel %vm2589_vm5, %v3539_v17, 128 }
0x4800   :  { %v2592_v3 = vshra.s32 %v2590_v59, 16  ;;  %v2591_v32 = vand.u32 65535, %v2590_v59 }
0x4802   :  { %v2594_v5 = vcvt.s32.f32 %v2592_v3  ;;  %v2593_v41 = vcvt.s32.f32 %v2591_v32 }
0x4804   :  { %2595 = vmin.xlane.f32.xlu1 %v2594_v5 }
0x4891   :  { %v2596_v33 = vpop.xlane.xlu1 %2595 }
0x4892   :  { %vm2597_vm0 = vcmp.eq.f32.partialorder %v2594_v5, %v2596_v33 }
0x4893   :  { %v2598_v43 = vsel %vm2597_vm0, %v2593_v41, inf }
0x4894   :  { %2599 = vmin.xlane.f32.xlu1 %v2598_v43 }
0x4895   :  { %3366 = shalt.err (!%p3363_p4)
}
0x4896   :  { %s3367_s25 = scalar_lea.hbm %s4409_s10, 1024 }
0x4897   :  { %p3368_p5 = scmp.ne.s32.totalorder %s4409_s10, %s3367_s25  ;;  %p3371_p6 = scmp.lt.u32.totalorder %s3367_s25, %s4409_s10 }
0x4899   :  { %p3373_p7 = pnand %p3371_p6, %p3368_p5 }
0x489b   :  { %3376 = shalt.err (!%p3373_p7)
}
0x489c   :  { %s3386_s28 = smov 128   ;;  %s3387_s29 = smov 8  }
0x489d   :  { %2620 = dma.vmem_to_hbm [thread:$0]  %s2615_s17, 1024, %s4409_s10, [#allocation4], %s3386_s28, %s3386_s28, %s3387_s29  }
0x4921   :  { %v2600_v17 = vpop.xlane.xlu1 %2599 }
0x4922   :  { %3377 = dma.done.wait [#allocation4], 1024  }
0x4923   :  { %3378 = vsyncadd [#allocation4], 4294966272 }
0x4924   :  { %2624 = vsyncpa [#allocation4], 1 }

</bundles_post_ra>
